<compile_context>
chip_gen: v5e
topology: v5e:2x2
jax: 0.10.0
libtpu: 0.0.40
codegen_flags: <defaults>
</compile_context>

<pallas_src>
import functools
import math

import numpy as np

import jax
import jax.numpy as jnp
from jax.experimental import pallas as pl
from jax.experimental.pallas import tpu as pltpu

_BN_EPS = 1e-5
_BN_SCALE = float(1.0 / np.sqrt(1.0 + _BN_EPS))


# ----------------------------------------------------------------------------
# Offline constant builders (numpy).  Feature maps live in a lane-dense
# (N*H, W*C) layout; every Conv2d / ConvTranspose2d becomes
#     Y = concat_dy(R_dy @ X) @ Bcat + bias_row
# ----------------------------------------------------------------------------

def _gather_rows(n, h_out, h_in, iy_fn):
    R = np.zeros((n * h_out, n * h_in), np.float32)
    for b in range(n):
        for oy in range(h_out):
            iy = iy_fn(oy)
            if iy is not None and 0 <= iy < h_in:
                R[b * h_out + oy, b * h_in + iy] = 1.0
    return R


def _conv_Bcat(w, w_in, w_out, stride):
    """w: (3, 3, Cin, Cout) -> (3*Win*Cin, Wout*Cout)."""
    kh, kw, cin, cout = w.shape
    blocks = []
    for dy in range(kh):
        B = np.zeros((w_in * cin, w_out * cout), np.float32)
        for ox in range(w_out):
            for dx in range(kw):
                ix = stride * ox + dx - 1
                if 0 <= ix < w_in:
                    B[ix * cin:(ix + 1) * cin, ox * cout:(ox + 1) * cout] += w[dy, dx]
        blocks.append(B)
    return np.concatenate(blocks, axis=0)


def _deconv_Bcat(wt, w_in, w_out):
    """wt: PyTorch ConvTranspose2d weight (Cin, Cout, 3, 3) -> (3*Win*Cin, Wout*Cout)."""
    cin, cout, kh, kw = wt.shape
    blocks = []
    for ky in range(kh):
        B = np.zeros((w_in * cin, w_out * cout), np.float32)
        for ix in range(w_in):
            for kx in range(kw):
                ox = 2 * ix - 1 + kx                       # ox = stride*ix - pad + kx
                if 0 <= ox < w_out:
                    B[ix * cin:(ix + 1) * cin, ox * cout:(ox + 1) * cout] += wt[:, :, ky, kx]
        blocks.append(B)
    return np.concatenate(blocks, axis=0)


def _proj_B(w, w_in, w_out, stride):
    """1x1 conv. w: (Cin, Cout) -> (Win*Cin, Wout*Cout)."""
    cin, cout = w.shape
    B = np.zeros((w_in * cin, w_out * cout), np.float32)
    for ox in range(w_out):
        ix = stride * ox
        if ix < w_in:
            B[ix * cin:(ix + 1) * cin, ox * cout:(ox + 1) * cout] = w
    return B


class _Packer:
    """Packs many small constant matrices into one (rows, 128) slab so the fused kernel
    needs a couple of HBM->VMEM copies instead of ~90 tiny per-leaf DMAs."""

    def __init__(self, dtype, lanes=128, align=8):
        self.dtype, self.lanes, self.align = dtype, lanes, align
        self._pieces, self.meta, self._rows = [], {}, 0

    def add(self, name, arr):
        arr = np.asarray(arr, np.float32)
        r, c = arr.shape
        assert c <= self.lanes, (name, arr.shape)
        pad_r = (-r) % self.align
        buf = np.zeros((r + pad_r, self.lanes), np.float32)
        buf[:r, :c] = arr
        self.meta[name] = (self._rows, r, c)
        self._pieces.append(buf)
        self._rows += r + pad_r

    def finalize(self):
        return jnp.asarray(np.concatenate(self._pieces, axis=0), self.dtype)


# ----------------------------------------------------------------------------
# Parameters (PyTorch-equivalent layouts, initialised in-script).
# ----------------------------------------------------------------------------

def init_params(key, chn, heads):
    keys = iter(jax.random.split(key, 64))

    def nrm(shape, s=0.1):
        return jax.random.normal(next(keys), shape, jnp.float32) * s

    def bias(c):
        return nrm((c,), 0.01)

    def block_b_p(ci, co):
        return dict(proj_w=nrm((ci, co)), proj_b=bias(co),
                    res_w1=nrm((3, 3, ci, co)), res_b1=bias(co),
                    res_w2=nrm((3, 3, co, co)), res_b2=bias(co))

    def block_e_p(ci, co):
        return dict(dw=nrm((ci, co, 3, 3)), db=bias(co),    # PyTorch ConvTranspose2d layout
                    res_w1=nrm((3, 3, co, co)), res_b1=bias(co),
                    res_w2=nrm((3, 3, co, co)), res_b2=bias(co))

    d = chn * 4
    return dict(
        in_w=nrm((3, 3, 1, chn)), in_b=bias(chn),
        b1=block_b_p(chn, chn),
        b2=block_b_p(chn, chn * 2),
        b3=block_b_p(chn * 2, chn * 4),
        bot=dict(wq=nrm((d, d)), bq=bias(d), wk=nrm((d, d)), bk=bias(d),
                 wv=nrm((d, d)), bv=bias(d), wo=nrm((d, d)), bo=bias(d)),
        b4=block_e_p(chn * 4, chn * 2),
        b5=block_e_p(chn * 2, chn),
        out=dict(w=nrm((chn, 2)), b=bias(2)))


# ----------------------------------------------------------------------------
# Build the two constant slabs + static offset metadata.
# ----------------------------------------------------------------------------

def build_constants(params, N, H, W, chn, heads):
    p = jax.tree_util.tree_map(lambda a: np.asarray(a, np.float32), params)
    H1, W1, C1 = H, W, chn
    H2, W2, C2 = H // 2, W // 2, chn * 2
    H3, W3, C3 = H // 4, W // 4, chn * 4
    dh = C3 // heads
    L, NL, NH3 = H3 * W3, N * H3 * W3, N * H3

    wp = _Packer(jnp.bfloat16, align=16)     # all MXU operands
    fp = _Packer(jnp.float32, align=8)       # bias rows + attention mask

    def bias_row(name, b, w_out):
        fp.add(name, np.tile(b, w_out)[None, :])

    # shared row-gather matrices (one set per resolution / transition)
    for tag, h in (('R1', H1), ('R2', H2), ('R3', H3)):          # stride-1 3x3
        wp.add(tag + '/up', _gather_rows(N, h, h, lambda oy: oy - 1))
        wp.add(tag + '/dn', _gather_rows(N, h, h, lambda oy: oy + 1))
    for tag, ho, hi in (('Rs12', H2, H1), ('Rs23', H3, H2)):     # stride-2 3x3 + 1x1 proj
        for dy in range(3):
            wp.add(f'{tag}/{dy}', _gather_rows(N, ho, hi, lambda oy, dy=dy: 2 * oy + dy - 1))
        wp.add(tag + '/p', _gather_rows(N, ho, hi, lambda oy: 2 * oy))
    for tag, hi in (('Rd32', H3), ('Rd21', H2)):                 # ConvTranspose2d, stride 2
        for ky in range(3):
            def iy(oy, ky=ky):
                t = oy + 1 - ky
                return t // 2 if (t >= 0 and t % 2 == 0) else None
            wp.add(f'{tag}/{ky}', _gather_rows(N, 2 * hi, hi, iy))

    def add_conv3(name, w, b, w_in, w_out, stride):
        wp.add(name + '/B', _conv_Bcat(w, w_in, w_out, stride))
        bias_row(name + '/b', b, w_out)

    def add_proj(name, w, b, w_in, w_out, stride):
        wp.add(name + '/B', _proj_B(w, w_in, w_out, stride))
        bias_row(name + '/b', b, w_out)

    def add_deconv(name, wt, b, w_in):
        wp.add(name + '/B', _deconv_Bcat(wt, w_in, 2 * w_in))
        bias_row(name + '/b', b, 2 * w_in)

    # input conv: 1 input channel, embedded in the chn-channel zero-padded input layout
    w_in_wide = np.zeros((3, 3, C1, C1), np.float32)
    w_in_wide[:, :, 0, :] = p['in_w'][:, :, 0, :]
    add_conv3('in', w_in_wide, p['in_b'], W1, W1, 1)

    # encoder
    add_proj('b1/proj', p['b1']['proj_w'], p['b1']['proj_b'], W1, W1, 1)
    add_conv3('b1/r1', p['b1']['res_w1'], p['b1']['res_b1'], W1, W1, 1)
    add_conv3('b1/r2', p['b1']['res_w2'], p['b1']['res_b2'], W1, W1, 1)

    add_proj('b2/proj', p['b2']['proj_w'], p['b2']['proj_b'], W1, W2, 2)
    add_conv3('b2/r1', p['b2']['res_w1'], p['b2']['res_b1'], W1, W2, 2)
    add_conv3('b2/r2', p['b2']['res_w2'], p['b2']['res_b2'], W2, W2, 1)

    add_proj('b3/proj', p['b3']['proj_w'], p['b3']['proj_b'], W2, W3, 2)
    add_conv3('b3/r1', p['b3']['res_w1'], p['b3']['res_b1'], W2, W3, 2)
    add_conv3('b3/r2', p['b3']['res_w2'], p['b3']['res_b2'], W3, W3, 1)

    # attention bottleneck: token pack, fused QKV, fused unpack+output projection
    ap = p['bot']
    uP = np.zeros((W3 * NL, NH3), np.float32)
    pP = np.zeros((W3 * NH3, NL), np.float32)
    for wi in range(W3):
        for b in range(N):
            for hh in range(H3):
                uP[wi * NL + b * L + hh * W3 + wi, b * H3 + hh] = 1.0
                pP[wi * NH3 + b * H3 + hh, b * L + hh * W3 + wi] = 1.0
    wp.add('att/uP', uP)
    wp.add('att/pP', pP)

    w_qkv = np.concatenate([ap['wq'], ap['wk'], ap['wv']], axis=1)        # (C3, 3*C3)
    w_qkv_cat = np.zeros((W3 * W3 * C3, 3 * C3), np.float32)
    for wi in range(W3):
        base = wi * (W3 * C3) + wi * C3
        w_qkv_cat[base:base + C3, :] = w_qkv
    wp.add('att/Wqkv', w_qkv_cat)
    fp.add('att/bqkv', np.concatenate([ap['bq'], ap['bk'], ap['bv']])[None, :])

    w_o_cat = np.zeros((W3 * C3, W3 * C3), np.float32)                    # block-diag Wo
    for wi in range(W3):
        w_o_cat[wi * C3:(wi + 1) * C3, wi * C3:(wi + 1) * C3] = ap['wo']
    wp.add('att/Wo', w_o_cat)
    bias_row('att/bo', ap['bo'], W3)

    mask = np.full((NL, NL), -1e9, np.float32)                            # no cross-image attn
    for b in range(N):
        mask[b * L:(b + 1) * L, b * L:(b + 1) * L] = 0.0
    fp.add('att/mask', mask)

    # decoder
    add_deconv('b4/dc', p['b4']['dw'], p['b4']['db'], W3)
    add_conv3('b4/r1', p['b4']['res_w1'], p['b4']['res_b1'], W2, W2, 1)
    add_conv3('b4/r2', p['b4']['res_w2'], p['b4']['res_b2'], W2, W2, 1)

    add_deconv('b5/dc', p['b5']['dw'], p['b5']['db'], W2)
    add_conv3('b5/r1', p['b5']['res_w1'], p['b5']['res_b1'], W1, W1, 1)
    add_conv3('b5/r2', p['b5']['res_w2'], p['b5']['res_b2'], W1, W1, 1)

    # output head: both class maps from one matmul -> (N*H, 2*W) logits
    ow, ob = p['out']['w'], p['out']['b']
    Bout = np.zeros((W1 * C1, 2 * W1), np.float32)
    for wi in range(W1):
        for cls in range(2):
            Bout[wi * C1:(wi + 1) * C1, cls * W1 + wi] = ow[:, cls]
    wp.add('out/B', Bout)
    bout = np.zeros((1, 2 * W1), np.float32)
    bout[0, :W1], bout[0, W1:] = ob[0], ob[1]
    fp.add('out/b', bout)

    dims = dict(W1=W1, W3=W3, C3=C3, heads=heads, dh=dh, NL=NL, NH3=NH3)
    return wp.finalize(), fp.finalize(), wp.meta, fp.meta, dims


# ----------------------------------------------------------------------------
# The fused Pallas kernel (single invocation, everything resident in VMEM).
# ----------------------------------------------------------------------------

def _make_kernel(wmeta, fmeta, dims):
    bf16, f32 = jnp.bfloat16, jnp.float32
    W1, W3, C3 = dims['W1'], dims['W3'], dims['C3']
    heads, dh, NL, NH3 = dims['heads'], dims['dh'], dims['NL'], dims['NH3']
    scale = 1.0 / math.sqrt(dh)

    def kernel(x_ref, w_ref, f_ref, out_ref):
        def Wc(name):                               # bf16 matmul constant (static slab slice)
            off, r, c = wmeta[name]
            return w_ref[off:off + r, 0:c]

        def Fc(name):                               # f32 bias row / mask
            off, r, c = fmeta[name]
            return f_ref[off:off + r, 0:c]

        def mm(a, b):                               # bf16 MXU operands, f32 accumulation
            return jnp.dot(a.astype(bf16), b.astype(bf16), preferred_element_type=f32)

        def mm_nt(a, b):                            # a @ b.T on the MXU
            return jax.lax.dot_general(a.astype(bf16), b.astype(bf16),
                                       (((1,), (1,)), ((), ())),
                                       preferred_element_type=f32)

        def bn_relu6(x):                            # BatchNorm2d(eval, default stats) + ReLU6
            return jnp.clip(x * _BN_SCALE, 0.0, 6.0)

        def conv3(x, rnames, tag):                  # one K-concatenated matmul per 3x3 conv
            parts = [x if r is None else mm(Wc(r), x) for r in rnames]
            return mm(jnp.concatenate(parts, axis=1), Wc(tag + '/B')) + Fc(tag + '/b')

        def conv1x1(x, tag, rname):
            h = x if rname is None else mm(Wc(rname), x)
            return mm(h, Wc(tag + '/B')) + Fc(tag + '/b')

        def block_b(x, tag, r1_names, r2_names, proj_r):
            xt = bn_relu6(x)
            shortcut = conv1x1(xt, tag + '/proj', proj_r)
            r = conv3(xt, r1_names, tag + '/r1')
            r = bn_relu6(r)
            r = conv3(r, r2_names, tag + '/r2')
            return r + shortcut

        def block_c(x):
            xb = bn_relu6(x)
            uP, pP = Wc('att/uP'), Wc('att/pP')
            # (N*H, W*C) -> token-major, folded into one K-concatenated QKV matmul
            g = jnp.concatenate([mm(uP[w * NL:(w + 1) * NL, :], xb) for w in range(W3)],
                                axis=1)
            qkv = mm(g, Wc('att/Wqkv')) + Fc('att/bqkv')            # (N*L, 3*C)
            mask = Fc('att/mask')
            outs = []
            for h in range(heads):
                q = qkv[:, h * dh:(h + 1) * dh]
                k = qkv[:, C3 + h * dh:C3 + (h + 1) * dh]
                v = qkv[:, 2 * C3 + h * dh:2 * C3 + (h + 1) * dh]
                s = mm_nt(q, k) * scale + mask
                m = jnp.max(s, axis=-1, keepdims=True)
                pr = jnp.exp(s - m)
                denom = jnp.sum(pr, axis=-1, keepdims=True)
                outs.append(mm(pr, v) / denom)
            ph = jnp.concatenate(outs, axis=1)                      # (N*L, C)
            # token-major -> (N*H, W*C); output projection folded into block-diag Wo
            gp = jnp.concatenate([mm(pP[w * NH3:(w + 1) * NH3, :], ph) for w in range(W3)],
                                 axis=1)
            att = mm(gp, Wc('att/Wo')) + Fc('att/bo')
            return xb + att

        def block_e(x, skip, tag, dc_names, r_names):
            sk = conv3(x, dc_names, tag + '/dc') + skip             # ConvTranspose2d + skip
            r = bn_relu6(sk)
            r = conv3(r, r_names, tag + '/r1')
            r = bn_relu6(r)
            r = conv3(r, r_names, tag + '/r2')
            return sk + r

        R1 = ('R1/up', None, 'R1/dn')
        R2 = ('R2/up', None, 'R2/dn')
        R3 = ('R3/up', None, 'R3/dn')
        Rs12 = ('Rs12/0', 'Rs12/1', 'Rs12/2')
        Rs23 = ('Rs23/0', 'Rs23/1', 'Rs23/2')
        Rd32 = ('Rd32/0', 'Rd32/1', 'Rd32/2')
        Rd21 = ('Rd21/0', 'Rd21/1', 'Rd21/2')

        x0 = x_ref[...]                                             # (N*H, W*C1) f32
        feat = conv3(x0, R1, 'in')
        b1 = block_b(feat, 'b1', R1, R1, None)
        b2 = block_b(b1, 'b2', Rs12, R2, 'Rs12/p')
        b3 = block_b(b2, 'b3', Rs23, R3, 'Rs23/p')
        bot = block_c(b3)
        b4 = block_e(bot, b2, 'b4', Rd32, R2)
        b5 = block_e(b4, b1, 'b5', Rd21, R1)

        y = bn_relu6(b5)                                            # Dropout2d(0.5): identity
        logits = mm(y, Wc('out/B')) + Fc('out/b')                   # (N*H, 2*W)
        l0, l1 = logits[:, :W1], logits[:, W1:]
        m = jnp.maximum(l0, l1)
        z0, z1 = l0 - m, l1 - m
        lse = jnp.log(jnp.exp(z0) + jnp.exp(z1))
        out_ref[...] = jnp.concatenate([z0 - lse, z1 - lse], axis=1)   # log_softmax, one store

    return kernel


def make_forward(w_slab, f_slab, wmeta, fmeta, dims, N, H, W, chn):
    # TODO(synk): for multi-image serving on v7x, add a leading "parallel" grid axis over
    #             batched calls so the second TensorCore gets work; a single tiny call stays
    #             on one core on purpose.
    kernel = _make_kernel(wmeta, fmeta, dims)
    vspec = pl.BlockSpec(memory_space=pltpu.MemorySpace.VMEM)
    call = pl.pallas_call(
        kernel,
        out_shape=jax.ShapeDtypeStruct((N * H, 2 * W), jnp.float32),
        in_specs=[vspec, vspec, vspec],
        out_specs=vspec,
    )

    def forward(x_nchw, w_slab, f_slab):
        xh = jnp.transpose(x_nchw, (0, 2, 3, 1))                        # (N,H,W,1)
        xh = jnp.pad(xh, ((0, 0), (0, 0), (0, 0), (0, chn - 1)))        # channel-pad to chn
        x_lay = xh.reshape(N * H, W * chn)                              # lane-dense layout
        out = call(x_lay, w_slab, f_slab)                               # (N*H, 2*W)
        return out.reshape(N, H, 2, W).transpose(0, 2, 1, 3).reshape(N, 2, H * W)

    return forward


# ----------------------------------------------------------------------------
# Pure-XLA reference of the same forward pass (in-script verification only).
# ----------------------------------------------------------------------------

def reference_forward(x_nchw, p, heads):
    f32, bf16 = jnp.float32, jnp.bfloat16

    def bn_relu6(x):
        return jnp.clip(x * _BN_SCALE, 0.0, 6.0)

    def conv(x, w, b, stride=1, pad=1):
        y = jax.lax.conv_general_dilated(
            x.astype(bf16), w.astype(bf16), (stride, stride), [(pad, pad), (pad, pad)],
            dimension_numbers=('NHWC', 'HWIO', 'NHWC'), preferred_element_type=f32)
        return y + b

    def conv1x1(x, w, b, stride=1):
        return conv(x, w.reshape(1, 1, *w.shape), b, stride, 0)

    def deconv(x, wt, b):
        w = jnp.transpose(wt, (2, 3, 0, 1))[::-1, ::-1]
        y = jax.lax.conv_general_dilated(
            x.astype(bf16), w.astype(bf16), (1, 1), [(1, 2), (1, 2)], lhs_dilation=(2, 2),
            dimension_numbers=('NHWC', 'HWIO', 'NHWC'), preferred_element_type=f32)
        return y + b

    def attention(x, ap):
        n, hh, ww, cc = x.shape
        L, dh = hh * ww, cc // heads
        t = x.reshape(n, L, cc)

        def proj(wm, bm):
            return jnp.dot(t.astype(bf16), wm.astype(bf16), preferred_element_type=f32) + bm

        def split(u):
            return u.reshape(n, L, heads, dh).transpose(0, 2, 1, 3)

        q = split(proj(ap['wq'], ap['bq']))
        k = split(proj(ap['wk'], ap['bk']))
        v = split(proj(ap['wv'], ap['bv']))
        s = jax.lax.dot_general(q.astype(bf16), k.astype(bf16),
                                (((3,), (3,)), ((0, 1), (0, 1))),
                                preferred_element_type=f32) / math.sqrt(dh)
        pr = jax.nn.softmax(s, axis=-1)
        o = jax.lax.dot_general(pr.astype(bf16), v.astype(bf16),
                                (((3,), (2,)), ((0, 1), (0, 1))),
                                preferred_element_type=f32)
        o = o.transpose(0, 2, 1, 3).reshape(n, L, cc)
        o = jnp.dot(o.astype(bf16), ap['wo'].astype(bf16), preferred_element_type=f32) + ap['bo']
        return o.reshape(n, hh, ww, cc)

    def block_b(x, bp, stride):
        xt = bn_relu6(x)
        sc = conv1x1(xt, bp['proj_w'], bp['proj_b'], stride)
        r = conv(xt, bp['res_w1'], bp['res_b1'], stride, 1)
        r = bn_relu6(r)
        r = conv(r, bp['res_w2'], bp['res_b2'], 1, 1)
        return r + sc

    def block_e(x, skip, bp):
        d = deconv(x, bp['dw'], bp['db'])
        sk = d + skip
        y = bn_relu6(sk)
        r = conv(y, bp['res_w1'], bp['res_b1'], 1, 1)
        r = bn_relu6(r)
        r = conv(r, bp['res_w2'], bp['res_b2'], 1, 1)
        return sk + r

    x = jnp.transpose(x_nchw, (0, 2, 3, 1))
    feat = conv(x, p['in_w'], p['in_b'], 1, 1)
    b1 = block_b(feat, p['b1'], 1)
    b2 = block_b(b1, p['b2'], 2)
    b3 = block_b(b2, p['b3'], 2)
    xb = bn_relu6(b3)
    bot = xb + attention(xb, p['bot'])
    b4 = block_e(bot, b2, p['b4'])
    b5 = block_e(b4, b1, p['b5'])
    y = conv1x1(bn_relu6(b5), p['out']['w'], p['out']['b'], 1)
    n, hh, ww, _ = y.shape
    y = jnp.transpose(y, (0, 3, 1, 2)).reshape(n, 2, hh * ww)
    return jax.nn.log_softmax(y, axis=1)


# ----------------------------------------------------------------------------

if __name__ == "__main__":
    chn, heads = 8, 2
    N, H, W = 2, 16, 16

    key = jax.random.PRNGKey(0)
    pkey, xkey = jax.random.split(key)
    params = init_params(pkey, chn, heads)
    w_slab, f_slab, wmeta, fmeta, dims = build_constants(params, N, H, W, chn, heads)
    x = jax.random.normal(xkey, (N, 1, H, W), jnp.float32)

    forward = make_forward(w_slab, f_slab, wmeta, fmeta, dims, N, H, W, chn)
    fwd = jax.jit(forward)
    out = jax.block_until_ready(fwd(x, w_slab, f_slab))

    assert out.shape == (N, 2, H * W), out.shape
    assert bool(jnp.all(jnp.isfinite(out)))
    # log_softmax sanity: exp(out) sums to 1 along dim=1
    sums = jnp.sum(jnp.exp(out), axis=1)
    assert bool(jnp.all(jnp.abs(sums - 1.0) < 1e-4))

    # cross-check the fused Pallas kernel against a plain-XLA reference of the same forward
    ref = jax.jit(functools.partial(reference_forward, heads=heads))(x, params)
    err = float(jnp.max(jnp.abs(out - ref)))
    assert err < 2e-1, f"kernel/reference mismatch: {err}"

    print("KERNEL_OK")
</pallas_src>

<mosaic_0001>
module attributes {stable_mosaic.version = 11 : i64} {
  func.func @kernel(%arg0: memref<32x128xf32, #tpu.memory_space<vmem>>, %arg1: memref<6704x128xbf16, #tpu.memory_space<vmem>>, %arg2: memref<184x128xf32, #tpu.memory_space<vmem>>, %arg3: memref<32x32xf32, #tpu.memory_space<vmem>>) attributes {dimension_semantics = [], scalar_prefetch = 0 : i64, scratch_operands = 0 : i64, tpu.core_type = #tpu.core_type<tc>} {
    %c0 = arith.constant 0 : index
    %c0_0 = arith.constant 0 : index
    %0 = vector.load %arg0[%c0, %c0_0] : memref<32x128xf32, #tpu.memory_space<vmem>>, vector<32x128xf32>
    %c0_1 = arith.constant 0 : index
    %c0_2 = arith.constant 0 : index
    %1 = vector.load %arg1[%c0_1, %c0_2] : memref<6704x128xbf16, #tpu.memory_space<vmem>>, vector<32x32xbf16>
    %2 = arith.truncf %0 : vector<32x128xf32> to vector<32x128xbf16>
    %cst = arith.constant dense<0.000000e+00> : vector<32x128xf32>
    %3 = tpu.matmul %1, %2, %cst {dimension_numbers = #tpu.dot_dimension_numbers<[1], [0], [0], [1], [0, 0, 1, 1], [], []>} : vector<32x32xbf16>, vector<32x128xbf16>, vector<32x128xf32> -> vector<32x128xf32>
    %c32 = arith.constant 32 : index
    %c0_3 = arith.constant 0 : index
    %4 = vector.load %arg1[%c32, %c0_3] : memref<6704x128xbf16, #tpu.memory_space<vmem>>, vector<32x32xbf16>
    %5 = arith.truncf %0 : vector<32x128xf32> to vector<32x128xbf16>
    %cst_4 = arith.constant dense<0.000000e+00> : vector<32x128xf32>
    %6 = tpu.matmul %4, %5, %cst_4 {dimension_numbers = #tpu.dot_dimension_numbers<[1], [0], [0], [1], [0, 0, 1, 1], [], []>} : vector<32x32xbf16>, vector<32x128xbf16>, vector<32x128xf32> -> vector<32x128xf32>
    %7 = tpu.concatenate %3, %0, %6 in 1 : vector<32x128xf32>, vector<32x128xf32>, vector<32x128xf32> -> vector<32x384xf32>
    %c400 = arith.constant 400 : index
    %c0_5 = arith.constant 0 : index
    %8 = vector.load %arg1[%c400, %c0_5] : memref<6704x128xbf16, #tpu.memory_space<vmem>>, vector<384x128xbf16>
    %9 = arith.truncf %7 : vector<32x384xf32> to vector<32x384xbf16>
    %cst_6 = arith.constant dense<0.000000e+00> : vector<32x128xf32>
    %10 = tpu.matmul %9, %8, %cst_6 {dimension_numbers = #tpu.dot_dimension_numbers<[1], [0], [0], [1], [0, 0, 1, 1], [], []>} : vector<32x384xbf16>, vector<384x128xbf16>, vector<32x128xf32> -> vector<32x128xf32>
    %c0_7 = arith.constant 0 : index
    %c0_8 = arith.constant 0 : index
    %11 = vector.load %arg2[%c0_7, %c0_8] : memref<184x128xf32, #tpu.memory_space<vmem>>, vector<1x128xf32>
    %12 = vector.broadcast %11 : vector<1x128xf32> to vector<32x128xf32>
    %13 = arith.addf %10, %12 : vector<32x128xf32>
    %cst_9 = arith.constant 0.999994993 : f32
    %14 = vector.broadcast %cst_9 : f32 to vector<32x128xf32>
    %15 = arith.mulf %13, %14 : vector<32x128xf32>
    %cst_10 = arith.constant 0.000000e+00 : f32
    %cst_11 = arith.constant 6.000000e+00 : f32
    %16 = vector.broadcast %cst_10 : f32 to vector<32x128xf32>
    %17 = arith.maximumf %16, %15 : vector<32x128xf32>
    %18 = vector.broadcast %cst_11 : f32 to vector<32x128xf32>
    %19 = arith.minimumf %18, %17 : vector<32x128xf32>
    %c784 = arith.constant 784 : index
    %c0_12 = arith.constant 0 : index
    %20 = vector.load %arg1[%c784, %c0_12] : memref<6704x128xbf16, #tpu.memory_space<vmem>>, vector<128x128xbf16>
    %21 = arith.truncf %19 : vector<32x128xf32> to vector<32x128xbf16>
    %cst_13 = arith.constant dense<0.000000e+00> : vector<32x128xf32>
    %22 = tpu.matmul %21, %20, %cst_13 {dimension_numbers = #tpu.dot_dimension_numbers<[1], [0], [0], [1], [0, 0, 1, 1], [], []>} : vector<32x128xbf16>, vector<128x128xbf16>, vector<32x128xf32> -> vector<32x128xf32>
    %c8 = arith.constant 8 : index
    %c0_14 = arith.constant 0 : index
    %23 = vector.load %arg2[%c8, %c0_14] : memref<184x128xf32, #tpu.memory_space<vmem>>, vector<1x128xf32>
    %24 = vector.broadcast %23 : vector<1x128xf32> to vector<32x128xf32>
    %25 = arith.addf %22, %24 : vector<32x128xf32>
    %c0_15 = arith.constant 0 : index
    %c0_16 = arith.constant 0 : index
    %26 = vector.load %arg1[%c0_15, %c0_16] : memref<6704x128xbf16, #tpu.memory_space<vmem>>, vector<32x32xbf16>
    %27 = arith.truncf %19 : vector<32x128xf32> to vector<32x128xbf16>
    %cst_17 = arith.constant dense<0.000000e+00> : vector<32x128xf32>
    %28 = tpu.matmul %26, %27, %cst_17 {dimension_numbers = #tpu.dot_dimension_numbers<[1], [0], [0], [1], [0, 0, 1, 1], [], []>} : vector<32x32xbf16>, vector<32x128xbf16>, vector<32x128xf32> -> vector<32x128xf32>
    %c32_18 = arith.constant 32 : index
    %c0_19 = arith.constant 0 : index
    %29 = vector.load %arg1[%c32_18, %c0_19] : memref<6704x128xbf16, #tpu.memory_space<vmem>>, vector<32x32xbf16>
    %30 = arith.truncf %19 : vector<32x128xf32> to vector<32x128xbf16>
    %cst_20 = arith.constant dense<0.000000e+00> : vector<32x128xf32>
    %31 = tpu.matmul %29, %30, %cst_20 {dimension_numbers = #tpu.dot_dimension_numbers<[1], [0], [0], [1], [0, 0, 1, 1], [], []>} : vector<32x32xbf16>, vector<32x128xbf16>, vector<32x128xf32> -> vector<32x128xf32>
    %32 = tpu.concatenate %28, %19, %31 in 1 : vector<32x128xf32>, vector<32x128xf32>, vector<32x128xf32> -> vector<32x384xf32>
    %c912 = arith.constant 912 : index
    %c0_21 = arith.constant 0 : index
    %33 = vector.load %arg1[%c912, %c0_21] : memref<6704x128xbf16, #tpu.memory_space<vmem>>, vector<384x128xbf16>
    %34 = arith.truncf %32 : vector<32x384xf32> to vector<32x384xbf16>
    %cst_22 = arith.constant dense<0.000000e+00> : vector<32x128xf32>
    %35 = tpu.matmul %34, %33, %cst_22 {dimension_numbers = #tpu.dot_dimension_numbers<[1], [0], [0], [1], [0, 0, 1, 1], [], []>} : vector<32x384xbf16>, vector<384x128xbf16>, vector<32x128xf32> -> vector<32x128xf32>
    %c16 = arith.constant 16 : index
    %c0_23 = arith.constant 0 : index
    %36 = vector.load %arg2[%c16, %c0_23] : memref<184x128xf32, #tpu.memory_space<vmem>>, vector<1x128xf32>
    %37 = vector.broadcast %36 : vector<1x128xf32> to vector<32x128xf32>
    %38 = arith.addf %35, %37 : vector<32x128xf32>
    %cst_24 = arith.constant 0.999994993 : f32
    %39 = vector.broadcast %cst_24 : f32 to vector<32x128xf32>
    %40 = arith.mulf %38, %39 : vector<32x128xf32>
    %cst_25 = arith.constant 0.000000e+00 : f32
    %cst_26 = arith.constant 6.000000e+00 : f32
    %41 = vector.broadcast %cst_25 : f32 to vector<32x128xf32>
    %42 = arith.maximumf %41, %40 : vector<32x128xf32>
    %43 = vector.broadcast %cst_26 : f32 to vector<32x128xf32>
    %44 = arith.minimumf %43, %42 : vector<32x128xf32>
    %c0_27 = arith.constant 0 : index
    %c0_28 = arith.constant 0 : index
    %45 = vector.load %arg1[%c0_27, %c0_28] : memref<6704x128xbf16, #tpu.memory_space<vmem>>, vector<32x32xbf16>
    %46 = arith.truncf %44 : vector<32x128xf32> to vector<32x128xbf16>
    %cst_29 = arith.constant dense<0.000000e+00> : vector<32x128xf32>
    %47 = tpu.matmul %45, %46, %cst_29 {dimension_numbers = #tpu.dot_dimension_numbers<[1], [0], [0], [1], [0, 0, 1, 1], [], []>} : vector<32x32xbf16>, vector<32x128xbf16>, vector<32x128xf32> -> vector<32x128xf32>
    %c32_30 = arith.constant 32 : index
    %c0_31 = arith.constant 0 : index
    %48 = vector.load %arg1[%c32_30, %c0_31] : memref<6704x128xbf16, #tpu.memory_space<vmem>>, vector<32x32xbf16>
    %49 = arith.truncf %44 : vector<32x128xf32> to vector<32x128xbf16>
    %cst_32 = arith.constant dense<0.000000e+00> : vector<32x128xf32>
    %50 = tpu.matmul %48, %49, %cst_32 {dimension_numbers = #tpu.dot_dimension_numbers<[1], [0], [0], [1], [0, 0, 1, 1], [], []>} : vector<32x32xbf16>, vector<32x128xbf16>, vector<32x128xf32> -> vector<32x128xf32>
    %51 = tpu.concatenate %47, %44, %50 in 1 : vector<32x128xf32>, vector<32x128xf32>, vector<32x128xf32> -> vector<32x384xf32>
    %c1296 = arith.constant 1296 : index
    %c0_33 = arith.constant 0 : index
    %52 = vector.load %arg1[%c1296, %c0_33] : memref<6704x128xbf16, #tpu.memory_space<vmem>>, vector<384x128xbf16>
    %53 = arith.truncf %51 : vector<32x384xf32> to vector<32x384xbf16>
    %cst_34 = arith.constant dense<0.000000e+00> : vector<32x128xf32>
    %54 = tpu.matmul %53, %52, %cst_34 {dimension_numbers = #tpu.dot_dimension_numbers<[1], [0], [0], [1], [0, 0, 1, 1], [], []>} : vector<32x384xbf16>, vector<384x128xbf16>, vector<32x128xf32> -> vector<32x128xf32>
    %c24 = arith.constant 24 : index
    %c0_35 = arith.constant 0 : index
    %55 = vector.load %arg2[%c24, %c0_35] : memref<184x128xf32, #tpu.memory_space<vmem>>, vector<1x128xf32>
    %56 = vector.broadcast %55 : vector<1x128xf32> to vector<32x128xf32>
    %57 = arith.addf %54, %56 : vector<32x128xf32>
    %58 = arith.addf %57, %25 : vector<32x128xf32>
    %cst_36 = arith.constant 0.999994993 : f32
    %59 = vector.broadcast %cst_36 : f32 to vector<32x128xf32>
    %60 = arith.mulf %58, %59 : vector<32x128xf32>
    %cst_37 = arith.constant 0.000000e+00 : f32
    %cst_38 = arith.constant 6.000000e+00 : f32
    %61 = vector.broadcast %cst_37 : f32 to vector<32x128xf32>
    %62 = arith.maximumf %61, %60 : vector<32x128xf32>
    %63 = vector.broadcast %cst_38 : f32 to vector<32x128xf32>
    %64 = arith.minimumf %63, %62 : vector<32x128xf32>
    %c176 = arith.constant 176 : index
    %c0_39 = arith.constant 0 : index
    %65 = vector.load %arg1[%c176, %c0_39] : memref<6704x128xbf16, #tpu.memory_space<vmem>>, vector<16x32xbf16>
    %66 = arith.truncf %64 : vector<32x128xf32> to vector<32x128xbf16>
    %cst_40 = arith.constant dense<0.000000e+00> : vector<16x128xf32>
    %67 = tpu.matmul %65, %66, %cst_40 {dimension_numbers = #tpu.dot_dimension_numbers<[1], [0], [0], [1], [0, 0, 1, 1], [], []>} : vector<16x32xbf16>, vector<32x128xbf16>, vector<16x128xf32> -> vector<16x128xf32>
    %c1680 = arith.constant 1680 : index
    %c0_41 = arith.constant 0 : index
    %68 = vector.load %arg1[%c1680, %c0_41] : memref<6704x128xbf16, #tpu.memory_space<vmem>>, vector<128x128xbf16>
    %69 = arith.truncf %67 : vector<16x128xf32> to vector<16x128xbf16>
    %cst_42 = arith.constant dense<0.000000e+00> : vector<16x128xf32>
    %70 = tpu.matmul %69, %68, %cst_42 {dimension_numbers = #tpu.dot_dimension_numbers<[1], [0], [0], [1], [0, 0, 1, 1], [], []>} : vector<16x128xbf16>, vector<128x128xbf16>, vector<16x128xf32> -> vector<16x128xf32>
    %c32_43 = arith.constant 32 : index
    %c0_44 = arith.constant 0 : index
    %71 = vector.load %arg2[%c32_43, %c0_44] : memref<184x128xf32, #tpu.memory_space<vmem>>, vector<1x128xf32>
    %72 = vector.broadcast %71 : vector<1x128xf32> to vector<16x128xf32>
    %73 = arith.addf %70, %72 : vector<16x128xf32>
    %c128 = arith.constant 128 : index
    %c0_45 = arith.constant 0 : index
    %74 = vector.load %arg1[%c128, %c0_45] : memref<6704x128xbf16, #tpu.memory_space<vmem>>, vector<16x32xbf16>
    %75 = arith.truncf %64 : vector<32x128xf32> to vector<32x128xbf16>
    %cst_46 = arith.constant dense<0.000000e+00> : vector<16x128xf32>
    %76 = tpu.matmul %74, %75, %cst_46 {dimension_numbers = #tpu.dot_dimension_numbers<[1], [0], [0], [1], [0, 0, 1, 1], [], []>} : vector<16x32xbf16>, vector<32x128xbf16>, vector<16x128xf32> -> vector<16x128xf32>
    %c144 = arith.constant 144 : index
    %c0_47 = arith.constant 0 : index
    %77 = vector.load %arg1[%c144, %c0_47] : memref<6704x128xbf16, #tpu.memory_space<vmem>>, vector<16x32xbf16>
    %78 = arith.truncf %64 : vector<32x128xf32> to vector<32x128xbf16>
    %cst_48 = arith.constant dense<0.000000e+00> : vector<16x128xf32>
    %79 = tpu.matmul %77, %78, %cst_48 {dimension_numbers = #tpu.dot_dimension_numbers<[1], [0], [0], [1], [0, 0, 1, 1], [], []>} : vector<16x32xbf16>, vector<32x128xbf16>, vector<16x128xf32> -> vector<16x128xf32>
    %c160 = arith.constant 160 : index
    %c0_49 = arith.constant 0 : index
    %80 = vector.load %arg1[%c160, %c0_49] : memref<6704x128xbf16, #tpu.memory_space<vmem>>, vector<16x32xbf16>
    %81 = arith.truncf %64 : vector<32x128xf32> to vector<32x128xbf16>
    %cst_50 = arith.constant dense<0.000000e+00> : vector<16x128xf32>
    %82 = tpu.matmul %80, %81, %cst_50 {dimension_numbers = #tpu.dot_dimension_numbers<[1], [0], [0], [1], [0, 0, 1, 1], [], []>} : vector<16x32xbf16>, vector<32x128xbf16>, vector<16x128xf32> -> vector<16x128xf32>
    %83 = tpu.concatenate %76, %79, %82 in 1 : vector<16x128xf32>, vector<16x128xf32>, vector<16x128xf32> -> vector<16x384xf32>
    %c1808 = arith.constant 1808 : index
    %c0_51 = arith.constant 0 : index
    %84 = vector.load %arg1[%c1808, %c0_51] : memref<6704x128xbf16, #tpu.memory_space<vmem>>, vector<384x128xbf16>
    %85 = arith.truncf %83 : vector<16x384xf32> to vector<16x384xbf16>
    %cst_52 = arith.constant dense<0.000000e+00> : vector<16x128xf32>
    %86 = tpu.matmul %85, %84, %cst_52 {dimension_numbers = #tpu.dot_dimension_numbers<[1], [0], [0], [1], [0, 0, 1, 1], [], []>} : vector<16x384xbf16>, vector<384x128xbf16>, vector<16x128xf32> -> vector<16x128xf32>
    %c40 = arith.constant 40 : index
    %c0_53 = arith.constant 0 : index
    %87 = vector.load %arg2[%c40, %c0_53] : memref<184x128xf32, #tpu.memory_space<vmem>>, vector<1x128xf32>
    %88 = vector.broadcast %87 : vector<1x128xf32> to vector<16x128xf32>
    %89 = arith.addf %86, %88 : vector<16x128xf32>
    %cst_54 = arith.constant 0.999994993 : f32
    %90 = vector.broadcast %cst_54 : f32 to vector<16x128xf32>
    %91 = arith.mulf %89, %90 : vector<16x128xf32>
    %cst_55 = arith.constant 0.000000e+00 : f32
    %cst_56 = arith.constant 6.000000e+00 : f32
    %92 = vector.broadcast %cst_55 : f32 to vector<16x128xf32>
    %93 = arith.maximumf %92, %91 : vector<16x128xf32>
    %94 = vector.broadcast %cst_56 : f32 to vector<16x128xf32>
    %95 = arith.minimumf %94, %93 : vector<16x128xf32>
    %c64 = arith.constant 64 : index
    %c0_57 = arith.constant 0 : index
    %96 = vector.load %arg1[%c64, %c0_57] : memref<6704x128xbf16, #tpu.memory_space<vmem>>, vector<16x16xbf16>
    %97 = arith.truncf %95 : vector<16x128xf32> to vector<16x128xbf16>
    %cst_58 = arith.constant dense<0.000000e+00> : vector<16x128xf32>
    %98 = tpu.matmul %96, %97, %cst_58 {dimension_numbers = #tpu.dot_dimension_numbers<[1], [0], [0], [1], [0, 0, 1, 1], [], []>} : vector<16x16xbf16>, vector<16x128xbf16>, vector<16x128xf32> -> vector<16x128xf32>
    %c80 = arith.constant 80 : index
    %c0_59 = arith.constant 0 : index
    %99 = vector.load %arg1[%c80, %c0_59] : memref<6704x128xbf16, #tpu.memory_space<vmem>>, vector<16x16xbf16>
    %100 = arith.truncf %95 : vector<16x128xf32> to vector<16x128xbf16>
    %cst_60 = arith.constant dense<0.000000e+00> : vector<16x128xf32>
    %101 = tpu.matmul %99, %100, %cst_60 {dimension_numbers = #tpu.dot_dimension_numbers<[1], [0], [0], [1], [0, 0, 1, 1], [], []>} : vector<16x16xbf16>, vector<16x128xbf16>, vector<16x128xf32> -> vector<16x128xf32>
    %102 = tpu.concatenate %98, %95, %101 in 1 : vector<16x128xf32>, vector<16x128xf32>, vector<16x128xf32> -> vector<16x384xf32>
    %c2192 = arith.constant 2192 : index
    %c0_61 = arith.constant 0 : index
    %103 = vector.load %arg1[%c2192, %c0_61] : memref<6704x128xbf16, #tpu.memory_space<vmem>>, vector<384x128xbf16>
    %104 = arith.truncf %102 : vector<16x384xf32> to vector<16x384xbf16>
    %cst_62 = arith.constant dense<0.000000e+00> : vector<16x128xf32>
    %105 = tpu.matmul %104, %103, %cst_62 {dimension_numbers = #tpu.dot_dimension_numbers<[1], [0], [0], [1], [0, 0, 1, 1], [], []>} : vector<16x384xbf16>, vector<384x128xbf16>, vector<16x128xf32> -> vector<16x128xf32>
    %c48 = arith.constant 48 : index
    %c0_63 = arith.constant 0 : index
    %106 = vector.load %arg2[%c48, %c0_63] : memref<184x128xf32, #tpu.memory_space<vmem>>, vector<1x128xf32>
    %107 = vector.broadcast %106 : vector<1x128xf32> to vector<16x128xf32>
    %108 = arith.addf %105, %107 : vector<16x128xf32>
    %109 = arith.addf %108, %73 : vector<16x128xf32>
    %cst_64 = arith.constant 0.999994993 : f32
    %110 = vector.broadcast %cst_64 : f32 to vector<16x128xf32>
    %111 = arith.mulf %109, %110 : vector<16x128xf32>
    %cst_65 = arith.constant 0.000000e+00 : f32
    %cst_66 = arith.constant 6.000000e+00 : f32
    %112 = vector.broadcast %cst_65 : f32 to vector<16x128xf32>
    %113 = arith.maximumf %112, %111 : vector<16x128xf32>
    %114 = vector.broadcast %cst_66 : f32 to vector<16x128xf32>
    %115 = arith.minimumf %114, %113 : vector<16x128xf32>
    %c240 = arith.constant 240 : index
    %c0_67 = arith.constant 0 : index
    %116 = vector.load %arg1[%c240, %c0_67] : memref<6704x128xbf16, #tpu.memory_space<vmem>>, vector<8x16xbf16>
    %117 = arith.truncf %115 : vector<16x128xf32> to vector<16x128xbf16>
    %cst_68 = arith.constant dense<0.000000e+00> : vector<8x128xf32>
    %118 = tpu.matmul %116, %117, %cst_68 {dimension_numbers = #tpu.dot_dimension_numbers<[1], [0], [0], [1], [0, 0, 1, 1], [], []>} : vector<8x16xbf16>, vector<16x128xbf16>, vector<8x128xf32> -> vector<8x128xf32>
    %c2576 = arith.constant 2576 : index
    %c0_69 = arith.constant 0 : index
    %119 = vector.load %arg1[%c2576, %c0_69] : memref<6704x128xbf16, #tpu.memory_space<vmem>>, vector<128x128xbf16>
    %120 = arith.truncf %118 : vector<8x128xf32> to vector<8x128xbf16>
    %cst_70 = arith.constant dense<0.000000e+00> : vector<8x128xf32>
    %121 = tpu.matmul %120, %119, %cst_70 {dimension_numbers = #tpu.dot_dimension_numbers<[1], [0], [0], [1], [0, 0, 1, 1], [], []>} : vector<8x128xbf16>, vector<128x128xbf16>, vector<8x128xf32> -> vector<8x128xf32>
    %c56 = arith.constant 56 : index
    %c0_71 = arith.constant 0 : index
    %122 = vector.load %arg2[%c56, %c0_71] : memref<184x128xf32, #tpu.memory_space<vmem>>, vector<1x128xf32>
    %123 = vector.broadcast %122 : vector<1x128xf32> to vector<8x128xf32>
    %124 = arith.addf %121, %123 : vector<8x128xf32>
    %c192 = arith.constant 192 : index
    %c0_72 = arith.constant 0 : index
    %125 = vector.load %arg1[%c192, %c0_72] : memref<6704x128xbf16, #tpu.memory_space<vmem>>, vector<8x16xbf16>
    %126 = arith.truncf %115 : vector<16x128xf32> to vector<16x128xbf16>
    %cst_73 = arith.constant dense<0.000000e+00> : vector<8x128xf32>
    %127 = tpu.matmul %125, %126, %cst_73 {dimension_numbers = #tpu.dot_dimension_numbers<[1], [0], [0], [1], [0, 0, 1, 1], [], []>} : vector<8x16xbf16>, vector<16x128xbf16>, vector<8x128xf32> -> vector<8x128xf32>
    %c208 = arith.constant 208 : index
    %c0_74 = arith.constant 0 : index
    %128 = vector.load %arg1[%c208, %c0_74] : memref<6704x128xbf16, #tpu.memory_space<vmem>>, vector<8x16xbf16>
    %129 = arith.truncf %115 : vector<16x128xf32> to vector<16x128xbf16>
    %cst_75 = arith.constant dense<0.000000e+00> : vector<8x128xf32>
    %130 = tpu.matmul %128, %129, %cst_75 {dimension_numbers = #tpu.dot_dimension_numbers<[1], [0], [0], [1], [0, 0, 1, 1], [], []>} : vector<8x16xbf16>, vector<16x128xbf16>, vector<8x128xf32> -> vector<8x128xf32>
    %c224 = arith.constant 224 : index
    %c0_76 = arith.constant 0 : index
    %131 = vector.load %arg1[%c224, %c0_76] : memref<6704x128xbf16, #tpu.memory_space<vmem>>, vector<8x16xbf16>
    %132 = arith.truncf %115 : vector<16x128xf32> to vector<16x128xbf16>
    %cst_77 = arith.constant dense<0.000000e+00> : vector<8x128xf32>
    %133 = tpu.matmul %131, %132, %cst_77 {dimension_numbers = #tpu.dot_dimension_numbers<[1], [0], [0], [1], [0, 0, 1, 1], [], []>} : vector<8x16xbf16>, vector<16x128xbf16>, vector<8x128xf32> -> vector<8x128xf32>
    %134 = tpu.concatenate %127, %130, %133 in 1 : vector<8x128xf32>, vector<8x128xf32>, vector<8x128xf32> -> vector<8x384xf32>
    %c2704 = arith.constant 2704 : index
    %c0_78 = arith.constant 0 : index
    %135 = vector.load %arg1[%c2704, %c0_78] : memref<6704x128xbf16, #tpu.memory_space<vmem>>, vector<384x128xbf16>
    %136 = arith.truncf %134 : vector<8x384xf32> to vector<8x384xbf16>
    %cst_79 = arith.constant dense<0.000000e+00> : vector<8x128xf32>
    %137 = tpu.matmul %136, %135, %cst_79 {dimension_numbers = #tpu.dot_dimension_numbers<[1], [0], [0], [1], [0, 0, 1, 1], [], []>} : vector<8x384xbf16>, vector<384x128xbf16>, vector<8x128xf32> -> vector<8x128xf32>
    %c64_80 = arith.constant 64 : index
    %c0_81 = arith.constant 0 : index
    %138 = vector.load %arg2[%c64_80, %c0_81] : memref<184x128xf32, #tpu.memory_space<vmem>>, vector<1x128xf32>
    %139 = vector.broadcast %138 : vector<1x128xf32> to vector<8x128xf32>
    %140 = arith.addf %137, %139 : vector<8x128xf32>
    %cst_82 = arith.constant 0.999994993 : f32
    %141 = vector.broadcast %cst_82 : f32 to vector<8x128xf32>
    %142 = arith.mulf %140, %141 : vector<8x128xf32>
    %cst_83 = arith.constant 0.000000e+00 : f32
    %cst_84 = arith.constant 6.000000e+00 : f32
    %143 = vector.broadcast %cst_83 : f32 to vector<8x128xf32>
    %144 = arith.maximumf %143, %142 : vector<8x128xf32>
    %145 = vector.broadcast %cst_84 : f32 to vector<8x128xf32>
    %146 = arith.minimumf %145, %144 : vector<8x128xf32>
    %c96 = arith.constant 96 : index
    %c0_85 = arith.constant 0 : index
    %147 = vector.load %arg1[%c96, %c0_85] : memref<6704x128xbf16, #tpu.memory_space<vmem>>, vector<8x8xbf16>
    %148 = arith.truncf %146 : vector<8x128xf32> to vector<8x128xbf16>
    %cst_86 = arith.constant dense<0.000000e+00> : vector<8x128xf32>
    %149 = tpu.matmul %147, %148, %cst_86 {dimension_numbers = #tpu.dot_dimension_numbers<[1], [0], [0], [1], [0, 0, 1, 1], [], []>} : vector<8x8xbf16>, vector<8x128xbf16>, vector<8x128xf32> -> vector<8x128xf32>
    %c112 = arith.constant 112 : index
    %c0_87 = arith.constant 0 : index
    %150 = vector.load %arg1[%c112, %c0_87] : memref<6704x128xbf16, #tpu.memory_space<vmem>>, vector<8x8xbf16>
    %151 = arith.truncf %146 : vector<8x128xf32> to vector<8x128xbf16>
    %cst_88 = arith.constant dense<0.000000e+00> : vector<8x128xf32>
    %152 = tpu.matmul %150, %151, %cst_88 {dimension_numbers = #tpu.dot_dimension_numbers<[1], [0], [0], [1], [0, 0, 1, 1], [], []>} : vector<8x8xbf16>, vector<8x128xbf16>, vector<8x128xf32> -> vector<8x128xf32>
    %153 = tpu.concatenate %149, %146, %152 in 1 : vector<8x128xf32>, vector<8x128xf32>, vector<8x128xf32> -> vector<8x384xf32>
    %c3088 = arith.constant 3088 : index
    %c0_89 = arith.constant 0 : index
    %154 = vector.load %arg1[%c3088, %c0_89] : memref<6704x128xbf16, #tpu.memory_space<vmem>>, vector<384x128xbf16>
    %155 = arith.truncf %153 : vector<8x384xf32> to vector<8x384xbf16>
    %cst_90 = arith.constant dense<0.000000e+00> : vector<8x128xf32>
    %156 = tpu.matmul %155, %154, %cst_90 {dimension_numbers = #tpu.dot_dimension_numbers<[1], [0], [0], [1], [0, 0, 1, 1], [], []>} : vector<8x384xbf16>, vector<384x128xbf16>, vector<8x128xf32> -> vector<8x128xf32>
    %c72 = arith.constant 72 : index
    %c0_91 = arith.constant 0 : index
    %157 = vector.load %arg2[%c72, %c0_91] : memref<184x128xf32, #tpu.memory_space<vmem>>, vector<1x128xf32>
    %158 = vector.broadcast %157 : vector<1x128xf32> to vector<8x128xf32>
    %159 = arith.addf %156, %158 : vector<8x128xf32>
    %160 = arith.addf %159, %124 : vector<8x128xf32>
    %cst_92 = arith.constant 0.999994993 : f32
    %161 = vector.broadcast %cst_92 : f32 to vector<8x128xf32>
    %162 = arith.mulf %160, %161 : vector<8x128xf32>
    %cst_93 = arith.constant 0.000000e+00 : f32
    %cst_94 = arith.constant 6.000000e+00 : f32
    %163 = vector.broadcast %cst_93 : f32 to vector<8x128xf32>
    %164 = arith.maximumf %163, %162 : vector<8x128xf32>
    %165 = vector.broadcast %cst_94 : f32 to vector<8x128xf32>
    %166 = arith.minimumf %165, %164 : vector<8x128xf32>
    %c3472 = arith.constant 3472 : index
    %c0_95 = arith.constant 0 : index
    %167 = vector.load %arg1[%c3472, %c0_95] : memref<6704x128xbf16, #tpu.memory_space<vmem>>, vector<128x8xbf16>
    %c3600 = arith.constant 3600 : index
    %c0_96 = arith.constant 0 : index
    %168 = vector.load %arg1[%c3600, %c0_96] : memref<6704x128xbf16, #tpu.memory_space<vmem>>, vector<32x32xbf16>
    %169 = vector.extract_strided_slice %167 {offsets = [0, 0], sizes = [32, 8], strides = [1, 1]} : vector<128x8xbf16> to vector<32x8xbf16>
    %170 = arith.truncf %166 : vector<8x128xf32> to vector<8x128xbf16>
    %cst_97 = arith.constant dense<0.000000e+00> : vector<32x128xf32>
    %171 = tpu.matmul %169, %170, %cst_97 {dimension_numbers = #tpu.dot_dimension_numbers<[1], [0], [0], [1], [0, 0, 1, 1], [], []>} : vector<32x8xbf16>, vector<8x128xbf16>, vector<32x128xf32> -> vector<32x128xf32>
    %172 = vector.extract_strided_slice %167 {offsets = [32, 0], sizes = [32, 8], strides = [1, 1]} : vector<128x8xbf16> to vector<32x8xbf16>
    %173 = arith.truncf %166 : vector<8x128xf32> to vector<8x128xbf16>
    %cst_98 = arith.constant dense<0.000000e+00> : vector<32x128xf32>
    %174 = tpu.matmul %172, %173, %cst_98 {dimension_numbers = #tpu.dot_dimension_numbers<[1], [0], [0], [1], [0, 0, 1, 1], [], []>} : vector<32x8xbf16>, vector<8x128xbf16>, vector<32x128xf32> -> vector<32x128xf32>
    %175 = vector.extract_strided_slice %167 {offsets = [64, 0], sizes = [32, 8], strides = [1, 1]} : vector<128x8xbf16> to vector<32x8xbf16>
    %176 = arith.truncf %166 : vector<8x128xf32> to vector<8x128xbf16>
    %cst_99 = arith.constant dense<0.000000e+00> : vector<32x128xf32>
    %177 = tpu.matmul %175, %176, %cst_99 {dimension_numbers = #tpu.dot_dimension_numbers<[1], [0], [0], [1], [0, 0, 1, 1], [], []>} : vector<32x8xbf16>, vector<8x128xbf16>, vector<32x128xf32> -> vector<32x128xf32>
    %178 = vector.extract_strided_slice %167 {offsets = [96, 0], sizes = [32, 8], strides = [1, 1]} : vector<128x8xbf16> to vector<32x8xbf16>
    %179 = arith.truncf %166 : vector<8x128xf32> to vector<8x128xbf16>
    %cst_100 = arith.constant dense<0.000000e+00> : vector<32x128xf32>
    %180 = tpu.matmul %178, %179, %cst_100 {dimension_numbers = #tpu.dot_dimension_numbers<[1], [0], [0], [1], [0, 0, 1, 1], [], []>} : vector<32x8xbf16>, vector<8x128xbf16>, vector<32x128xf32> -> vector<32x128xf32>
    %181 = tpu.concatenate %171, %174, %177, %180 in 1 : vector<32x128xf32>, vector<32x128xf32>, vector<32x128xf32>, vector<32x128xf32> -> vector<32x512xf32>
    %c3632 = arith.constant 3632 : index
    %c0_101 = arith.constant 0 : index
    %182 = vector.load %arg1[%c3632, %c0_101] : memref<6704x128xbf16, #tpu.memory_space<vmem>>, vector<512x96xbf16>
    %183 = arith.truncf %181 : vector<32x512xf32> to vector<32x512xbf16>
    %cst_102 = arith.constant dense<0.000000e+00> : vector<32x96xf32>
    %184 = tpu.matmul %183, %182, %cst_102 {dimension_numbers = #tpu.dot_dimension_numbers<[1], [0], [0], [1], [0, 0, 1, 1], [], []>} : vector<32x512xbf16>, vector<512x96xbf16>, vector<32x96xf32> -> vector<32x96xf32>
    %c80_103 = arith.constant 80 : index
    %c0_104 = arith.constant 0 : index
    %185 = vector.load %arg2[%c80_103, %c0_104] : memref<184x128xf32, #tpu.memory_space<vmem>>, vector<1x96xf32>
    %186 = vector.broadcast %185 : vector<1x96xf32> to vector<32x96xf32>
    %187 = arith.addf %184, %186 : vector<32x96xf32>
    %c96_105 = arith.constant 96 : index
    %c0_106 = arith.constant 0 : index
    %188 = vector.load %arg2[%c96_105, %c0_106] : memref<184x128xf32, #tpu.memory_space<vmem>>, vector<32x32xf32>
    %189 = vector.extract_strided_slice %187 {offsets = [0, 0], sizes = [32, 16], strides = [1, 1]} : vector<32x96xf32> to vector<32x16xf32>
    %190 = vector.extract_strided_slice %187 {offsets = [0, 32], sizes = [32, 16], strides = [1, 1]} : vector<32x96xf32> to vector<32x16xf32>
    %191 = vector.extract_strided_slice %187 {offsets = [0, 64], sizes = [32, 16], strides = [1, 1]} : vector<32x96xf32> to vector<32x16xf32>
    %192 = arith.truncf %189 : vector<32x16xf32> to vector<32x16xbf16>
    %193 = arith.truncf %190 : vector<32x16xf32> to vector<32x16xbf16>
    %cst_107 = arith.constant dense<0.000000e+00> : vector<32x32xf32>
    %194 = tpu.matmul %192, %193, %cst_107 {dimension_numbers = #tpu.dot_dimension_numbers<[1], [1], [0], [0], [0, 0, 1, 0], [], []>} : vector<32x16xbf16>, vector<32x16xbf16>, vector<32x32xf32> -> vector<32x32xf32>
    %cst_108 = arith.constant 2.500000e-01 : f32
    %195 = vector.broadcast %cst_108 : f32 to vector<32x32xf32>
    %196 = arith.mulf %194, %195 : vector<32x32xf32>
    %197 = arith.addf %196, %188 : vector<32x32xf32>
    %cst_109 = arith.constant dense<0xFF800000> : vector<32xf32>
    %198 = vector.multi_reduction <maximumf>, %197, %cst_109 [1] : vector<32x32xf32> to vector<32xf32>
    %199 = vector.shape_cast %198 : vector<32xf32> to vector<32x1xf32>
    %200 = vector.broadcast %199 : vector<32x1xf32> to vector<32x32xf32>
    %201 = arith.subf %197, %200 : vector<32x32xf32>
    %202 = math.exp %201 : vector<32x32xf32>
    %cst_110 = arith.constant dense<0.000000e+00> : vector<32xf32>
    %203 = vector.multi_reduction <add>, %202, %cst_110 [1] : vector<32x32xf32> to vector<32xf32>
    %204 = vector.shape_cast %203 : vector<32xf32> to vector<32x1xf32>
    %205 = arith.truncf %202 : vector<32x32xf32> to vector<32x32xbf16>
    %206 = arith.truncf %191 : vector<32x16xf32> to vector<32x16xbf16>
    %cst_111 = arith.constant dense<0.000000e+00> : vector<32x16xf32>
    %207 = tpu.matmul %205, %206, %cst_111 {dimension_numbers = #tpu.dot_dimension_numbers<[1], [0], [0], [1], [0, 0, 1, 1], [], []>} : vector<32x32xbf16>, vector<32x16xbf16>, vector<32x16xf32> -> vector<32x16xf32>
    %208 = vector.broadcast %204 : vector<32x1xf32> to vector<32x16xf32>
    %209 = arith.divf %207, %208 : vector<32x16xf32>
    %210 = vector.extract_strided_slice %187 {offsets = [0, 16], sizes = [32, 16], strides = [1, 1]} : vector<32x96xf32> to vector<32x16xf32>
    %211 = vector.extract_strided_slice %187 {offsets = [0, 48], sizes = [32, 16], strides = [1, 1]} : vector<32x96xf32> to vector<32x16xf32>
    %212 = vector.extract_strided_slice %187 {offsets = [0, 80], sizes = [32, 16], strides = [1, 1]} : vector<32x96xf32> to vector<32x16xf32>
    %213 = arith.truncf %210 : vector<32x16xf32> to vector<32x16xbf16>
    %214 = arith.truncf %211 : vector<32x16xf32> to vector<32x16xbf16>
    %cst_112 = arith.constant dense<0.000000e+00> : vector<32x32xf32>
    %215 = tpu.matmul %213, %214, %cst_112 {dimension_numbers = #tpu.dot_dimension_numbers<[1], [1], [0], [0], [0, 0, 1, 0], [], []>} : vector<32x16xbf16>, vector<32x16xbf16>, vector<32x32xf32> -> vector<32x32xf32>
    %cst_113 = arith.constant 2.500000e-01 : f32
    %216 = vector.broadcast %cst_113 : f32 to vector<32x32xf32>
    %217 = arith.mulf %215, %216 : vector<32x32xf32>
    %218 = arith.addf %217, %188 : vector<32x32xf32>
    %cst_114 = arith.constant dense<0xFF800000> : vector<32xf32>
    %219 = vector.multi_reduction <maximumf>, %218, %cst_114 [1] : vector<32x32xf32> to vector<32xf32>
    %220 = vector.shape_cast %219 : vector<32xf32> to vector<32x1xf32>
    %221 = vector.broadcast %220 : vector<32x1xf32> to vector<32x32xf32>
    %222 = arith.subf %218, %221 : vector<32x32xf32>
    %223 = math.exp %222 : vector<32x32xf32>
    %cst_115 = arith.constant dense<0.000000e+00> : vector<32xf32>
    %224 = vector.multi_reduction <add>, %223, %cst_115 [1] : vector<32x32xf32> to vector<32xf32>
    %225 = vector.shape_cast %224 : vector<32xf32> to vector<32x1xf32>
    %226 = arith.truncf %223 : vector<32x32xf32> to vector<32x32xbf16>
    %227 = arith.truncf %212 : vector<32x16xf32> to vector<32x16xbf16>
    %cst_116 = arith.constant dense<0.000000e+00> : vector<32x16xf32>
    %228 = tpu.matmul %226, %227, %cst_116 {dimension_numbers = #tpu.dot_dimension_numbers<[1], [0], [0], [1], [0, 0, 1, 1], [], []>} : vector<32x32xbf16>, vector<32x16xbf16>, vector<32x16xf32> -> vector<32x16xf32>
    %229 = vector.broadcast %225 : vector<32x1xf32> to vector<32x16xf32>
    %230 = arith.divf %228, %229 : vector<32x16xf32>
    %231 = tpu.concatenate %209, %230 in 1 : vector<32x16xf32>, vector<32x16xf32> -> vector<32x32xf32>
    %232 = vector.extract_strided_slice %168 {offsets = [0, 0], sizes = [8, 32], strides = [1, 1]} : vector<32x32xbf16> to vector<8x32xbf16>
    %233 = arith.truncf %231 : vector<32x32xf32> to vector<32x32xbf16>
    %cst_117 = arith.constant dense<0.000000e+00> : vector<8x32xf32>
    %234 = tpu.matmul %232, %233, %cst_117 {dimension_numbers = #tpu.dot_dimension_numbers<[1], [0], [0], [1], [0, 0, 1, 1], [], []>} : vector<8x32xbf16>, vector<32x32xbf16>, vector<8x32xf32> -> vector<8x32xf32>
    %235 = vector.extract_strided_slice %168 {offsets = [8, 0], sizes = [8, 32], strides = [1, 1]} : vector<32x32xbf16> to vector<8x32xbf16>
    %236 = arith.truncf %231 : vector<32x32xf32> to vector<32x32xbf16>
    %cst_118 = arith.constant dense<0.000000e+00> : vector<8x32xf32>
    %237 = tpu.matmul %235, %236, %cst_118 {dimension_numbers = #tpu.dot_dimension_numbers<[1], [0], [0], [1], [0, 0, 1, 1], [], []>} : vector<8x32xbf16>, vector<32x32xbf16>, vector<8x32xf32> -> vector<8x32xf32>
    %238 = vector.extract_strided_slice %168 {offsets = [16, 0], sizes = [8, 32], strides = [1, 1]} : vector<32x32xbf16> to vector<8x32xbf16>
    %239 = arith.truncf %231 : vector<32x32xf32> to vector<32x32xbf16>
    %cst_119 = arith.constant dense<0.000000e+00> : vector<8x32xf32>
    %240 = tpu.matmul %238, %239, %cst_119 {dimension_numbers = #tpu.dot_dimension_numbers<[1], [0], [0], [1], [0, 0, 1, 1], [], []>} : vector<8x32xbf16>, vector<32x32xbf16>, vector<8x32xf32> -> vector<8x32xf32>
    %241 = vector.extract_strided_slice %168 {offsets = [24, 0], sizes = [8, 32], strides = [1, 1]} : vector<32x32xbf16> to vector<8x32xbf16>
    %242 = arith.truncf %231 : vector<32x32xf32> to vector<32x32xbf16>
    %cst_120 = arith.constant dense<0.000000e+00> : vector<8x32xf32>
    %243 = tpu.matmul %241, %242, %cst_120 {dimension_numbers = #tpu.dot_dimension_numbers<[1], [0], [0], [1], [0, 0, 1, 1], [], []>} : vector<8x32xbf16>, vector<32x32xbf16>, vector<8x32xf32> -> vector<8x32xf32>
    %244 = tpu.concatenate %234, %237, %240, %243 in 1 : vector<8x32xf32>, vector<8x32xf32>, vector<8x32xf32>, vector<8x32xf32> -> vector<8x128xf32>
    %c4144 = arith.constant 4144 : index
    %c0_121 = arith.constant 0 : index
    %245 = vector.load %arg1[%c4144, %c0_121] : memref<6704x128xbf16, #tpu.memory_space<vmem>>, vector<128x128xbf16>
    %246 = arith.truncf %244 : vector<8x128xf32> to vector<8x128xbf16>
    %cst_122 = arith.constant dense<0.000000e+00> : vector<8x128xf32>
    %247 = tpu.matmul %246, %245, %cst_122 {dimension_numbers = #tpu.dot_dimension_numbers<[1], [0], [0], [1], [0, 0, 1, 1], [], []>} : vector<8x128xbf16>, vector<128x128xbf16>, vector<8x128xf32> -> vector<8x128xf32>
    %c88 = arith.constant 88 : index
    %c0_123 = arith.constant 0 : index
    %248 = vector.load %arg2[%c88, %c0_123] : memref<184x128xf32, #tpu.memory_space<vmem>>, vector<1x128xf32>
    %249 = vector.broadcast %248 : vector<1x128xf32> to vector<8x128xf32>
    %250 = arith.addf %247, %249 : vector<8x128xf32>
    %251 = arith.addf %166, %250 : vector<8x128xf32>
    %c256 = arith.constant 256 : index
    %c0_124 = arith.constant 0 : index
    %252 = vector.load %arg1[%c256, %c0_124] : memref<6704x128xbf16, #tpu.memory_space<vmem>>, vector<16x8xbf16>
    %253 = arith.truncf %251 : vector<8x128xf32> to vector<8x128xbf16>
    %cst_125 = arith.constant dense<0.000000e+00> : vector<16x128xf32>
    %254 = tpu.matmul %252, %253, %cst_125 {dimension_numbers = #tpu.dot_dimension_numbers<[1], [0], [0], [1], [0, 0, 1, 1], [], []>} : vector<16x8xbf16>, vector<8x128xbf16>, vector<16x128xf32> -> vector<16x128xf32>
    %c272 = arith.constant 272 : index
    %c0_126 = arith.constant 0 : index
    %255 = vector.load %arg1[%c272, %c0_126] : memref<6704x128xbf16, #tpu.memory_space<vmem>>, vector<16x8xbf16>
    %256 = arith.truncf %251 : vector<8x128xf32> to vector<8x128xbf16>
    %cst_127 = arith.constant dense<0.000000e+00> : vector<16x128xf32>
    %257 = tpu.matmul %255, %256, %cst_127 {dimension_numbers = #tpu.dot_dimension_numbers<[1], [0], [0], [1], [0, 0, 1, 1], [], []>} : vector<16x8xbf16>, vector<8x128xbf16>, vector<16x128xf32> -> vector<16x128xf32>
    %c288 = arith.constant 288 : index
    %c0_128 = arith.constant 0 : index
    %258 = vector.load %arg1[%c288, %c0_128] : memref<6704x128xbf16, #tpu.memory_space<vmem>>, vector<16x8xbf16>
    %259 = arith.truncf %251 : vector<8x128xf32> to vector<8x128xbf16>
    %cst_129 = arith.constant dense<0.000000e+00> : vector<16x128xf32>
    %260 = tpu.matmul %258, %259, %cst_129 {dimension_numbers = #tpu.dot_dimension_numbers<[1], [0], [0], [1], [0, 0, 1, 1], [], []>} : vector<16x8xbf16>, vector<8x128xbf16>, vector<16x128xf32> -> vector<16x128xf32>
    %261 = tpu.concatenate %254, %257, %260 in 1 : vector<16x128xf32>, vector<16x128xf32>, vector<16x128xf32> -> vector<16x384xf32>
    %c4272 = arith.constant 4272 : index
    %c0_130 = arith.constant 0 : index
    %262 = vector.load %arg1[%c4272, %c0_130] : memref<6704x128xbf16, #tpu.memory_space<vmem>>, vector<384x128xbf16>
    %263 = arith.truncf %261 : vector<16x384xf32> to vector<16x384xbf16>
    %cst_131 = arith.constant dense<0.000000e+00> : vector<16x128xf32>
    %264 = tpu.matmul %263, %262, %cst_131 {dimension_numbers = #tpu.dot_dimension_numbers<[1], [0], [0], [1], [0, 0, 1, 1], [], []>} : vector<16x384xbf16>, vector<384x128xbf16>, vector<16x128xf32> -> vector<16x128xf32>
    %c128_132 = arith.constant 128 : index
    %c0_133 = arith.constant 0 : index
    %265 = vector.load %arg2[%c128_132, %c0_133] : memref<184x128xf32, #tpu.memory_space<vmem>>, vector<1x128xf32>
    %266 = vector.broadcast %265 : vector<1x128xf32> to vector<16x128xf32>
    %267 = arith.addf %264, %266 : vector<16x128xf32>
    %268 = arith.addf %267, %109 : vector<16x128xf32>
    %cst_134 = arith.constant 0.999994993 : f32
    %269 = vector.broadcast %cst_134 : f32 to vector<16x128xf32>
    %270 = arith.mulf %268, %269 : vector<16x128xf32>
    %cst_135 = arith.constant 0.000000e+00 : f32
    %cst_136 = arith.constant 6.000000e+00 : f32
    %271 = vector.broadcast %cst_135 : f32 to vector<16x128xf32>
    %272 = arith.maximumf %271, %270 : vector<16x128xf32>
    %273 = vector.broadcast %cst_136 : f32 to vector<16x128xf32>
    %274 = arith.minimumf %273, %272 : vector<16x128xf32>
    %c64_137 = arith.constant 64 : index
    %c0_138 = arith.constant 0 : index
    %275 = vector.load %arg1[%c64_137, %c0_138] : memref<6704x128xbf16, #tpu.memory_space<vmem>>, vector<16x16xbf16>
    %276 = arith.truncf %274 : vector<16x128xf32> to vector<16x128xbf16>
    %cst_139 = arith.constant dense<0.000000e+00> : vector<16x128xf32>
    %277 = tpu.matmul %275, %276, %cst_139 {dimension_numbers = #tpu.dot_dimension_numbers<[1], [0], [0], [1], [0, 0, 1, 1], [], []>} : vector<16x16xbf16>, vector<16x128xbf16>, vector<16x128xf32> -> vector<16x128xf32>
    %c80_140 = arith.constant 80 : index
    %c0_141 = arith.constant 0 : index
    %278 = vector.load %arg1[%c80_140, %c0_141] : memref<6704x128xbf16, #tpu.memory_space<vmem>>, vector<16x16xbf16>
    %279 = arith.truncf %274 : vector<16x128xf32> to vector<16x128xbf16>
    %cst_142 = arith.constant dense<0.000000e+00> : vector<16x128xf32>
    %280 = tpu.matmul %278, %279, %cst_142 {dimension_numbers = #tpu.dot_dimension_numbers<[1], [0], [0], [1], [0, 0, 1, 1], [], []>} : vector<16x16xbf16>, vector<16x128xbf16>, vector<16x128xf32> -> vector<16x128xf32>
    %281 = tpu.concatenate %277, %274, %280 in 1 : vector<16x128xf32>, vector<16x128xf32>, vector<16x128xf32> -> vector<16x384xf32>
    %c4656 = arith.constant 4656 : index
    %c0_143 = arith.constant 0 : index
    %282 = vector.load %arg1[%c4656, %c0_143] : memref<6704x128xbf16, #tpu.memory_space<vmem>>, vector<384x128xbf16>
    %283 = arith.truncf %281 : vector<16x384xf32> to vector<16x384xbf16>
    %cst_144 = arith.constant dense<0.000000e+00> : vector<16x128xf32>
    %284 = tpu.matmul %283, %282, %cst_144 {dimension_numbers = #tpu.dot_dimension_numbers<[1], [0], [0], [1], [0, 0, 1, 1], [], []>} : vector<16x384xbf16>, vector<384x128xbf16>, vector<16x128xf32> -> vector<16x128xf32>
    %c136 = arith.constant 136 : index
    %c0_145 = arith.constant 0 : index
    %285 = vector.load %arg2[%c136, %c0_145] : memref<184x128xf32, #tpu.memory_space<vmem>>, vector<1x128xf32>
    %286 = vector.broadcast %285 : vector<1x128xf32> to vector<16x128xf32>
    %287 = arith.addf %284, %286 : vector<16x128xf32>
    %cst_146 = arith.constant 0.999994993 : f32
    %288 = vector.broadcast %cst_146 : f32 to vector<16x128xf32>
    %289 = arith.mulf %287, %288 : vector<16x128xf32>
    %cst_147 = arith.constant 0.000000e+00 : f32
    %cst_148 = arith.constant 6.000000e+00 : f32
    %290 = vector.broadcast %cst_147 : f32 to vector<16x128xf32>
    %291 = arith.maximumf %290, %289 : vector<16x128xf32>
    %292 = vector.broadcast %cst_148 : f32 to vector<16x128xf32>
    %293 = arith.minimumf %292, %291 : vector<16x128xf32>
    %c64_149 = arith.constant 64 : index
    %c0_150 = arith.constant 0 : index
    %294 = vector.load %arg1[%c64_149, %c0_150] : memref<6704x128xbf16, #tpu.memory_space<vmem>>, vector<16x16xbf16>
    %295 = arith.truncf %293 : vector<16x128xf32> to vector<16x128xbf16>
    %cst_151 = arith.constant dense<0.000000e+00> : vector<16x128xf32>
    %296 = tpu.matmul %294, %295, %cst_151 {dimension_numbers = #tpu.dot_dimension_numbers<[1], [0], [0], [1], [0, 0, 1, 1], [], []>} : vector<16x16xbf16>, vector<16x128xbf16>, vector<16x128xf32> -> vector<16x128xf32>
    %c80_152 = arith.constant 80 : index
    %c0_153 = arith.constant 0 : index
    %297 = vector.load %arg1[%c80_152, %c0_153] : memref<6704x128xbf16, #tpu.memory_space<vmem>>, vector<16x16xbf16>
    %298 = arith.truncf %293 : vector<16x128xf32> to vector<16x128xbf16>
    %cst_154 = arith.constant dense<0.000000e+00> : vector<16x128xf32>
    %299 = tpu.matmul %297, %298, %cst_154 {dimension_numbers = #tpu.dot_dimension_numbers<[1], [0], [0], [1], [0, 0, 1, 1], [], []>} : vector<16x16xbf16>, vector<16x128xbf16>, vector<16x128xf32> -> vector<16x128xf32>
    %300 = tpu.concatenate %296, %293, %299 in 1 : vector<16x128xf32>, vector<16x128xf32>, vector<16x128xf32> -> vector<16x384xf32>
    %c5040 = arith.constant 5040 : index
    %c0_155 = arith.constant 0 : index
    %301 = vector.load %arg1[%c5040, %c0_155] : memref<6704x128xbf16, #tpu.memory_space<vmem>>, vector<384x128xbf16>
    %302 = arith.truncf %300 : vector<16x384xf32> to vector<16x384xbf16>
    %cst_156 = arith.constant dense<0.000000e+00> : vector<16x128xf32>
    %303 = tpu.matmul %302, %301, %cst_156 {dimension_numbers = #tpu.dot_dimension_numbers<[1], [0], [0], [1], [0, 0, 1, 1], [], []>} : vector<16x384xbf16>, vector<384x128xbf16>, vector<16x128xf32> -> vector<16x128xf32>
    %c144_157 = arith.constant 144 : index
    %c0_158 = arith.constant 0 : index
    %304 = vector.load %arg2[%c144_157, %c0_158] : memref<184x128xf32, #tpu.memory_space<vmem>>, vector<1x128xf32>
    %305 = vector.broadcast %304 : vector<1x128xf32> to vector<16x128xf32>
    %306 = arith.addf %303, %305 : vector<16x128xf32>
    %307 = arith.addf %268, %306 : vector<16x128xf32>
    %c304 = arith.constant 304 : index
    %c0_159 = arith.constant 0 : index
    %308 = vector.load %arg1[%c304, %c0_159] : memref<6704x128xbf16, #tpu.memory_space<vmem>>, vector<32x16xbf16>
    %309 = arith.truncf %307 : vector<16x128xf32> to vector<16x128xbf16>
    %cst_160 = arith.constant dense<0.000000e+00> : vector<32x128xf32>
    %310 = tpu.matmul %308, %309, %cst_160 {dimension_numbers = #tpu.dot_dimension_numbers<[1], [0], [0], [1], [0, 0, 1, 1], [], []>} : vector<32x16xbf16>, vector<16x128xbf16>, vector<32x128xf32> -> vector<32x128xf32>
    %c336 = arith.constant 336 : index
    %c0_161 = arith.constant 0 : index
    %311 = vector.load %arg1[%c336, %c0_161] : memref<6704x128xbf16, #tpu.memory_space<vmem>>, vector<32x16xbf16>
    %312 = arith.truncf %307 : vector<16x128xf32> to vector<16x128xbf16>
    %cst_162 = arith.constant dense<0.000000e+00> : vector<32x128xf32>
    %313 = tpu.matmul %311, %312, %cst_162 {dimension_numbers = #tpu.dot_dimension_numbers<[1], [0], [0], [1], [0, 0, 1, 1], [], []>} : vector<32x16xbf16>, vector<16x128xbf16>, vector<32x128xf32> -> vector<32x128xf32>
    %c368 = arith.constant 368 : index
    %c0_163 = arith.constant 0 : index
    %314 = vector.load %arg1[%c368, %c0_163] : memref<6704x128xbf16, #tpu.memory_space<vmem>>, vector<32x16xbf16>
    %315 = arith.truncf %307 : vector<16x128xf32> to vector<16x128xbf16>
    %cst_164 = arith.constant dense<0.000000e+00> : vector<32x128xf32>
    %316 = tpu.matmul %314, %315, %cst_164 {dimension_numbers = #tpu.dot_dimension_numbers<[1], [0], [0], [1], [0, 0, 1, 1], [], []>} : vector<32x16xbf16>, vector<16x128xbf16>, vector<32x128xf32> -> vector<32x128xf32>
    %317 = tpu.concatenate %310, %313, %316 in 1 : vector<32x128xf32>, vector<32x128xf32>, vector<32x128xf32> -> vector<32x384xf32>
    %c5424 = arith.constant 5424 : index
    %c0_165 = arith.constant 0 : index
    %318 = vector.load %arg1[%c5424, %c0_165] : memref<6704x128xbf16, #tpu.memory_space<vmem>>, vector<384x128xbf16>
    %319 = arith.truncf %317 : vector<32x384xf32> to vector<32x384xbf16>
    %cst_166 = arith.constant dense<0.000000e+00> : vector<32x128xf32>
    %320 = tpu.matmul %319, %318, %cst_166 {dimension_numbers = #tpu.dot_dimension_numbers<[1], [0], [0], [1], [0, 0, 1, 1], [], []>} : vector<32x384xbf16>, vector<384x128xbf16>, vector<32x128xf32> -> vector<32x128xf32>
    %c152 = arith.constant 152 : index
    %c0_167 = arith.constant 0 : index
    %321 = vector.load %arg2[%c152, %c0_167] : memref<184x128xf32, #tpu.memory_space<vmem>>, vector<1x128xf32>
    %322 = vector.broadcast %321 : vector<1x128xf32> to vector<32x128xf32>
    %323 = arith.addf %320, %322 : vector<32x128xf32>
    %324 = arith.addf %323, %58 : vector<32x128xf32>
    %cst_168 = arith.constant 0.999994993 : f32
    %325 = vector.broadcast %cst_168 : f32 to vector<32x128xf32>
    %326 = arith.mulf %324, %325 : vector<32x128xf32>
    %cst_169 = arith.constant 0.000000e+00 : f32
    %cst_170 = arith.constant 6.000000e+00 : f32
    %327 = vector.broadcast %cst_169 : f32 to vector<32x128xf32>
    %328 = arith.maximumf %327, %326 : vector<32x128xf32>
    %329 = vector.broadcast %cst_170 : f32 to vector<32x128xf32>
    %330 = arith.minimumf %329, %328 : vector<32x128xf32>
    %c0_171 = arith.constant 0 : index
    %c0_172 = arith.constant 0 : index
    %331 = vector.load %arg1[%c0_171, %c0_172] : memref<6704x128xbf16, #tpu.memory_space<vmem>>, vector<32x32xbf16>
    %332 = arith.truncf %330 : vector<32x128xf32> to vector<32x128xbf16>
    %cst_173 = arith.constant dense<0.000000e+00> : vector<32x128xf32>
    %333 = tpu.matmul %331, %332, %cst_173 {dimension_numbers = #tpu.dot_dimension_numbers<[1], [0], [0], [1], [0, 0, 1, 1], [], []>} : vector<32x32xbf16>, vector<32x128xbf16>, vector<32x128xf32> -> vector<32x128xf32>
    %c32_174 = arith.constant 32 : index
    %c0_175 = arith.constant 0 : index
    %334 = vector.load %arg1[%c32_174, %c0_175] : memref<6704x128xbf16, #tpu.memory_space<vmem>>, vector<32x32xbf16>
    %335 = arith.truncf %330 : vector<32x128xf32> to vector<32x128xbf16>
    %cst_176 = arith.constant dense<0.000000e+00> : vector<32x128xf32>
    %336 = tpu.matmul %334, %335, %cst_176 {dimension_numbers = #tpu.dot_dimension_numbers<[1], [0], [0], [1], [0, 0, 1, 1], [], []>} : vector<32x32xbf16>, vector<32x128xbf16>, vector<32x128xf32> -> vector<32x128xf32>
    %337 = tpu.concatenate %333, %330, %336 in 1 : vector<32x128xf32>, vector<32x128xf32>, vector<32x128xf32> -> vector<32x384xf32>
    %c5808 = arith.constant 5808 : index
    %c0_177 = arith.constant 0 : index
    %338 = vector.load %arg1[%c5808, %c0_177] : memref<6704x128xbf16, #tpu.memory_space<vmem>>, vector<384x128xbf16>
    %339 = arith.truncf %337 : vector<32x384xf32> to vector<32x384xbf16>
    %cst_178 = arith.constant dense<0.000000e+00> : vector<32x128xf32>
    %340 = tpu.matmul %339, %338, %cst_178 {dimension_numbers = #tpu.dot_dimension_numbers<[1], [0], [0], [1], [0, 0, 1, 1], [], []>} : vector<32x384xbf16>, vector<384x128xbf16>, vector<32x128xf32> -> vector<32x128xf32>
    %c160_179 = arith.constant 160 : index
    %c0_180 = arith.constant 0 : index
    %341 = vector.load %arg2[%c160_179, %c0_180] : memref<184x128xf32, #tpu.memory_space<vmem>>, vector<1x128xf32>
    %342 = vector.broadcast %341 : vector<1x128xf32> to vector<32x128xf32>
    %343 = arith.addf %340, %342 : vector<32x128xf32>
    %cst_181 = arith.constant 0.999994993 : f32
    %344 = vector.broadcast %cst_181 : f32 to vector<32x128xf32>
    %345 = arith.mulf %343, %344 : vector<32x128xf32>
    %cst_182 = arith.constant 0.000000e+00 : f32
    %cst_183 = arith.constant 6.000000e+00 : f32
    %346 = vector.broadcast %cst_182 : f32 to vector<32x128xf32>
    %347 = arith.maximumf %346, %345 : vector<32x128xf32>
    %348 = vector.broadcast %cst_183 : f32 to vector<32x128xf32>
    %349 = arith.minimumf %348, %347 : vector<32x128xf32>
    %c0_184 = arith.constant 0 : index
    %c0_185 = arith.constant 0 : index
    %350 = vector.load %arg1[%c0_184, %c0_185] : memref<6704x128xbf16, #tpu.memory_space<vmem>>, vector<32x32xbf16>
    %351 = arith.truncf %349 : vector<32x128xf32> to vector<32x128xbf16>
    %cst_186 = arith.constant dense<0.000000e+00> : vector<32x128xf32>
    %352 = tpu.matmul %350, %351, %cst_186 {dimension_numbers = #tpu.dot_dimension_numbers<[1], [0], [0], [1], [0, 0, 1, 1], [], []>} : vector<32x32xbf16>, vector<32x128xbf16>, vector<32x128xf32> -> vector<32x128xf32>
    %c32_187 = arith.constant 32 : index
    %c0_188 = arith.constant 0 : index
    %353 = vector.load %arg1[%c32_187, %c0_188] : memref<6704x128xbf16, #tpu.memory_space<vmem>>, vector<32x32xbf16>
    %354 = arith.truncf %349 : vector<32x128xf32> to vector<32x128xbf16>
    %cst_189 = arith.constant dense<0.000000e+00> : vector<32x128xf32>
    %355 = tpu.matmul %353, %354, %cst_189 {dimension_numbers = #tpu.dot_dimension_numbers<[1], [0], [0], [1], [0, 0, 1, 1], [], []>} : vector<32x32xbf16>, vector<32x128xbf16>, vector<32x128xf32> -> vector<32x128xf32>
    %356 = tpu.concatenate %352, %349, %355 in 1 : vector<32x128xf32>, vector<32x128xf32>, vector<32x128xf32> -> vector<32x384xf32>
    %c6192 = arith.constant 6192 : index
    %c0_190 = arith.constant 0 : index
    %357 = vector.load %arg1[%c6192, %c0_190] : memref<6704x128xbf16, #tpu.memory_space<vmem>>, vector<384x128xbf16>
    %358 = arith.truncf %356 : vector<32x384xf32> to vector<32x384xbf16>
    %cst_191 = arith.constant dense<0.000000e+00> : vector<32x128xf32>
    %359 = tpu.matmul %358, %357, %cst_191 {dimension_numbers = #tpu.dot_dimension_numbers<[1], [0], [0], [1], [0, 0, 1, 1], [], []>} : vector<32x384xbf16>, vector<384x128xbf16>, vector<32x128xf32> -> vector<32x128xf32>
    %c168 = arith.constant 168 : index
    %c0_192 = arith.constant 0 : index
    %360 = vector.load %arg2[%c168, %c0_192] : memref<184x128xf32, #tpu.memory_space<vmem>>, vector<1x128xf32>
    %361 = vector.broadcast %360 : vector<1x128xf32> to vector<32x128xf32>
    %362 = arith.addf %359, %361 : vector<32x128xf32>
    %363 = arith.addf %324, %362 : vector<32x128xf32>
    %cst_193 = arith.constant 0.999994993 : f32
    %364 = vector.broadcast %cst_193 : f32 to vector<32x128xf32>
    %365 = arith.mulf %363, %364 : vector<32x128xf32>
    %cst_194 = arith.constant 0.000000e+00 : f32
    %cst_195 = arith.constant 6.000000e+00 : f32
    %366 = vector.broadcast %cst_194 : f32 to vector<32x128xf32>
    %367 = arith.maximumf %366, %365 : vector<32x128xf32>
    %368 = vector.broadcast %cst_195 : f32 to vector<32x128xf32>
    %369 = arith.minimumf %368, %367 : vector<32x128xf32>
    %c6576 = arith.constant 6576 : index
    %c0_196 = arith.constant 0 : index
    %370 = vector.load %arg1[%c6576, %c0_196] : memref<6704x128xbf16, #tpu.memory_space<vmem>>, vector<128x32xbf16>
    %371 = arith.truncf %369 : vector<32x128xf32> to vector<32x128xbf16>
    %cst_197 = arith.constant dense<0.000000e+00> : vector<32x32xf32>
    %372 = tpu.matmul %371, %370, %cst_197 {dimension_numbers = #tpu.dot_dimension_numbers<[1], [0], [0], [1], [0, 0, 1, 1], [], []>} : vector<32x128xbf16>, vector<128x32xbf16>, vector<32x32xf32> -> vector<32x32xf32>
    %c176_198 = arith.constant 176 : index
    %c0_199 = arith.constant 0 : index
    %373 = vector.load %arg2[%c176_198, %c0_199] : memref<184x128xf32, #tpu.memory_space<vmem>>, vector<1x32xf32>
    %374 = vector.broadcast %373 : vector<1x32xf32> to vector<32x32xf32>
    %375 = arith.addf %372, %374 : vector<32x32xf32>
    %376 = vector.extract_strided_slice %375 {offsets = [0, 0], sizes = [32, 16], strides = [1, 1]} : vector<32x32xf32> to vector<32x16xf32>
    %377 = vector.extract_strided_slice %375 {offsets = [0, 16], sizes = [32, 16], strides = [1, 1]} : vector<32x32xf32> to vector<32x16xf32>
    %378 = arith.maximumf %376, %377 : vector<32x16xf32>
    %379 = arith.subf %376, %378 : vector<32x16xf32>
    %380 = arith.subf %377, %378 : vector<32x16xf32>
    %381 = math.exp %379 : vector<32x16xf32>
    %382 = math.exp %380 : vector<32x16xf32>
    %383 = arith.addf %381, %382 : vector<32x16xf32>
    %384 = math.log %383 : vector<32x16xf32>
    %385 = arith.subf %379, %384 : vector<32x16xf32>
    %386 = arith.subf %380, %384 : vector<32x16xf32>
    %387 = tpu.concatenate %385, %386 in 1 : vector<32x16xf32>, vector<32x16xf32> -> vector<32x32xf32>
    %c0_200 = arith.constant 0 : index
    %c0_201 = arith.constant 0 : index
    %388 = vector.load %arg3[%c0_200, %c0_201] : memref<32x32xf32, #tpu.memory_space<vmem>>, vector<32x32xf32>
    tpu.vector_store %arg3[%c0_200, %c0_201], %387 {strides = array<i32>} : memref<32x32xf32, #tpu.memory_space<vmem>>, vector<32x32xf32>,
    return
  }
}

</mosaic_0001>

<bundles_post_ra>
// kernel: forward.1
= control target key start
LH: loop header
LB: loop body
LE: loop exit
PB: predicated region body
PF: predicated region fallthrough
CT: control target
= control target key end

     0   :  { %8 = vsyncpa [#allocation3], 0  ;;  %s8322_s0 = inlined_call_operand.vmem [shape: f32[32,128], index: 0, kind: input, shape index: {}]   ;;  %s8323_s1 = inlined_call_operand.hbm [shape: bf16[6704,128], index: 1, kind: input, shape index: {}]   ;;  %s8324_s2 = inlined_call_operand.hbm [shape: f32[184,128], index: 2, kind: input, shape index: {}]   ;;  %s8325_s3 = inlined_call_operand.vmem [shape: f32[32,32], index: 3, kind: output, shape index: {}]  }
   0x1   :  { %s16_s14 = sshll.u32 %s8323_s1, 4  ;;  %s17_s14 = int_to_ptr.hbm [resolvable:$true] %s16_s14 }
   0x2   :  { %9 = vsyncpa [#allocation5], 0  ;;  %s7905_s15 = smov [#allocation2]   ;;  %s29_s19 = sshll.u32 %s8324_s2, 4  ;;  %s30_s19 = int_to_ptr.hbm [resolvable:$true] %s29_s19 }
   0x3   :  { %s18_s16 = sshll.u32 %s7905_s15, 4  ;;  %s7906_s20 = smov 64   ;;  %s19_s16 = int_to_ptr.vmem [resolvable:$true] %s18_s16 }
   0x4   :  { %s7907_s21 = smov 4   ;;  %s7908_s22 = smov [#allocation4]  }
   0x5   :  { %24 = dma.hbm_to_vmem [thread:$0]  %s17_s14, 53632, %s19_s16, [#allocation3], %s7906_s20, %s7906_s20, %s7907_s21  }
   0x6   :  { %s31_s23 = sshll.u32 %s7908_s22, 4  ;;  %s7909_s24 = smov 128   ;;  %s32_s23 = int_to_ptr.vmem [resolvable:$true] %s31_s23 }
   0x7   :  { %s7910_s1 = smov 8  }
   0x8   :  { %37 = dma.hbm_to_vmem [thread:$0]  %s30_s19, 2944, %s32_s23, [#allocation5], %s7909_s24, %s7909_s24, %s7910_s1  }
   0x9   :  { %7901 = dma.done.wait [#allocation3], 53632  }
   0xa   :  { %7902 = vsyncadd [#allocation3], 4294913664 }
   0xb   :  { %7903 = dma.done.wait [#allocation5], 2944  }
   0xc   :  { %7904 = vsyncadd [#allocation5], 4294964352  ;;  %v49_v0 = vld [vmem:[%s8322_s0 + $0x10] sm:$0xff]  ;;  %v50_v1 = vld [vmem:[%s8322_s0 + $0x18] sm:$0xff]  ;;  %vm67_vm0 = vcmask 261120   ;;  %vm1534_vm1 = vcmask 130048  }
   0xd   :  { %v47_v2 = vld [vmem:[%s8322_s0] sm:$0xff]  ;;  %v7954_v3 = vpack.c.bf16 %v50_v1, %v49_v0  ;;  %v48_v4 = vld [vmem:[%s8322_s0 + $0x8] sm:$0xff]  ;;  %v7349_v8 = vld [vmem:[#allocation2 + $0x138] sm:$0xff]  ;;  %vm2216_vm2 = vcmask 1043456   ;;  %vm2212_vm3 = vcmask 64512   ;;  %s7911_s0 = smov 112  }
   0xe   :  { %v7350_v5 = vld [vmem:[#allocation2 + $0x140] sm:$0xff]  ;;  %v55_v6 = vpack.c.bf16 %v48_v4, %v47_v2  ;;  %v7341_v10 = vld [vmem:[#allocation2 + $0xf8] sm:$0xff]  ;;  %v7963_v12 = vld [vmem:[#allocation2 + $0x10] sm:$0xff]  ;;  %s7912_s5 = smov 96   ;;  %s7913_s6 = smov 80  }
   0xf   :  { %80 = vmatpush.bf16.msra.mxu0 %v7954_v3  ;;  %119 = vmatpush.bf16.msra.mxu1 %v7954_v3  ;;  %v7342_v7 = vld [vmem:[#allocation2 + $0x100] sm:$0xff]  ;;  %v7348_v13 = vld [vmem:[#allocation2 + $0x130] sm:$0xff]  ;;  %v7357_v14 = vld [vmem:[#allocation2 + $0x178] sm:$0xff]  ;;  %s7914_s7 = smov 48   ;;  %s7915_s8 = smov 16  }
  0x10   :  { %349 = vmatpush.bf16.msra.mxu3 %v7350_v5  ;;  %v7358_v9 = vld [vmem:[#allocation2 + $0x180] sm:$0xff]  ;;  %330 = vmatpush.bf16.msra.mxu2 %v7342_v7  ;;  %v7340_v15 = vld [vmem:[#allocation2 + $0xf0] sm:$0xff]  ;;  %v7347_v16 = vld [vmem:[#allocation2 + $0x128] sm:$0xff]  ;;  %s7916_s9 = smov 32  }
  0x11   :  { %v7961_v11 = vld [vmem:[#allocation2] sm:$0xff]  ;;  %v7356_v17 = vld [vmem:[#allocation2 + $0x170] sm:$0xff]  ;;  %v7339_v18 = vld [vmem:[#allocation2 + $0xe8] sm:$0xff] }
  0x12   :  { %v7346_v19 = vld [vmem:[#allocation2 + $0x120] sm:$0xff]  ;;  %v7355_v20 = vld [vmem:[#allocation2 + $0x168] sm:$0xff]  ;;  %v7345_v22 = vld [vmem:[#allocation2 + $0x118] sm:$0xff] }
  0x13   :  { %81 = vmatpush.bf16.msra.mxu0 %v55_v6  ;;  %120 = vmatpush.bf16.msra.mxu1 %v55_v6  ;;  %v7338_v21 = vld [vmem:[#allocation2 + $0xe0] sm:$0xff]  ;;  %v7969_v24 = vld [vmem:[#allocation2 + $0x8] sm:$0xff]  ;;  %v7971_v25 = vld [vmem:[#allocation2 + $0x18] sm:$0xff] }
  0x14   :  { %350 = vmatpush.bf16.msra.mxu3 %v7349_v8  ;;  %331 = vmatpush.bf16.msra.mxu2 %v7341_v10  ;;  %v7354_v23 = vld [vmem:[#allocation2 + $0x160] sm:$0xff]  ;;  %v7344_v26 = vld [vmem:[#allocation2 + $0x110] sm:$0xff]  ;;  %v7337_v27 = vld [vmem:[#allocation2 + $0xd8] sm:$0xff] }
  0x15   :  { %v7353_v28 = vld [vmem:[#allocation2 + $0x158] sm:$0xff]  ;;  %v7343_v29 = vld [vmem:[#allocation2 + $0x108] sm:$0xff]  ;;  %v7336_v30 = vld [vmem:[#allocation2 + $0xd0] sm:$0xff] }
  0x16   :  { %5630 = vmatmul.msk.bf16.vlgmr.msra.gmra.mxu0 %vm67_vm0, %v7961_v11  ;;  %5640 = vmatmul.msk.bf16.vlgmr.msra.gmra.mxu1 %vm67_vm0, %v7963_v12  ;;  %v7352_v31 = vld [vmem:[#allocation2 + $0x150] sm:$0xff]  ;;  %v7335_v32 = vld [vmem:[#allocation2 + $0xc8] sm:$0xff]  ;;  %v7366_v34 = vld [vmem:[#allocation2 + $0x1c0] sm:$0xff] }
  0x17   :  { %368 = vmatpush.bf16.msrb.mxu0 %v7358_v9  ;;  %v7351_v33 = vld [vmem:[#allocation2 + $0x148] sm:$0xff]  ;;  %467 = vmatpush.bf16.msrb.mxu1 %v7366_v34  ;;  %v7365_v47 = vld [vmem:[#allocation2 + $0x1b8] sm:$0xff]  ;;  %v7364_v48 = vld [vmem:[#allocation2 + $0x1b0] sm:$0xff] }
  0x18   :  { %351 = vmatpush.bf16.msra.mxu3 %v7348_v13  ;;  %332 = vmatpush.bf16.msra.mxu2 %v7340_v15  ;;  %v7363_v49 = vld [vmem:[#allocation2 + $0x1a8] sm:$0xff]  ;;  %v7362_v50 = vld [vmem:[#allocation2 + $0x1a0] sm:$0xff]  ;;  %v7361_v51 = vld [vmem:[#allocation2 + $0x198] sm:$0xff] }
  0x19   :  { %v7360_v52 = vld [vmem:[#allocation2 + $0x190] sm:$0xff]  ;;  %v7359_v53 = vld [vmem:[#allocation2 + $0x188] sm:$0xff]  ;;  %v7382_v54 = vld [vmem:[#allocation2 + $0x240] sm:$0xff] }
  0x1a   :  { %v7381_v55 = vld [vmem:[#allocation2 + $0x238] sm:$0xff]  ;;  %v7380_v59 = vld [vmem:[#allocation2 + $0x230] sm:$0xff]  ;;  %v7379_v62 = vld [vmem:[#allocation2 + $0x228] sm:$0xff] }
  0x1b   :  { %369 = vmatpush.bf16.msrb.mxu0 %v7357_v14  ;;  %468 = vmatpush.bf16.msrb.mxu1 %v7365_v47  ;;  %v7772_v57 = vld [vmem:[#allocation4] ss:$0 sm:$0xff]  ;;  %v7378_v2 = vld [vmem:[#allocation2 + $0x220] sm:$0xff]  ;;  %v7376_v14 = vld [vmem:[#allocation2 + $0x210] sm:$0xff] }
  0x1c   :  { %352 = vmatpush.bf16.msra.mxu3 %v7347_v16  ;;  %333 = vmatpush.bf16.msra.mxu2 %v7339_v18  ;;  %v7377_v8 = vld [vmem:[#allocation2 + $0x218] sm:$0xff]  ;;  %v7371_v47 = vld [vmem:[#allocation2 + $0x1e8] sm:$0xff] }
  0x1f   :  { %370 = vmatpush.bf16.msrb.mxu0 %v7356_v17  ;;  %469 = vmatpush.bf16.msrb.mxu1 %v7364_v48  ;;  %v7387_v48 = vld [vmem:[#allocation2 + $0x268] sm:$0xff] }
  0x20   :  { %353 = vmatpush.bf16.msra.mxu3 %v7346_v19  ;;  %334 = vmatpush.bf16.msra.mxu2 %v7338_v21  ;;  %v7375_v19 = vld [vmem:[#allocation2 + $0x208] sm:$0xff] }
  0x23   :  { %371 = vmatpush.bf16.msrb.mxu0 %v7355_v20  ;;  %470 = vmatpush.bf16.msrb.mxu1 %v7363_v49  ;;  %v7370_v49 = vld [vmem:[#allocation2 + $0x1e0] sm:$0xff] }
  0x24   :  { %354 = vmatpush.bf16.msra.mxu3 %v7345_v22  ;;  %335 = vmatpush.bf16.msra.mxu2 %v7337_v27 }
  0x26   :  { %5631 = vmatmul.msk.bf16.gmra.mxu0 %vm67_vm0, %v7969_v24  ;;  %5641 = vmatmul.msk.bf16.gmra.mxu1 %vm67_vm0, %v7971_v25 }
  0x27   :  { %372 = vmatpush.bf16.msrb.mxu0 %v7354_v23  ;;  %471 = vmatpush.bf16.msrb.mxu1 %v7362_v50  ;;  %v7386_v50 = vld [vmem:[#allocation2 + $0x260] sm:$0xff] }
  0x28   :  { %355 = vmatpush.bf16.msra.mxu3 %v7344_v26  ;;  %336 = vmatpush.bf16.msra.mxu2 %v7336_v30 }
  0x2b   :  { %373 = vmatpush.bf16.msrb.mxu0 %v7353_v28  ;;  %472 = vmatpush.bf16.msrb.mxu1 %v7361_v51  ;;  %v7369_v51 = vld [vmem:[#allocation2 + $0x1d8] sm:$0xff] }
  0x2c   :  { %356 = vmatpush.bf16.msra.mxu3 %v7343_v29  ;;  %337 = vmatpush.bf16.msra.mxu2 %v7335_v32 }
  0x2f   :  { %374 = vmatpush.bf16.msrb.mxu0 %v7352_v31  ;;  %357 = vmatmul.bf16.vlgmr.msra.gmra.mxu3 %v55_v6 }
  0x30   :  { %473 = vmatpush.bf16.msrb.mxu1 %v7360_v52  ;;  %v7385_v52 = vld [vmem:[#allocation2 + $0x258] sm:$0xff] }
  0x33   :  { %375 = vmatpush.bf16.msrb.mxu0 %v7351_v33 }
  0x34   :  { %474 = vmatpush.bf16.msrb.mxu1 %v7359_v53  ;;  %v7368_v53 = vld [vmem:[#allocation2 + $0x1d0] sm:$0xff] }
  0x38   :  { %741 = vmatpush.bf16.msra.mxu1 %v7382_v54  ;;  %v7384_v54 = vld [vmem:[#allocation2 + $0x250] sm:$0xff] }
  0x3c   :  { %742 = vmatpush.bf16.msra.mxu1 %v7381_v55  ;;  %v7367_v55 = vld [vmem:[#allocation2 + $0x1c8] sm:$0xff] }
  0x3f   :  { %362 = vmatmul.bf16.gmra.mxu3 %v7954_v3 }
  0x40   :  { %743 = vmatpush.bf16.msra.mxu1 %v7380_v59 }
  0x44   :  { %744 = vmatpush.bf16.msra.mxu1 %v7379_v62 }
  0x48   :  { %745 = vmatpush.bf16.msra.mxu1 %v7378_v2 }
  0x4c   :  { %746 = vmatpush.bf16.msra.mxu1 %v7377_v8 }
  0x50   :  { %747 = vmatpush.bf16.msra.mxu1 %v7376_v14  ;;  %v8000_v14 = vld [vmem:[#allocation2 + $0x2e8] sm:$0xff] }
  0x54   :  { %748 = vmatpush.bf16.msra.mxu1 %v7375_v19  ;;  %v8009_v19 = vld [vmem:[#allocation2 + $0x2d0] sm:$0xff] }
  0x93   :  { %v83_v35 = vpop.f32.mrf.mxu0  ;;  %v122_v36 = vpop.f32.mrf.mxu1 }
  0x9b   :  { %v85_v37 = vpop.f32.mrf.mxu0  ;;  %v124_v38 = vpop.f32.mrf.mxu1 }
  0x9c   :  { %v181_v39 = vpack.c.bf16 %v124_v38, %v122_v36  ;;  %v180_v40 = vpack.c.bf16 %v85_v37, %v83_v35 }
  0x9e   :  { %338 = vmatmul.bf16.vlgmr.msra.gmra.mxu2 %v180_v40  ;;  %376 = vmatmul.bf16.vlgmr.msrb.gmra.mxu0 %v181_v39 }
  0xa3   :  { %v88_v41 = vpop.f32.mrf.mxu0  ;;  %v127_v42 = vpop.f32.mrf.mxu1 }
  0xab   :  { %v90_v43 = vpop.f32.mrf.mxu0  ;;  %v129_v44 = vpop.f32.mrf.mxu1 }
  0xac   :  { %v182_v45 = vpack.c.bf16 %v90_v43, %v88_v41  ;;  %v183_v46 = vpack.c.bf16 %v129_v44, %v127_v42  ;;  %v7374_v41 = vld [vmem:[#allocation2 + $0x200] sm:$0xff]  ;;  %v7373_v43 = vld [vmem:[#allocation2 + $0x1f8] sm:$0xff] }
  0xad   :  { %v7390_v42 = vld [vmem:[#allocation2 + $0x280] sm:$0xff]  ;;  %722 = vmatpush.bf16.msra.mxu0 %v7374_v41  ;;  %v7389_v44 = vld [vmem:[#allocation2 + $0x278] sm:$0xff] }
  0xae   :  { %343 = vmatmul.bf16.gmra.mxu2 %v182_v45  ;;  %381 = vmatmul.bf16.gmra.mxu0 %v183_v46  ;;  %v7372_v45 = vld [vmem:[#allocation2 + $0x1f0] sm:$0xff] }
  0xaf   :  { %v7388_v46 = vld [vmem:[#allocation2 + $0x270] sm:$0xff] }
  0xb1   :  { %723 = vmatpush.bf16.msra.mxu0 %v7373_v43 }
  0xb2   :  { %v358_v56 = vpop.f32.mrf.mxu3 }
  0xb5   :  { %724 = vmatpush.bf16.msra.mxu0 %v7372_v45 }
  0xb9   :  { %725 = vmatpush.bf16.msra.mxu0 %v7371_v47 }
  0xba   :  { %v360_v0 = vpop.f32.mrf.mxu3 }
  0xbd   :  { %726 = vmatpush.bf16.msra.mxu0 %v7370_v49 }
  0xc1   :  { %727 = vmatpush.bf16.msra.mxu0 %v7369_v51 }
  0xc2   :  { %v363_v15 = vpop.f32.mrf.mxu3 }
  0xc5   :  { %728 = vmatpush.bf16.msra.mxu0 %v7368_v53 }
  0xc9   :  { %729 = vmatpush.bf16.msra.mxu0 %v7367_v55 }
  0xca   :  { %v365_v30 = vpop.f32.mrf.mxu3 }
 0x11b   :  { %v377_v58 = vpop.f32.mrf.mxu0 }
 0x121   :  { %v339_v60 = vpop.f32.mrf.mxu2 }
 0x122   :  { %v340_v61 = vadd.f32 %v7772_v57, %v339_v60 }
 0x123   :  { %v379_v3 = vpop.f32.mrf.mxu0 }
 0x124   :  { %v359_v63 = vadd.f32 %v358_v56, %v340_v61  ;;  %v7383_v56 = vld [vmem:[#allocation2 + $0x248] sm:$0xff] }
 0x126   :  { %v378_v1 = vadd.f32 %v377_v58, %v359_v63 }
 0x128   :  { %v387_v6 = vmul.f32 0.999995, %v378_v1 }
 0x129   :  { %v341_v4 = vpop.f32.mrf.mxu2 }
 0x12a   :  { %v342_v5 = vadd.f32 %v7772_v57, %v341_v4  ;;  %v391_v10 = vmax.f32 %v387_v6, 0.0 }
 0x12b   :  { %v382_v20 = vpop.f32.mrf.mxu0 }
 0x12c   :  { %v361_v7 = vadd.f32 %v360_v0, %v342_v5  ;;  %v395_v21 = vmin.f32 %v391_v10, 6.0  ;;  %v7995_v10 = vld [vmem:[#allocation2 + $0x2f0] sm:$0xff] }
 0x12e   :  { %v380_v9 = vadd.f32 %v379_v3, %v361_v7  ;;  %v7406_v7 = vld [vmem:[#allocation2 + $0x300] sm:$0xff] }
 0x130   :  { %v388_v13 = vmul.f32 0.999995, %v380_v9  ;;  %v7992_v9 = vld [vmem:[#allocation2 + $0x2f8] sm:$0xff] }
 0x131   :  { %v344_v16 = vpop.f32.mrf.mxu2 }
 0x132   :  { %v392_v17 = vmax.f32 %v388_v13, 0.0  ;;  %v345_v18 = vadd.f32 %v7772_v57, %v344_v16  ;;  %v8006_v16 = vld [vmem:[#allocation2 + $0x2d8] sm:$0xff] }
 0x133   :  { %v384_v33 = vpop.f32.mrf.mxu0 }
 0x134   :  { %v396_v22 = vmin.f32 %v392_v17, 6.0  ;;  %v364_v23 = vadd.f32 %v363_v15, %v345_v18  ;;  %v8003_v15 = vld [vmem:[#allocation2 + $0x2e0] sm:$0xff] }
 0x136   :  { %v415_v26 = vpack.c.bf16 %v396_v22, %v395_v21  ;;  %v383_v27 = vadd.f32 %v382_v20, %v364_v23  ;;  %v8012_v20 = vld [vmem:[#allocation2 + $0x2c8] sm:$0xff] }
 0x138   :  { %475 = vmatmul.bf16.vlgmr.msrb.gmra.mxu1 %v415_v26  ;;  %v389_v31 = vmul.f32 0.999995, %v383_v27 }
 0x139   :  { %v346_v28 = vpop.f32.mrf.mxu2 }
 0x13a   :  { %v347_v29 = vadd.f32 %v7772_v57, %v346_v28  ;;  %v393_v35 = vmax.f32 %v389_v31, 0.0  ;;  %v7774_v28 = vld [vmem:[#allocation4 + $0x10] ss:$0 sm:$0xff] }
 0x13c   :  { %v366_v32 = vadd.f32 %v365_v30, %v347_v29  ;;  %v397_v38 = vmin.f32 %v393_v35, 6.0 }
 0x13e   :  { %v385_v34 = vadd.f32 %v384_v33, %v366_v32 }
 0x140   :  { %v390_v36 = vmul.f32 0.999995, %v385_v34 }
 0x142   :  { %v394_v37 = vmax.f32 %v390_v36, 0.0 }
 0x144   :  { %v398_v39 = vmin.f32 %v394_v37, 6.0 }
 0x146   :  { %v416_v40 = vpack.c.bf16 %v398_v39, %v397_v38 }
 0x148   :  { %480 = vmatmul.bf16.gmra.mxu1 %v416_v40  ;;  %492 = vmatpush.bf16.msrb.mxu2 %v416_v40 }
 0x149   :  { %511 = vmatpush.bf16.msrb.mxu3 %v416_v40 }
 0x14c   :  { %493 = vmatpush.bf16.msrb.mxu2 %v415_v26 }
 0x14d   :  { %512 = vmatpush.bf16.msrb.mxu3 %v415_v26 }
 0x14f   :  { %5770 = vmatmul.msk.bf16.vlgmr.msrb.gmra.mxu2 %vm67_vm0, %v7961_v11 }
 0x150   :  { %5772 = vmatmul.msk.bf16.vlgmr.msrb.gmra.mxu3 %vm67_vm0, %v7963_v12  ;;  %760 = vmatpush.bf16.msra.mxu2 %v7390_v42 }
 0x154   :  { %761 = vmatpush.bf16.msra.mxu2 %v7389_v44 }
 0x158   :  { %749 = vmatmul.bf16.vlgmr.msra.gmra.mxu1 %v415_v26  ;;  %762 = vmatpush.bf16.msra.mxu2 %v7388_v46 }
 0x15c   :  { %763 = vmatpush.bf16.msra.mxu2 %v7387_v48 }
 0x15f   :  { %5771 = vmatmul.msk.bf16.gmra.mxu2 %vm67_vm0, %v7969_v24 }
 0x160   :  { %5773 = vmatmul.msk.bf16.gmra.mxu3 %vm67_vm0, %v7971_v25  ;;  %764 = vmatpush.bf16.msra.mxu2 %v7386_v50 }
 0x164   :  { %765 = vmatpush.bf16.msra.mxu2 %v7385_v52 }
 0x168   :  { %754 = vmatmul.bf16.gmra.mxu1 %v416_v40  ;;  %766 = vmatpush.bf16.msra.mxu2 %v7384_v54 }
 0x16c   :  { %767 = vmatpush.bf16.msra.mxu2 %v7383_v56 }
 0x170   :  { %7742 = vmatpush.bf16.msrb.mxu2 %v7406_v7 }
 0x174   :  { %7743 = vmatpush.bf16.msrb.mxu2 %v7992_v9 }
 0x178   :  { %7744 = vmatpush.bf16.msrb.mxu2 %v7995_v10 }
 0x17c   :  { %7745 = vmatpush.bf16.msrb.mxu2 %v8000_v14 }
 0x180   :  { %7746 = vmatpush.bf16.msrb.mxu2 %v8003_v15 }
 0x184   :  { %7747 = vmatpush.bf16.msrb.mxu2 %v8006_v16 }
 0x188   :  { %7748 = vmatpush.bf16.msrb.mxu2 %v8009_v19 }
 0x18c   :  { %7749 = vmatpush.bf16.msrb.mxu2 %v8012_v20 }
 0x1b5   :  { %v7986_v5 = vpop.f32.mrf.mxu1 }
 0x1bd   :  { %v7988_v6 = vpop.f32.mrf.mxu1 }
 0x1c5   :  { %v7990_v8 = vpop.f32.mrf.mxu1 }
 0x1cd   :  { %v7998_v13 = vpop.f32.mrf.mxu1 }
 0x1d2   :  { %v495_v57 = vpop.f32.mrf.mxu2 }
 0x1d3   :  { %v514_v58 = vpop.f32.mrf.mxu3 }
 0x1d5   :  { %v750_v17 = vpop.f32.mrf.mxu1 }
 0x1da   :  { %v497_v59 = vpop.f32.mrf.mxu2 }
 0x1db   :  { %v572_v60 = vpack.c.bf16 %v497_v59, %v495_v57  ;;  %v516_v61 = vpop.f32.mrf.mxu3 }
 0x1dc   :  { %v573_v62 = vpack.c.bf16 %v516_v61, %v514_v58  ;;  %v7398_v61 = vld [vmem:[#allocation2 + $0x2c0] sm:$0xff] }
 0x1dd   :  { %730 = vmatmul.bf16.vlgmr.msra.gmra.mxu0 %v572_v60  ;;  %v752_v23 = vpop.f32.mrf.mxu1  ;;  %v7414_v60 = vld [vmem:[#allocation2 + $0x340] sm:$0xff]  ;;  %1029 = vmatpush.bf16.msrb.mxu1 %v7398_v61 }
 0x1de   :  { %768 = vmatmul.bf16.vlgmr.msra.gmra.mxu2 %v573_v62  ;;  %v7413_v62 = vld [vmem:[#allocation2 + $0x338] sm:$0xff] }
 0x1e2   :  { %v500_v63 = vpop.f32.mrf.mxu2 }
 0x1e3   :  { %v519_v0 = vpop.f32.mrf.mxu3 }
 0x1e5   :  { %v755_v29 = vpop.f32.mrf.mxu1 }
 0x1ea   :  { %v502_v1 = vpop.f32.mrf.mxu2 }
 0x1eb   :  { %v521_v2 = vpop.f32.mrf.mxu3  ;;  %v574_v3 = vpack.c.bf16 %v502_v1, %v500_v63  ;;  %v7397_v63 = vld [vmem:[#allocation2 + $0x2b8] sm:$0xff]  ;;  %v7396_v1 = vld [vmem:[#allocation2 + $0x2b0] sm:$0xff] }
 0x1ec   :  { %v575_v4 = vpack.c.bf16 %v521_v2, %v519_v0  ;;  %v7412_v0 = vld [vmem:[#allocation2 + $0x330] sm:$0xff]  ;;  %1030 = vmatpush.bf16.msrb.mxu1 %v7397_v63  ;;  %v7410_v2 = vld [vmem:[#allocation2 + $0x320] sm:$0xff] }
 0x1ed   :  { %735 = vmatmul.bf16.gmra.mxu0 %v574_v3  ;;  %v757_v41 = vpop.f32.mrf.mxu1  ;;  %v7409_v3 = vld [vmem:[#allocation2 + $0x318] sm:$0xff] }
 0x1ee   :  { %773 = vmatmul.bf16.gmra.mxu2 %v575_v4  ;;  %v7394_v4 = vld [vmem:[#allocation2 + $0x2a0] sm:$0xff] }
 0x1f0   :  { %1031 = vmatpush.bf16.msrb.mxu1 %v7396_v1 }
 0x25a   :  { %v731_v18 = vpop.f32.mrf.mxu0 }
 0x25b   :  { %v732_v33 = vadd.f32 %v7774_v28, %v731_v18 }
 0x25d   :  { %v751_v39 = vadd.f32 %v750_v17, %v732_v33  ;;  %v7418_v33 = vld [vmem:[#allocation2 + $0x358] sm:$0xff] }
 0x261   :  { %v769_v21 = vpop.f32.mrf.mxu2 }
 0x262   :  { %v733_v22 = vpop.f32.mrf.mxu0  ;;  %v770_v42 = vadd.f32 %v769_v21, %v751_v39 }
 0x263   :  { %v734_v31 = vadd.f32 %v7774_v28, %v733_v22 }
 0x264   :  { %v779_v48 = vmul.f32 0.999995, %v770_v42 }
 0x265   :  { %v753_v36 = vadd.f32 %v752_v23, %v734_v31  ;;  %v7420_v31 = vld [vmem:[#allocation2 + $0x368] sm:$0xff] }
 0x266   :  { %v783_v53 = vmax.f32 %v779_v48, 0.0 }
 0x268   :  { %v787_v58 = vmin.f32 %v783_v53, 6.0 }
 0x269   :  { %v771_v26 = vpop.f32.mrf.mxu2 }
 0x26a   :  { %v736_v27 = vpop.f32.mrf.mxu0  ;;  %v772_v40 = vadd.f32 %v771_v26, %v753_v36  ;;  %v7417_v36 = vld [vmem:[#allocation2 + $0x350] sm:$0xff] }
 0x26b   :  { %v737_v30 = vadd.f32 %v7774_v28, %v736_v27 }
 0x26c   :  { %v780_v46 = vmul.f32 0.999995, %v772_v40 }
 0x26d   :  { %v756_v34 = vadd.f32 %v755_v29, %v737_v30  ;;  %v7422_v29 = vld [vmem:[#allocation2 + $0x378] sm:$0xff]  ;;  %v7421_v30 = vld [vmem:[#allocation2 + $0x370] sm:$0xff] }
 0x26e   :  { %v784_v51 = vmax.f32 %v780_v46, 0.0 }
 0x270   :  { %v788_v56 = vmin.f32 %v784_v51, 6.0  ;;  %v7773_v51 = vld [vmem:[#allocation4 + $0x8] ss:$0 sm:$0xff] }
 0x271   :  { %v774_v32 = vpop.f32.mrf.mxu2 }
 0x272   :  { %v738_v35 = vpop.f32.mrf.mxu0  ;;  %v775_v37 = vadd.f32 %v774_v32, %v756_v34  ;;  %v791_v59 = vpack.c.bf16 %v788_v56, %v787_v58  ;;  %v7419_v32 = vld [vmem:[#allocation2 + $0x360] sm:$0xff] }
 0x273   :  { %v739_v38 = vadd.f32 %v7774_v28, %v738_v35  ;;  %v7423_v28 = vld [vmem:[#allocation2 + $0x380] sm:$0xff] }
 0x274   :  { %v781_v43 = vmul.f32 0.999995, %v775_v37  ;;  %v7416_v37 = vld [vmem:[#allocation2 + $0x348] sm:$0xff] }
 0x275   :  { %v758_v44 = vadd.f32 %v757_v41, %v739_v38  ;;  %v7775_v41 = vld [vmem:[#allocation4 + $0x18] ss:$0 sm:$0xff] }
 0x276   :  { %v785_v49 = vmax.f32 %v781_v43, 0.0 }
 0x278   :  { %v789_v54 = vmin.f32 %v785_v49, 6.0 }
 0x279   :  { %v776_v45 = vpop.f32.mrf.mxu2 }
 0x27a   :  { %v777_v47 = vadd.f32 %v776_v45, %v758_v44 }
 0x27c   :  { %v782_v50 = vmul.f32 0.999995, %v777_v47 }
 0x27e   :  { %v786_v52 = vmax.f32 %v782_v50, 0.0 }
 0x280   :  { %v790_v55 = vmin.f32 %v786_v52, 6.0 }
 0x282   :  { %v792_v57 = vpack.c.bf16 %v790_v55, %v789_v54  ;;  %v482_v54 = vadd.f32 %v7773_v51, %v7990_v8 }
 0x284   :  { %799 = vmatpush.bf16.msra.mxu3 %v792_v57  ;;  %818 = vmatpush.bf16.msrb.mxu0 %v792_v57 }
 0x285   :  { %1061 = vmatmul.bf16.vlgmr.msrb.gmra.mxu2 %v792_v57  ;;  %v479_v57 = vadd.f32 %v7773_v51, %v7988_v6 }
 0x288   :  { %800 = vmatpush.bf16.msra.mxu3 %v791_v59  ;;  %819 = vmatpush.bf16.msrb.mxu0 %v791_v59 }
 0x28b   :  { %5870 = vmatmul.msk.bf16.vlgmr.msra.gmra.mxu3 %vm67_vm0, %v7961_v11  ;;  %5872 = vmatmul.msk.bf16.vlgmr.msrb.gmra.mxu0 %vm67_vm0, %v7963_v12  ;;  %v7411_v11 = vld [vmem:[#allocation2 + $0x328] sm:$0xff] }
 0x28c   :  { %1048 = vmatpush.bf16.msra.mxu0 %v7406_v7  ;;  %1067 = vmatpush.bf16.msrb.mxu3 %v7414_v60  ;;  %v7395_v12 = vld [vmem:[#allocation2 + $0x2a8] sm:$0xff]  ;;  %v7408_v7 = vld [vmem:[#allocation2 + $0x310] sm:$0xff] }
 0x28d   :  { %1032 = vmatpush.bf16.msrb.mxu1 %v7395_v12 }
 0x290   :  { %1049 = vmatpush.bf16.msra.mxu0 %v7992_v9  ;;  %1068 = vmatpush.bf16.msrb.mxu3 %v7413_v62  ;;  %v7393_v9 = vld [vmem:[#allocation2 + $0x298] sm:$0xff]  ;;  %v477_v62 = vadd.f32 %v7773_v51, %v7986_v5 }
 0x291   :  { %1033 = vmatpush.bf16.msrb.mxu1 %v7394_v4 }
 0x294   :  { %1050 = vmatpush.bf16.msra.mxu0 %v7995_v10  ;;  %1069 = vmatpush.bf16.msrb.mxu3 %v7412_v0  ;;  %v7392_v10 = vld [vmem:[#allocation2 + $0x290] sm:$0xff] }
 0x295   :  { %1034 = vmatpush.bf16.msrb.mxu1 %v7393_v9 }
 0x298   :  { %1051 = vmatpush.bf16.msra.mxu0 %v8000_v14  ;;  %1070 = vmatpush.bf16.msrb.mxu3 %v7411_v11  ;;  %v484_v11 = vadd.f32 %v7773_v51, %v7998_v13  ;;  %v7443_v51 = vld [vmem:[#allocation2 + $0x408] sm:$0xff] }
 0x299   :  { %1035 = vmatpush.bf16.msrb.mxu1 %v7392_v10 }
 0x29b   :  { %5871 = vmatmul.msk.bf16.gmra.mxu3 %vm67_vm0, %v7969_v24  ;;  %5873 = vmatmul.msk.bf16.gmra.mxu0 %vm67_vm0, %v7971_v25  ;;  %v7407_v24 = vld [vmem:[#allocation2 + $0x308] sm:$0xff] }
 0x29c   :  { %1052 = vmatpush.bf16.msra.mxu0 %v8003_v15  ;;  %1071 = vmatpush.bf16.msrb.mxu3 %v7410_v2  ;;  %v7391_v25 = vld [vmem:[#allocation2 + $0x288] sm:$0xff] }
 0x29d   :  { %1036 = vmatpush.bf16.msrb.mxu1 %v7391_v25 }
 0x2a0   :  { %1053 = vmatpush.bf16.msra.mxu0 %v8006_v16  ;;  %1072 = vmatpush.bf16.msrb.mxu3 %v7409_v3 }
 0x2a1   :  { %1195 = vmatpush.bf16.msra.mxu1 %v7423_v28 }
 0x2a4   :  { %1054 = vmatpush.bf16.msra.mxu0 %v8009_v19  ;;  %1073 = vmatpush.bf16.msrb.mxu3 %v7408_v7 }
 0x2a5   :  { %1196 = vmatpush.bf16.msra.mxu1 %v7422_v29  ;;  %v7450_v29 = vld [vmem:[#allocation2 + $0x440] sm:$0xff] }
 0x2a8   :  { %1055 = vmatpush.bf16.msra.mxu0 %v8012_v20  ;;  %1074 = vmatpush.bf16.msrb.mxu3 %v7407_v24 }
 0x2a9   :  { %1197 = vmatpush.bf16.msra.mxu1 %v7421_v30 }
 0x2ab   :  { %1056 = vmatmul.bf16.vlgmr.msra.gmra.mxu0 %v791_v59 }
 0x2ad   :  { %1198 = vmatpush.bf16.msra.mxu1 %v7420_v31  ;;  %v7430_v31 = vld [vmem:[#allocation2 + $0x3a0] sm:$0xff] }
 0x2b1   :  { %1199 = vmatpush.bf16.msra.mxu1 %v7419_v32  ;;  %v7449_v32 = vld [vmem:[#allocation2 + $0x438] sm:$0xff] }
 0x2b5   :  { %1200 = vmatpush.bf16.msra.mxu1 %v7418_v33  ;;  %v7448_v33 = vld [vmem:[#allocation2 + $0x430] sm:$0xff] }
 0x2b9   :  { %1201 = vmatpush.bf16.msra.mxu1 %v7417_v36  ;;  %v7447_v36 = vld [vmem:[#allocation2 + $0x428] sm:$0xff] }
 0x2bd   :  { %1202 = vmatpush.bf16.msra.mxu1 %v7416_v37  ;;  %v7442_v37 = vld [vmem:[#allocation2 + $0x400] sm:$0xff] }
 0x308   :  { %v821_v14 = vpop.f32.mrf.mxu0  ;;  %v1062_v43 = vpop.f32.mrf.mxu2 }
 0x30e   :  { %v802_v15 = vpop.f32.mrf.mxu3 }
 0x310   :  { %v823_v16 = vpop.f32.mrf.mxu0  ;;  %v1064_v61 = vpop.f32.mrf.mxu2 }
 0x311   :  { %v880_v17 = vpack.c.bf16 %v823_v16, %v821_v14 }
 0x313   :  { %1075 = vmatmul.bf16.vlgmr.msrb.gmra.mxu3 %v880_v17 }
 0x316   :  { %v804_v18 = vpop.f32.mrf.mxu3 }
 0x317   :  { %v879_v19 = vpack.c.bf16 %v804_v18, %v802_v15  ;;  %v7415_v18 = vld [vmem:[#allocation2 + $0x58] sm:$0xff] }
 0x318   :  { %v826_v20 = vpop.f32.mrf.mxu0 }
 0x319   :  { %1037 = vmatmul.bf16.vlgmr.msrb.gmra.mxu1 %v879_v19  ;;  %v7424_v19 = vld [vmem:[#allocation2 + $0x40] sm:$0xff] }
 0x31e   :  { %v807_v21 = vpop.f32.mrf.mxu3 }
 0x320   :  { %v828_v22 = vpop.f32.mrf.mxu0 }
 0x321   :  { %v882_v23 = vpack.c.bf16 %v828_v22, %v826_v20  ;;  %v7426_v20 = vld [vmem:[#allocation2 + $0x50] sm:$0xff]  ;;  %v7433_v22 = vld [vmem:[#allocation2 + $0x3b8] sm:$0xff] }
 0x323   :  { %1080 = vmatmul.bf16.gmra.mxu3 %v882_v23 }
 0x326   :  { %v809_v26 = vpop.f32.mrf.mxu3 }
 0x327   :  { %v881_v27 = vpack.c.bf16 %v809_v26, %v807_v21  ;;  %v7434_v21 = vld [vmem:[#allocation2 + $0x3c0] sm:$0xff]  ;;  %v7432_v26 = vld [vmem:[#allocation2 + $0x3b0] sm:$0xff] }
 0x328   :  { %v1057_v38 = vpop.f32.mrf.mxu0  ;;  %1478 = vmatpush.bf16.msra.mxu3 %v7434_v21  ;;  %v7451_v21 = vld [vmem:[#allocation2 + $0x20] sm:$0xff] }
 0x329   :  { %1042 = vmatmul.bf16.gmra.mxu1 %v881_v27  ;;  %v7431_v27 = vld [vmem:[#allocation2 + $0x3a8] sm:$0xff] }
 0x32c   :  { %1479 = vmatpush.bf16.msra.mxu3 %v7433_v22  ;;  %v7452_v22 = vld [vmem:[#allocation2 + $0x28] sm:$0xff] }
 0x330   :  { %v1059_v47 = vpop.f32.mrf.mxu0  ;;  %1480 = vmatpush.bf16.msra.mxu3 %v7432_v26  ;;  %v7476_v26 = vld [vmem:[#allocation2 + $0x500] sm:$0xff] }
 0x334   :  { %1481 = vmatpush.bf16.msra.mxu3 %v7431_v27  ;;  %v7467_v27 = vld [vmem:[#allocation2 + $0x4b8] sm:$0xff] }
 0x338   :  { %1482 = vmatpush.bf16.msra.mxu3 %v7430_v31  ;;  %v7458_v31 = vld [vmem:[#allocation2 + $0x470] sm:$0xff] }
 0x396   :  { %v1038_v34 = vpop.f32.mrf.mxu1  ;;  %v1076_v35 = vpop.f32.mrf.mxu3 }
 0x397   :  { %v1039_v45 = vadd.f32 %v7775_v41, %v1038_v34  ;;  %v7425_v34 = vld [vmem:[#allocation2 + $0x48] sm:$0xff] }
 0x399   :  { %v1058_v52 = vadd.f32 %v1057_v38, %v1039_v45  ;;  %v7428_v38 = vld [vmem:[#allocation2 + $0x390] sm:$0xff]  ;;  %v7445_v45 = vld [vmem:[#allocation2 + $0x418] sm:$0xff] }
 0x39b   :  { %v1077_v58 = vadd.f32 %v1076_v35, %v1058_v52  ;;  %v7429_v35 = vld [vmem:[#allocation2 + $0x398] sm:$0xff]  ;;  %v7438_v52 = vld [vmem:[#allocation2 + $0x3e0] sm:$0xff] }
 0x39c   :  { %1483 = vmatpush.bf16.msra.mxu3 %v7429_v35  ;;  %v7473_v35 = vld [vmem:[#allocation2 + $0x4e8] sm:$0xff] }
 0x39d   :  { %v8038_v12 = vadd.f32 %v1077_v58, %v477_v62 }
 0x39e   :  { %v1040_v39 = vpop.f32.mrf.mxu1  ;;  %v1078_v40 = vpop.f32.mrf.mxu3 }
 0x39f   :  { %v1041_v42 = vadd.f32 %v7775_v41, %v1040_v39  ;;  %v1090_v4 = vmul.f32 0.999995, %v8038_v12  ;;  %v7446_v39 = vld [vmem:[#allocation2 + $0x420] sm:$0xff] }
 0x3a0   :  { %1484 = vmatpush.bf16.msra.mxu3 %v7428_v38  ;;  %v7472_v38 = vld [vmem:[#allocation2 + $0x4e0] sm:$0xff] }
 0x3a1   :  { %v1060_v49 = vadd.f32 %v1059_v47, %v1041_v42  ;;  %v1094_v10 = vmax.f32 %v1090_v4, 0.0  ;;  %v7441_v42 = vld [vmem:[#allocation2 + $0x3f8] sm:$0xff] }
 0x3a3   :  { %v1079_v55 = vadd.f32 %v1078_v40, %v1060_v49  ;;  %v1098_v16 = vmin.f32 %v1094_v10, 6.0  ;;  %v7439_v49 = vld [vmem:[#allocation2 + $0x3e8] sm:$0xff] }
 0x3a5   :  { %v8035_v63 = vadd.f32 %v1079_v55, %v479_v57  ;;  %v7436_v55 = vld [vmem:[#allocation2 + $0x3d0] sm:$0xff] }
 0x3a6   :  { %v1043_v44 = vpop.f32.mrf.mxu1  ;;  %v1081_v48 = vpop.f32.mrf.mxu3 }
 0x3a7   :  { %v1044_v46 = vadd.f32 %v7775_v41, %v1043_v44  ;;  %v1091_v6 = vmul.f32 0.999995, %v8035_v63 }
 0x3a9   :  { %v1063_v50 = vadd.f32 %v1062_v43, %v1044_v46  ;;  %v1095_v9 = vmax.f32 %v1091_v6, 0.0  ;;  %v7440_v46 = vld [vmem:[#allocation2 + $0x3f0] sm:$0xff] }
 0x3ab   :  { %v1082_v53 = vadd.f32 %v1081_v48, %v1063_v50  ;;  %v1099_v13 = vmin.f32 %v1095_v9, 6.0  ;;  %v7444_v48 = vld [vmem:[#allocation2 + $0x410] sm:$0xff] }
 0x3ad   :  { %v8032_v59 = vadd.f32 %v1082_v53, %v482_v54  ;;  %v1104_v17 = vpack.c.bf16 %v1099_v13, %v1098_v16  ;;  %v7437_v54 = vld [vmem:[#allocation2 + $0x3d8] sm:$0xff] }
 0x3ae   :  { %v1045_v56 = vpop.f32.mrf.mxu1  ;;  %v1083_v1 = vpop.f32.mrf.mxu3 }
 0x3af   :  { %v1046_v60 = vadd.f32 %v7775_v41, %v1045_v56  ;;  %v1092_v8 = vmul.f32 0.999995, %v8032_v59  ;;  %v7427_v41 = vld [vmem:[#allocation2 + $0x388] sm:$0xff] }
 0x3b0   :  { %1485 = vmatpush.bf16.msra.mxu3 %v7427_v41  ;;  %v7435_v56 = vld [vmem:[#allocation2 + $0x3c8] sm:$0xff] }
 0x3b1   :  { %v1065_v0 = vadd.f32 %v1064_v61, %v1046_v60  ;;  %v1096_v7 = vmax.f32 %v1092_v8, 0.0  ;;  %v7461_v41 = vld [vmem:[#allocation2 + $0x488] sm:$0xff] }
 0x3b3   :  { %v1084_v2 = vadd.f32 %v1083_v1, %v1065_v0  ;;  %v1100_v25 = vmin.f32 %v1096_v7, 6.0  ;;  %v7777_v1 = vld [vmem:[#allocation4 + $0x28] ss:$0 sm:$0xff] }
 0x3b5   :  { %v8042_v3 = vadd.f32 %v1084_v2, %v484_v11 }
 0x3b7   :  { %v1093_v5 = vmul.f32 0.999995, %v8042_v3 }
 0x3b9   :  { %v1097_v24 = vmax.f32 %v1093_v5, 0.0 }
 0x3bb   :  { %v1101_v14 = vmin.f32 %v1097_v24, 6.0 }
 0x3bd   :  { %v1105_v15 = vpack.c.bf16 %v1101_v14, %v1100_v25 }
 0x3bf   :  { %1120 = vmatpush.bf16.msrb.mxu0 %v1105_v15  ;;  %1249 = vmatpush.bf16.msrb.mxu1 %v1105_v15 }
 0x3c0   :  { %1273 = vmatpush.bf16.msra.mxu2 %v1105_v15 }
 0x3c3   :  { %1121 = vmatpush.bf16.msrb.mxu0 %v1104_v17  ;;  %1250 = vmatpush.bf16.msrb.mxu1 %v1104_v17 }
 0x3c4   :  { %1274 = vmatpush.bf16.msra.mxu2 %v1104_v17 }
 0x3c6   :  { %5974 = vmatmul.msk.bf16.vlgmr.msrb.gmra.mxu0 %vm67_vm0, %v7415_v18 }
 0x3c7   :  { %1225 = vmatpush.bf16.msra.mxu0 %v1105_v15  ;;  %6021 = vmatmul.msk.bf16.vlgmr.msra.gmra.mxu2 %vm67_vm0, %v7426_v20 }
 0x3cb   :  { %1226 = vmatpush.bf16.msra.mxu0 %v1104_v17 }
 0x3cf   :  { %1492 = vmatpush.bf16.msrb.mxu0 %v7442_v37  ;;  %v7456_v37 = vld [vmem:[#allocation2 + $0x460] sm:$0xff] }
 0x3d3   :  { %1493 = vmatpush.bf16.msrb.mxu0 %v7441_v42  ;;  %v7455_v42 = vld [vmem:[#allocation2 + $0x458] sm:$0xff] }
 0x3d6   :  { %6011 = vmatmul.msk.bf16.vlgmr.msra.gmra.mxu0 %vm67_vm0, %v7424_v19  ;;  %v7468_v19 = vld [vmem:[#allocation2 + $0x4c0] sm:$0xff] }
 0x3d7   :  { %1494 = vmatpush.bf16.msrb.mxu0 %v7440_v46  ;;  %v7453_v46 = vld [vmem:[#allocation2 + $0x448] sm:$0xff] }
 0x3db   :  { %1495 = vmatpush.bf16.msrb.mxu0 %v7439_v49 }
 0x3df   :  { %1496 = vmatpush.bf16.msrb.mxu0 %v7438_v52 }
 0x3e3   :  { %1497 = vmatpush.bf16.msrb.mxu0 %v7437_v54  ;;  %v7778_v54 = vld [vmem:[#allocation4 + $0x30] ss:$0 sm:$0xff] }
 0x3e7   :  { %1498 = vmatpush.bf16.msrb.mxu0 %v7436_v55 }
 0x3eb   :  { %1499 = vmatpush.bf16.msrb.mxu0 %v7435_v56 }
 0x3ef   :  { %1800 = vmatpush.bf16.msra.mxu0 %v7476_v26  ;;  %v7499_v26 = vld [vmem:[#allocation2 + $0x5b8] sm:$0xff] }
 0x443   :  { %v1123_v23 = vpop.f32.mrf.mxu0 }
 0x44a   :  { %v1276_v44 = vpop.f32.mrf.mxu2 }
 0x44b   :  { %v1125_v28 = vpop.f32.mrf.mxu0 }
 0x44c   :  { %v1144_v30 = vpack.c.bf16 %v1125_v28, %v1123_v23  ;;  %v7460_v23 = vld [vmem:[#allocation2 + $0x480] sm:$0xff]  ;;  %v7459_v28 = vld [vmem:[#allocation2 + $0x478] sm:$0xff] }
 0x44e   :  { %1203 = vmatmul.bf16.vlgmr.msra.gmra.mxu1 %v1144_v30  ;;  %v7466_v30 = vld [vmem:[#allocation2 + $0x4b0] sm:$0xff] }
 0x44f   :  { %1506 = vmatpush.bf16.msra.mxu1 %v7450_v29  ;;  %v7475_v29 = vld [vmem:[#allocation2 + $0x4f8] sm:$0xff] }
 0x450   :  { %1801 = vmatpush.bf16.msra.mxu0 %v7475_v29  ;;  %v7498_v29 = vld [vmem:[#allocation2 + $0x5b0] sm:$0xff] }
 0x452   :  { %v1278_v50 = vpop.f32.mrf.mxu2 }
 0x453   :  { %1507 = vmatpush.bf16.msra.mxu1 %v7449_v32  ;;  %v1228_v40 = vpop.f32.mrf.mxu0  ;;  %v1331_v53 = vpack.c.bf16 %v1278_v50, %v1276_v44  ;;  %v7474_v32 = vld [vmem:[#allocation2 + $0x4f0] sm:$0xff] }
 0x454   :  { %1802 = vmatpush.bf16.msra.mxu0 %v7474_v32  ;;  %v7454_v44 = vld [vmem:[#allocation2 + $0x450] sm:$0xff]  ;;  %v7497_v32 = vld [vmem:[#allocation2 + $0x5a8] sm:$0xff] }
 0x457   :  { %1508 = vmatpush.bf16.msra.mxu1 %v7448_v33  ;;  %v7465_v33 = vld [vmem:[#allocation2 + $0x4a8] sm:$0xff] }
 0x458   :  { %1803 = vmatpush.bf16.msra.mxu0 %v7473_v35  ;;  %v7496_v35 = vld [vmem:[#allocation2 + $0x5a0] sm:$0xff] }
 0x45b   :  { %1509 = vmatpush.bf16.msra.mxu1 %v7447_v36  ;;  %v1230_v43 = vpop.f32.mrf.mxu0  ;;  %v7464_v36 = vld [vmem:[#allocation2 + $0x4a0] sm:$0xff] }
 0x45c   :  { %v1329_v47 = vpack.c.bf16 %v1230_v43, %v1228_v40  ;;  %1804 = vmatpush.bf16.msra.mxu0 %v7472_v38  ;;  %v7462_v40 = vld [vmem:[#allocation2 + $0x490] sm:$0xff]  ;;  %v7471_v43 = vld [vmem:[#allocation2 + $0x4d8] sm:$0xff] }
 0x45d   :  { %v7495_v38 = vld [vmem:[#allocation2 + $0x598] sm:$0xff] }
 0x45e   :  { %6016 = vmatmul.msk.bf16.vlgmr.msrb.gmra.mxu1 %vm67_vm0, %v7425_v34  ;;  %1486 = vmatmul.bf16.vlgmr.msra.gmra.mxu3 %v1329_v47  ;;  %v7457_v34 = vld [vmem:[#allocation2 + $0x468] sm:$0xff] }
 0x45f   :  { %1510 = vmatpush.bf16.msra.mxu1 %v7446_v39  ;;  %v7463_v39 = vld [vmem:[#allocation2 + $0x498] sm:$0xff]  ;;  %v7469_v47 = vld [vmem:[#allocation2 + $0x4c8] sm:$0xff] }
 0x460   :  { %1805 = vmatpush.bf16.msra.mxu0 %v7471_v43  ;;  %v7485_v43 = vld [vmem:[#allocation2 + $0x548] sm:$0xff] }
 0x463   :  { %1511 = vmatpush.bf16.msra.mxu1 %v7445_v45  ;;  %v7470_v45 = vld [vmem:[#allocation2 + $0x4d0] sm:$0xff] }
 0x464   :  { %1806 = vmatpush.bf16.msra.mxu0 %v7470_v45  ;;  %v1822_v45 = vld [vmem:[#allocation2 + $0x78] sm:$0xf] }
 0x467   :  { %1512 = vmatpush.bf16.msra.mxu1 %v7444_v48 }
 0x468   :  { %1807 = vmatpush.bf16.msra.mxu0 %v7469_v47  ;;  %v7484_v47 = vld [vmem:[#allocation2 + $0x540] sm:$0xff] }
 0x46b   :  { %1513 = vmatpush.bf16.msra.mxu1 %v7443_v51 }
 0x46e   :  { %1514 = vmatmul.bf16.vlgmr.msra.gmra.mxu1 %v1331_v53 }
 0x4cb   :  { %v8050_v57 = vpop.f32.mrf.mxu1 }
 0x4d3   :  { %v8052_v58 = vpop.f32.mrf.mxu1 }
 0x4db   :  { %v1252_v60 = vpop.f32.mrf.mxu1 }
 0x4e1   :  { %v1487_v0 = vpop.f32.mrf.mxu3 }
 0x4e2   :  { %v1488_v11 = vadd.f32 %v7777_v1, %v1487_v0 }
 0x4e3   :  { %v1254_v61 = vpop.f32.mrf.mxu1 }
 0x4e4   :  { %v1330_v62 = vpack.c.bf16 %v1254_v61, %v1252_v60 }
 0x4e6   :  { %1500 = vmatmul.bf16.vlgmr.msrb.gmra.mxu0 %v1330_v62  ;;  %v7776_v62 = vld [vmem:[#allocation4 + $0x20] ss:$0 sm:$0xff] }
 0x4e9   :  { %v1489_v4 = vpop.f32.mrf.mxu3 }
 0x4ea   :  { %v1490_v5 = vadd.f32 %v7777_v1, %v1489_v4 }
 0x4eb   :  { %v1515_v8 = vpop.f32.mrf.mxu1 }
 0x4f3   :  { %v1517_v25 = vpop.f32.mrf.mxu1 }
 0x563   :  { %v1501_v2 = vpop.f32.mrf.mxu0 }
 0x564   :  { %v1502_v6 = vadd.f32 %v1501_v2, %v1488_v11  ;;  %v1205_v11 = vadd.f32 %v7776_v62, %v8050_v57 }
 0x566   :  { %v1516_v7 = vadd.f32 %v1515_v8, %v1502_v6 }
 0x568   :  { %v1520_v24 = vmul.f32 0.999995, %v1516_v7 }
 0x56a   :  { %v1522_v13 = vmax.f32 %v1520_v24, 0.0 }
 0x56b   :  { %v1503_v9 = vpop.f32.mrf.mxu0 }
 0x56c   :  { %v1504_v10 = vadd.f32 %v1503_v9, %v1490_v5  ;;  %v1524_v17 = vmin.f32 %v1522_v13, 6.0  ;;  %v1207_v9 = vadd.f32 %v7776_v62, %v8052_v58  ;;  %v1937_v58 = vld [vmem:[#allocation2 + $0x68] sm:$0xf] }
 0x56e   :  { %v1518_v14 = vadd.f32 %v1517_v25, %v1504_v10 }
 0x570   :  { %v1521_v15 = vmul.f32 0.999995, %v1518_v14 }
 0x572   :  { %v1523_v16 = vmax.f32 %v1521_v15, 0.0 }
 0x574   :  { %v1525_v18 = vmin.f32 %v1523_v16, 6.0 }
 0x576   :  { %v1528_v20 = vpack.c.bf16 %v1525_v18, %v1524_v17  ;;  %v7492_v18 = vld [vmem:[#allocation2 + $0x580] sm:$0xff] }
 0x578   :  { %1545 = vmatpush.bf16.msrb.mxu2 %v1528_v20  ;;  %1569 = vmatpush.bf16.msrb.mxu3 %v1528_v20 }
 0x57b   :  { %6122 = vmatmul.msk.bf16.vlgmr.msrb.gmra.mxu2 %vm1534_vm1, %v7451_v21  ;;  %6127 = vmatmul.msk.bf16.vlgmr.msrb.gmra.mxu3 %vm1534_vm1, %v7452_v22  ;;  %v1920_v21 = vld [vmem:[#allocation2 + $0x60] sm:$0xf]  ;;  %v1954_v22 = vld [vmem:[#allocation2 + $0x70] sm:$0xf] }
 0x57c   :  { %1786 = vmatpush.bf16.msra.mxu3 %v7468_v19  ;;  %1772 = vmatpush.bf16.msra.mxu2 %v7460_v23  ;;  %v7500_v19 = vld [vmem:[#allocation2 + $0x5c0] sm:$0xff]  ;;  %v7491_v23 = vld [vmem:[#allocation2 + $0x578] sm:$0xff] }
 0x580   :  { %1787 = vmatpush.bf16.msra.mxu3 %v7467_v27  ;;  %1773 = vmatpush.bf16.msra.mxu2 %v7459_v28  ;;  %v7507_v27 = vld [vmem:[#allocation2 + $0x5f8] sm:$0xff]  ;;  %v7490_v28 = vld [vmem:[#allocation2 + $0x570] sm:$0xff] }
 0x584   :  { %1788 = vmatpush.bf16.msra.mxu3 %v7466_v30  ;;  %1774 = vmatpush.bf16.msra.mxu2 %v7458_v31  ;;  %v7506_v30 = vld [vmem:[#allocation2 + $0x5f0] sm:$0xff]  ;;  %v7489_v31 = vld [vmem:[#allocation2 + $0x568] sm:$0xff] }
 0x588   :  { %1789 = vmatpush.bf16.msra.mxu3 %v7465_v33  ;;  %1775 = vmatpush.bf16.msra.mxu2 %v7457_v34  ;;  %v7505_v33 = vld [vmem:[#allocation2 + $0x5e8] sm:$0xff]  ;;  %v7488_v34 = vld [vmem:[#allocation2 + $0x560] sm:$0xff] }
 0x58c   :  { %1790 = vmatpush.bf16.msra.mxu3 %v7464_v36  ;;  %1776 = vmatpush.bf16.msra.mxu2 %v7456_v37  ;;  %v7504_v36 = vld [vmem:[#allocation2 + $0x5e0] sm:$0xff]  ;;  %v7487_v37 = vld [vmem:[#allocation2 + $0x558] sm:$0xff] }
 0x590   :  { %1791 = vmatpush.bf16.msra.mxu3 %v7463_v39  ;;  %1777 = vmatpush.bf16.msra.mxu2 %v7455_v42  ;;  %v7503_v39 = vld [vmem:[#allocation2 + $0x5d8] sm:$0xff]  ;;  %v7502_v42 = vld [vmem:[#allocation2 + $0x5d0] sm:$0xff] }
 0x594   :  { %1792 = vmatpush.bf16.msra.mxu3 %v7462_v40  ;;  %1778 = vmatpush.bf16.msra.mxu2 %v7454_v44  ;;  %v7486_v40 = vld [vmem:[#allocation2 + $0x550] sm:$0xff]  ;;  %v7493_v44 = vld [vmem:[#allocation2 + $0x588] sm:$0xff] }
 0x598   :  { %1793 = vmatpush.bf16.msra.mxu3 %v7461_v41  ;;  %1779 = vmatpush.bf16.msra.mxu2 %v7453_v46  ;;  %v7494_v41 = vld [vmem:[#allocation2 + $0x590] sm:$0xff]  ;;  %v7501_v46 = vld [vmem:[#allocation2 + $0x5c8] sm:$0xff] }
 0x59b   :  { %1794 = vmatmul.bf16.vlgmr.msra.gmra.mxu3 %v1528_v20  ;;  %v7508_v20 = vld [vmem:[#allocation2 + $0x600] sm:$0xff] }
 0x5fe   :  { %v1547_v48 = vpop.f32.mrf.mxu2  ;;  %v1571_v49 = vpop.f32.mrf.mxu3 }
 0x606   :  { %v1549_v50 = vpop.f32.mrf.mxu2  ;;  %v1573_v51 = vpop.f32.mrf.mxu3 }
 0x607   :  { %v1624_v52 = vpack.c.bf16 %v1549_v50, %v1547_v48  ;;  %v1625_v53 = vpack.c.bf16 %v1573_v51, %v1571_v49  ;;  %v7483_v48 = vld [vmem:[#allocation2 + $0x538] sm:$0xff]  ;;  %v7524_v49 = vld [vmem:[#allocation2 + $0x680] sm:$0xff]  ;;  %v7482_v51 = vld [vmem:[#allocation2 + $0x530] sm:$0xff] }
 0x608   :  { %v7523_v50 = vld [vmem:[#allocation2 + $0x678] sm:$0xff] }
 0x609   :  { %1780 = vmatmul.bf16.vlgmr.msra.gmra.mxu2 %v1624_v52  ;;  %1808 = vmatmul.bf16.vlgmr.msra.gmra.mxu0 %v1625_v53  ;;  %v7481_v52 = vld [vmem:[#allocation2 + $0x528] sm:$0xff]  ;;  %v7480_v53 = vld [vmem:[#allocation2 + $0x520] sm:$0xff] }
 0x61e   :  { %v1795_v55 = vpop.f32.mrf.mxu3 }
 0x626   :  { %v1797_v4 = vpop.f32.mrf.mxu3 }
 0x686   :  { %v1809_v61 = vpop.f32.mrf.mxu0 }
 0x68c   :  { %v1781_v56 = vpop.f32.mrf.mxu2 }
 0x68d   :  { %v1782_v60 = vadd.f32 %v7778_v54, %v1781_v56 }
 0x68e   :  { %v1811_v5 = vpop.f32.mrf.mxu0 }
 0x68f   :  { %v1796_v0 = vadd.f32 %v1795_v55, %v1782_v60  ;;  %v7479_v55 = vld [vmem:[#allocation2 + $0x518] sm:$0xff]  ;;  %v7478_v60 = vld [vmem:[#allocation2 + $0x510] sm:$0xff] }
 0x691   :  { %v1810_v1 = vadd.f32 %v1809_v61, %v1796_v0 }
 0x693   :  { %v8057_v2 = vadd.f32 %v1810_v1, %v1205_v11 }
 0x694   :  { %v1783_v8 = vpop.f32.mrf.mxu2 }
 0x695   :  { %v1784_v6 = vadd.f32 %v7778_v54, %v1783_v8  ;;  %v1816_v24 = vmul.f32 0.999995, %v8057_v2 }
 0x697   :  { %v1798_v7 = vadd.f32 %v1797_v4, %v1784_v6  ;;  %v1818_v14 = vmax.f32 %v1816_v24, 0.0  ;;  %v7477_v4 = vld [vmem:[#allocation2 + $0x508] sm:$0xff] }
 0x699   :  { %v1812_v10 = vadd.f32 %v1811_v5, %v1798_v7  ;;  %v1820_v16 = vmin.f32 %v1818_v14, 6.0  ;;  %v7522_v7 = vld [vmem:[#allocation2 + $0x670] sm:$0xff]  ;;  %v7521_v5 = vld [vmem:[#allocation2 + $0x668] sm:$0xff] }
 0x69b   :  { %v8061_v25 = vadd.f32 %v1812_v10, %v1207_v9  ;;  %v7520_v10 = vld [vmem:[#allocation2 + $0x660] sm:$0xff] }
 0x69d   :  { %v1817_v13 = vmul.f32 0.999995, %v8061_v25 }
 0x69f   :  { %v1819_v15 = vmax.f32 %v1817_v13, 0.0  ;;  %v7519_v13 = vld [vmem:[#allocation2 + $0x658] sm:$0xff] }
 0x6a1   :  { %v1821_v57 = vmin.f32 %v1819_v15, 6.0  ;;  %v7518_v15 = vld [vmem:[#allocation2 + $0x650] sm:$0xff] }
 0x6a3   :  { %v1823_v17 = vpack.c.bf16 %v1821_v57, %v1820_v16  ;;  %v7517_v16 = vld [vmem:[#allocation2 + $0x648] sm:$0xff] }
 0x6a5   :  { %1834 = vmatpush.bf16.msrb.mxu1 %v1823_v17  ;;  %1931 = vmatpush.bf16.msrb.mxu2 %v1823_v17 }
 0x6a6   :  { %1948 = vmatpush.bf16.msrb.mxu3 %v1823_v17  ;;  %1965 = vmatpush.bf16.msrb.mxu0 %v1823_v17  ;;  %v7779_v17 = vld [vmem:[#allocation4 + $0x40] ss:$0 sm:$0xff] }
 0x6a8   :  { %6257 = vmatmul.msk.bf16.vlgmr.msrb.gmra.mxu2 %vm1534_vm1, %v1920_v21  ;;  %6224 = vmatmul.msk.bf16.vlgmr.msrb.gmra.mxu1 %vm1534_vm1, %v1822_v45 }
 0x6a9   :  { %2168 = vmatpush.bf16.msra.mxu2 %v7492_v18  ;;  %6258 = vmatmul.msk.bf16.vlgmr.msrb.gmra.mxu3 %vm1534_vm1, %v1937_v58 }
 0x6aa   :  { %2181 = vmatpush.bf16.msra.mxu3 %v7500_v19  ;;  %2194 = vmatpush.bf16.msra.mxu0 %v7508_v20 }
 0x6ab   :  { %6259 = vmatmul.msk.bf16.vlgmr.msrb.gmra.mxu0 %vm1534_vm1, %v1954_v22  ;;  %1907 = vmatpush.bf16.msra.mxu1 %v7484_v47  ;;  %v7516_v22 = vld [vmem:[#allocation2 + $0x640] sm:$0xff]  ;;  %v7529_v47 = vld [vmem:[#allocation2 + $0x6a8] sm:$0xff] }
 0x6ad   :  { %2169 = vmatpush.bf16.msra.mxu2 %v7491_v23 }
 0x6ae   :  { %2182 = vmatpush.bf16.msra.mxu3 %v7499_v26  ;;  %2195 = vmatpush.bf16.msra.mxu0 %v7507_v27 }
 0x6af   :  { %1908 = vmatpush.bf16.msra.mxu1 %v7483_v48  ;;  %v7528_v48 = vld [vmem:[#allocation2 + $0x6a0] sm:$0xff] }
 0x6b1   :  { %2170 = vmatpush.bf16.msra.mxu2 %v7490_v28 }
 0x6b2   :  { %2183 = vmatpush.bf16.msra.mxu3 %v7498_v29  ;;  %2196 = vmatpush.bf16.msra.mxu0 %v7506_v30 }
 0x6b3   :  { %1909 = vmatpush.bf16.msra.mxu1 %v7482_v51  ;;  %v7525_v51 = vld [vmem:[#allocation2 + $0x688] sm:$0xff] }
 0x6b5   :  { %2171 = vmatpush.bf16.msra.mxu2 %v7489_v31 }
 0x6b6   :  { %2184 = vmatpush.bf16.msra.mxu3 %v7497_v32  ;;  %2197 = vmatpush.bf16.msra.mxu0 %v7505_v33  ;;  %v2210_v33 = vld [vmem:[#allocation2 + $0x30] sm:$0xf] }
 0x6b7   :  { %1910 = vmatpush.bf16.msra.mxu1 %v7481_v52 }
 0x6b9   :  { %2172 = vmatpush.bf16.msra.mxu2 %v7488_v34  ;;  %v2233_v34 = vld [vmem:[#allocation2 + $0x38] sm:$0xf] }
 0x6ba   :  { %2185 = vmatpush.bf16.msra.mxu3 %v7496_v35  ;;  %2198 = vmatpush.bf16.msra.mxu0 %v7504_v36  ;;  %v7515_v35 = vld [vmem:[#allocation2 + $0x638] sm:$0xff]  ;;  %v7514_v36 = vld [vmem:[#allocation2 + $0x630] sm:$0xff] }
 0x6bb   :  { %1911 = vmatpush.bf16.msra.mxu1 %v7480_v53 }
 0x6bd   :  { %2173 = vmatpush.bf16.msra.mxu2 %v7487_v37  ;;  %v7513_v37 = vld [vmem:[#allocation2 + $0x628] sm:$0xff] }
 0x6be   :  { %2186 = vmatpush.bf16.msra.mxu3 %v7495_v38  ;;  %2199 = vmatpush.bf16.msra.mxu0 %v7503_v39  ;;  %v7532_v38 = vld [vmem:[#allocation2 + $0x6c0] sm:$0xff]  ;;  %v7531_v39 = vld [vmem:[#allocation2 + $0x6b8] sm:$0xff] }
 0x6bf   :  { %1912 = vmatpush.bf16.msra.mxu1 %v7479_v55 }
 0x6c1   :  { %2174 = vmatpush.bf16.msra.mxu2 %v7486_v40  ;;  %v7512_v40 = vld [vmem:[#allocation2 + $0x620] sm:$0xff] }
 0x6c2   :  { %2187 = vmatpush.bf16.msra.mxu3 %v7494_v41  ;;  %2200 = vmatpush.bf16.msra.mxu0 %v7502_v42  ;;  %v7530_v41 = vld [vmem:[#allocation2 + $0x6b0] sm:$0xff]  ;;  %v7511_v42 = vld [vmem:[#allocation2 + $0x618] sm:$0xff] }
 0x6c3   :  { %1913 = vmatpush.bf16.msra.mxu1 %v7478_v60 }
 0x6c5   :  { %2175 = vmatpush.bf16.msra.mxu2 %v7485_v43  ;;  %v7510_v43 = vld [vmem:[#allocation2 + $0x610] sm:$0xff] }
 0x6c6   :  { %2188 = vmatpush.bf16.msra.mxu3 %v7493_v44  ;;  %2201 = vmatpush.bf16.msra.mxu0 %v7501_v46  ;;  %v7509_v46 = vld [vmem:[#allocation2 + $0x608] sm:$0xff] }
 0x6c7   :  { %1914 = vmatpush.bf16.msra.mxu1 %v7477_v4 }
 0x6c9   :  { %2446 = vmatpush.bf16.msrb.mxu2 %v7516_v22  ;;  %v7556_v22 = vld [vmem:[#allocation2 + $0x790] sm:$0xff] }
 0x6ca   :  { %2459 = vmatpush.bf16.msrb.mxu3 %v7524_v49  ;;  %2472 = vmatpush.bf16.msrb.mxu0 %v7532_v38  ;;  %v7527_v49 = vld [vmem:[#allocation2 + $0x698] sm:$0xff]  ;;  %v7544_v38 = vld [vmem:[#allocation2 + $0x730] sm:$0xff] }
 0x6cd   :  { %2447 = vmatpush.bf16.msrb.mxu2 %v7515_v35  ;;  %v7569_v35 = vld [vmem:[#allocation2 + $0x7f8] sm:$0xff] }
 0x6ce   :  { %2460 = vmatpush.bf16.msrb.mxu3 %v7523_v50  ;;  %2473 = vmatpush.bf16.msrb.mxu0 %v7531_v39  ;;  %v7526_v50 = vld [vmem:[#allocation2 + $0x690] sm:$0xff] }
 0x6cf   :  { %v7568_v39 = vld [vmem:[#allocation2 + $0x7f0] sm:$0xff] }
 0x6d1   :  { %2448 = vmatpush.bf16.msrb.mxu2 %v7514_v36  ;;  %v7553_v36 = vld [vmem:[#allocation2 + $0x778] sm:$0xff] }
 0x6d2   :  { %2461 = vmatpush.bf16.msrb.mxu3 %v7522_v7  ;;  %2474 = vmatpush.bf16.msrb.mxu0 %v7530_v41  ;;  %v7536_v41 = vld [vmem:[#allocation2 + $0x6e0] sm:$0xff] }
 0x6d5   :  { %2449 = vmatpush.bf16.msrb.mxu2 %v7513_v37  ;;  %v7561_v37 = vld [vmem:[#allocation2 + $0x7b8] sm:$0xff] }
 0x6d6   :  { %2462 = vmatpush.bf16.msrb.mxu3 %v7521_v5  ;;  %2475 = vmatpush.bf16.msrb.mxu0 %v7529_v47  ;;  %v7560_v47 = vld [vmem:[#allocation2 + $0x7b0] sm:$0xff] }
 0x6d9   :  { %2450 = vmatpush.bf16.msrb.mxu2 %v7512_v40  ;;  %v7534_v40 = vld [vmem:[#allocation2 + $0x6d0] sm:$0xff] }
 0x6da   :  { %2463 = vmatpush.bf16.msrb.mxu3 %v7520_v10  ;;  %2476 = vmatpush.bf16.msrb.mxu0 %v7528_v48  ;;  %v7542_v48 = vld [vmem:[#allocation2 + $0x720] sm:$0xff] }
 0x6dd   :  { %2451 = vmatpush.bf16.msrb.mxu2 %v7511_v42  ;;  %v7538_v42 = vld [vmem:[#allocation2 + $0x6f0] sm:$0xff] }
 0x6de   :  { %2464 = vmatpush.bf16.msrb.mxu3 %v7519_v13  ;;  %2477 = vmatpush.bf16.msrb.mxu0 %v7527_v49  ;;  %v7566_v49 = vld [vmem:[#allocation2 + $0x7e0] sm:$0xff] }
 0x6e1   :  { %2452 = vmatpush.bf16.msrb.mxu2 %v7510_v43  ;;  %v7540_v43 = vld [vmem:[#allocation2 + $0x700] sm:$0xff] }
 0x6e2   :  { %2465 = vmatpush.bf16.msrb.mxu3 %v7518_v15  ;;  %2478 = vmatpush.bf16.msrb.mxu0 %v7526_v50  ;;  %v7551_v50 = vld [vmem:[#allocation2 + $0x768] sm:$0xff] }
 0x6e5   :  { %2453 = vmatpush.bf16.msrb.mxu2 %v7509_v46  ;;  %v7552_v46 = vld [vmem:[#allocation2 + $0x770] sm:$0xff] }
 0x6e6   :  { %2466 = vmatpush.bf16.msrb.mxu3 %v7517_v16  ;;  %2479 = vmatpush.bf16.msrb.mxu0 %v7525_v51  ;;  %v7559_v51 = vld [vmem:[#allocation2 + $0x7a8] sm:$0xff] }
 0x725   :  { %v1836_v9 = vpop.f32.mrf.mxu1 }
 0x726   :  { %v1856_v24 = vpack.c.bf16 %v1836_v9, %v1836_v9 }
 0x728   :  { %v1967_v54 = vpop.f32.mrf.mxu0  ;;  %1915 = vmatmul.bf16.vlgmr.msra.gmra.mxu1 %v1856_v24 }
 0x729   :  { %v2021_v56 = vpack.c.bf16 %v1967_v54, %v1967_v54 }
 0x72b   :  { %2202 = vmatmul.bf16.vlgmr.msra.gmra.mxu0 %v2021_v56  ;;  %v1933_v61 = vpop.f32.mrf.mxu2 }
 0x72c   :  { %v2019_v62 = vpack.c.bf16 %v1933_v61, %v1933_v61  ;;  %v1950_v0 = vpop.f32.mrf.mxu3 }
 0x72d   :  { %v2020_v1 = vpack.c.bf16 %v1950_v0, %v1950_v0  ;;  %v1838_v14 = vpop.f32.mrf.mxu1 }
 0x72e   :  { %2176 = vmatmul.bf16.vlgmr.msra.gmra.mxu2 %v2019_v62 }
 0x72f   :  { %2189 = vmatmul.bf16.vlgmr.msra.gmra.mxu3 %v2020_v1  ;;  %v7781_v1 = vld [vmem:[#allocation4 + $0x48] ss:$0 sm:$0xff] }
 0x730   :  { %v1969_v11 = vpop.f32.mrf.mxu0 }
 0x733   :  { %v1935_v8 = vpop.f32.mrf.mxu2 }
 0x734   :  { %v1952_v6 = vpop.f32.mrf.mxu3  ;;  %v7780_v8 = vld [vmem:[#allocation4 + $0x38] ss:$0 sm:$0xff] }
 0x7a5   :  { %v1916_v44 = vpop.f32.mrf.mxu1 }
 0x7a6   :  { %v1917_v5 = vadd.f32 %v7780_v8, %v1916_v44  ;;  %v7543_v44 = vld [vmem:[#allocation2 + $0x728] sm:$0xff] }
 0x7a8   :  { %v2203_v57 = vpop.f32.mrf.mxu0 }
 0x7ad   :  { %v1918_v45 = vpop.f32.mrf.mxu1 }
 0x7ae   :  { %v7567_v45 = vld [vmem:[#allocation2 + $0x7e8] sm:$0xff] }
 0x7b0   :  { %v2205_v18 = vpop.f32.mrf.mxu0 }
 0x7b1   :  { %v2177_v19 = vpop.f32.mrf.mxu2 }
 0x7b2   :  { %v2178_v20 = vadd.f32 %v7779_v17, %v2177_v19  ;;  %v2190_v21 = vpop.f32.mrf.mxu3  ;;  %v7572_v17 = vld [vmem:[#allocation2 + $0x810] sm:$0xff]  ;;  %v7533_v19 = vld [vmem:[#allocation2 + $0x6c8] sm:$0xff] }
 0x7b4   :  { %v2191_v58 = vadd.f32 %v2190_v21, %v2178_v20  ;;  %v7535_v20 = vld [vmem:[#allocation2 + $0x6d8] sm:$0xff]  ;;  %v7537_v21 = vld [vmem:[#allocation2 + $0x6e8] sm:$0xff] }
 0x7b6   :  { %v2204_v23 = vadd.f32 %v2203_v57, %v2191_v58  ;;  %v7548_v57 = vld [vmem:[#allocation2 + $0x750] sm:$0xff]  ;;  %v7539_v58 = vld [vmem:[#allocation2 + $0x6f8] sm:$0xff] }
 0x7b8   :  { %v2207_v26 = vmul.f32 0.999995, %v2204_v23  ;;  %v7564_v23 = vld [vmem:[#allocation2 + $0x7d0] sm:$0xff] }
 0x7b9   :  { %v2179_v27 = vpop.f32.mrf.mxu2 }
 0x7ba   :  { %v2208_v28 = vmax.f32 %v2207_v26, 0.0  ;;  %v2192_v29 = vpop.f32.mrf.mxu3  ;;  %v7547_v26 = vld [vmem:[#allocation2 + $0x748] sm:$0xff] }
 0x7bb   :  { %v7571_v27 = vld [vmem:[#allocation2 + $0x808] sm:$0xff] }
 0x7bc   :  { %v2209_v30 = vmin.f32 %v2208_v28, 6.0  ;;  %v7555_v28 = vld [vmem:[#allocation2 + $0x788] sm:$0xff] }
 0x7bd   :  { %v7563_v29 = vld [vmem:[#allocation2 + $0x7c8] sm:$0xff] }
 0x7be   :  { %v2211_v31 = vpack.c.bf16 %v2209_v30, %v2209_v30  ;;  %v7546_v30 = vld [vmem:[#allocation2 + $0x740] sm:$0xff] }
 0x7c0   :  { %2467 = vmatmul.bf16.vlgmr.msrb.gmra.mxu3 %v2211_v31  ;;  %v2218_v32 = vsel %vm2216_vm2, %v2211_v31, 0  ;;  %v7570_v31 = vld [vmem:[#allocation2 + $0x800] sm:$0xff] }
 0x7c1   :  { %2227 = vmatpush.bf16.msrb.mxu1 %v2218_v32 }
 0x7c4   :  { %6356 = vmatmul.msk.bf16.vlgmr.msrb.gmra.mxu1 %vm2212_vm3, %v2210_v33  ;;  %v7562_v33 = vld [vmem:[#allocation2 + $0x7c0] sm:$0xff] }
 0x7c5   :  { %2244 = vmatpush.bf16.msra.mxu1 %v2218_v32  ;;  %v7554_v32 = vld [vmem:[#allocation2 + $0x780] sm:$0xff] }
 0x7d4   :  { %6357 = vmatmul.msk.bf16.vlgmr.msra.gmra.mxu1 %vm2212_vm3, %v2233_v34  ;;  %v7545_v34 = vld [vmem:[#allocation2 + $0x738] sm:$0xff] }
 0x841   :  { %v2229_v52 = vpop.f32.mrf.mxu1 }
 0x842   :  { %v2298_v53 = vpack.c.bf16 %v2229_v52, %v2229_v52  ;;  %v7541_v52 = vld [vmem:[#allocation2 + $0x718] sm:$0xff] }
 0x843   :  { %v2468_v54 = vpop.f32.mrf.mxu3 }
 0x844   :  { %2454 = vmatmul.bf16.vlgmr.msrb.gmra.mxu2 %v2298_v53  ;;  %v7565_v53 = vld [vmem:[#allocation2 + $0x7d8] sm:$0xff] }
 0x849   :  { %v2231_v55 = vpop.f32.mrf.mxu1 }
 0x84a   :  { %v7558_v55 = vld [vmem:[#allocation2 + $0x7a0] sm:$0xff] }
 0x84b   :  { %v2470_v56 = vpop.f32.mrf.mxu3 }
 0x84c   :  { %v7549_v56 = vld [vmem:[#allocation2 + $0x758] sm:$0xff] }
 0x851   :  { %v2246_v60 = vpop.f32.mrf.mxu1 }
 0x852   :  { %v2299_v61 = vpack.c.bf16 %v2246_v60, %v2246_v60  ;;  %v7557_v60 = vld [vmem:[#allocation2 + $0x798] sm:$0xff] }
 0x854   :  { %2480 = vmatmul.bf16.vlgmr.msrb.gmra.mxu0 %v2299_v61 }
 0x859   :  { %v2248_v62 = vpop.f32.mrf.mxu1 }
 0x8c7   :  { %v2455_v0 = vpop.f32.mrf.mxu2 }
 0x8c8   :  { %v2456_v11 = vadd.f32 %v7781_v1, %v2455_v0 }
 0x8ca   :  { %v2469_v4 = vadd.f32 %v2468_v54, %v2456_v11  ;;  %v7550_v54 = vld [vmem:[#allocation2 + $0x760] sm:$0xff] }
 0x8cf   :  { %v2457_v6 = vpop.f32.mrf.mxu2 }
 0x8d1   :  { %v2481_v7 = vpop.f32.mrf.mxu0 }
 0x8d2   :  { %v2482_v9 = vadd.f32 %v2481_v7, %v2469_v4 }
 0x8d4   :  { %v2485_v24 = vadd.f32 %v2482_v9, %v1917_v5 }
 0x8d6   :  { %v2486_v10 = vmul.f32 0.999995, %v2485_v24 }
 0x8d8   :  { %v2487_v14 = vmax.f32 %v2486_v10, 0.0 }
 0x8d9   :  { %v2483_v13 = vpop.f32.mrf.mxu0 }
 0x8da   :  { %v8071_v15 = vmin.f32 %v2487_v14, 6.0 }
 0x8dc   :  { %v2509_v16 = vpack.c.bf16 %v8071_v15, %v8071_v15 }
 0x8de   :  { %v2527_v18 = vsel %vm2216_vm2, %v2509_v16, 0 }
 0x8df   :  { %2536 = vmatpush.bf16.msrb.mxu1 %v2527_v18  ;;  %2571 = vmatpush.bf16.msra.mxu2 %v2527_v18 }
 0x8e0   :  { %2606 = vmatpush.bf16.msra.mxu3 %v2527_v18  ;;  %2641 = vmatpush.bf16.msra.mxu0 %v2527_v18 }
 0x8e2   :  { %6462 = vmatmul.msk.bf16.vlgmr.msrb.gmra.mxu1 %vm2212_vm3, %v7533_v19  ;;  %6472 = vmatmul.msk.bf16.vlgmr.msra.gmra.mxu2 %vm2212_vm3, %v7535_v20 }
 0x8e3   :  { %2919 = vmatpush.bf16.msra.mxu1 %v7548_v57  ;;  %6482 = vmatmul.msk.bf16.vlgmr.msra.gmra.mxu3 %vm2212_vm3, %v7537_v21 }
 0x8e4   :  { %2976 = vmatpush.bf16.msrb.mxu0 %v7572_v17  ;;  %2938 = vmatpush.bf16.msrb.mxu2 %v7556_v22 }
 0x8e5   :  { %6492 = vmatmul.msk.bf16.vlgmr.msra.gmra.mxu0 %vm2212_vm3, %v7539_v58  ;;  %2957 = vmatpush.bf16.msrb.mxu3 %v7564_v23 }
 0x8e7   :  { %2920 = vmatpush.bf16.msra.mxu1 %v7547_v26 }
 0x8e8   :  { %2977 = vmatpush.bf16.msrb.mxu0 %v7571_v27  ;;  %2939 = vmatpush.bf16.msrb.mxu2 %v7555_v28  ;;  %v7782_v27 = vld [vmem:[#allocation4 + $0x50] ss:$0 sm:$0xff] }
 0x8e9   :  { %2958 = vmatpush.bf16.msrb.mxu3 %v7563_v29 }
 0x8eb   :  { %2921 = vmatpush.bf16.msra.mxu1 %v7546_v30 }
 0x8ec   :  { %2978 = vmatpush.bf16.msrb.mxu0 %v7570_v31  ;;  %2940 = vmatpush.bf16.msrb.mxu2 %v7554_v32 }
 0x8ed   :  { %2959 = vmatpush.bf16.msrb.mxu3 %v7562_v33 }
 0x8ef   :  { %2922 = vmatpush.bf16.msra.mxu1 %v7545_v34 }
 0x8f0   :  { %2979 = vmatpush.bf16.msrb.mxu0 %v7569_v35  ;;  %2941 = vmatpush.bf16.msrb.mxu2 %v7553_v36 }
 0x8f1   :  { %2960 = vmatpush.bf16.msrb.mxu3 %v7561_v37 }
 0x8f2   :  { %6463 = vmatmul.msk.bf16.gmra.mxu1 %vm2212_vm3, %v7534_v40  ;;  %6473 = vmatmul.msk.bf16.gmra.mxu2 %vm2212_vm3, %v7536_v41 }
 0x8f3   :  { %2923 = vmatpush.bf16.msra.mxu1 %v7544_v38  ;;  %6483 = vmatmul.msk.bf16.gmra.mxu3 %vm2212_vm3, %v7538_v42 }
 0x8f4   :  { %2980 = vmatpush.bf16.msrb.mxu0 %v7568_v39  ;;  %2942 = vmatpush.bf16.msrb.mxu2 %v7552_v46 }
 0x8f5   :  { %6493 = vmatmul.msk.bf16.gmra.mxu0 %vm2212_vm3, %v7540_v43  ;;  %2961 = vmatpush.bf16.msrb.mxu3 %v7560_v47 }
 0x8f7   :  { %2924 = vmatpush.bf16.msra.mxu1 %v7543_v44 }
 0x8f8   :  { %2981 = vmatpush.bf16.msrb.mxu0 %v7567_v45  ;;  %2943 = vmatpush.bf16.msrb.mxu2 %v7551_v50 }
 0x8f9   :  { %2962 = vmatpush.bf16.msrb.mxu3 %v7559_v51 }
 0x8fb   :  { %2925 = vmatpush.bf16.msra.mxu1 %v7542_v48 }
 0x8fc   :  { %2982 = vmatpush.bf16.msrb.mxu0 %v7566_v49  ;;  %2944 = vmatpush.bf16.msrb.mxu2 %v7550_v54 }
 0x8fd   :  { %2963 = vmatpush.bf16.msrb.mxu3 %v7558_v55 }
 0x8ff   :  { %2926 = vmatpush.bf16.msra.mxu1 %v7541_v52 }
 0x900   :  { %2983 = vmatpush.bf16.msrb.mxu0 %v7565_v53  ;;  %2945 = vmatpush.bf16.msrb.mxu2 %v7549_v56 }
 0x901   :  { %2964 = vmatpush.bf16.msrb.mxu3 %v7557_v60 }
 0x95f   :  { %v2538_v61 = vpop.f32.mrf.mxu1 }
 0x962   :  { %v2643_v62 = vpop.f32.mrf.mxu0 }
 0x965   :  { %v2573_v0 = vpop.f32.mrf.mxu2 }
 0x966   :  { %v2608_v1 = vpop.f32.mrf.mxu3 }
 0x967   :  { %v2540_v11 = vpop.f32.mrf.mxu1 }
 0x968   :  { %v2717_v8 = vpack.c.bf16 %v2540_v11, %v2538_v61 }
 0x96a   :  { %v2645_v6 = vpop.f32.mrf.mxu0  ;;  %2927 = vmatmul.bf16.vlgmr.msra.gmra.mxu1 %v2717_v8 }
 0x96b   :  { %v2720_v4 = vpack.c.bf16 %v2645_v6, %v2643_v62 }
 0x96d   :  { %2984 = vmatmul.bf16.vlgmr.msrb.gmra.mxu0 %v2720_v4  ;;  %v2575_v7 = vpop.f32.mrf.mxu2 }
 0x96e   :  { %v2718_v5 = vpack.c.bf16 %v2575_v7, %v2573_v0  ;;  %v2610_v9 = vpop.f32.mrf.mxu3 }
 0x96f   :  { %v2719_v24 = vpack.c.bf16 %v2610_v9, %v2608_v1  ;;  %v2543_v10 = vpop.f32.mrf.mxu1 }
 0x970   :  { %2946 = vmatmul.bf16.vlgmr.msrb.gmra.mxu2 %v2718_v5 }
 0x971   :  { %2965 = vmatmul.bf16.vlgmr.msrb.gmra.mxu3 %v2719_v24 }
 0x972   :  { %v2648_v14 = vpop.f32.mrf.mxu0 }
 0x975   :  { %v2578_v13 = vpop.f32.mrf.mxu2 }
 0x976   :  { %v2613_v16 = vpop.f32.mrf.mxu3 }
 0x977   :  { %v2545_v57 = vpop.f32.mrf.mxu1 }
 0x978   :  { %v2721_v17 = vpack.c.bf16 %v2545_v57, %v2543_v10  ;;  %v2995_v57 = vld [vmem:[#allocation4 + $0x60] sm:$0xff] }
 0x97a   :  { %v2650_v18 = vpop.f32.mrf.mxu0  ;;  %2932 = vmatmul.bf16.gmra.mxu1 %v2721_v17 }
 0x97b   :  { %v2724_v19 = vpack.c.bf16 %v2650_v18, %v2648_v14 }
 0x97d   :  { %2989 = vmatmul.bf16.gmra.mxu0 %v2724_v19  ;;  %v2580_v20 = vpop.f32.mrf.mxu2 }
 0x97e   :  { %v2722_v21 = vpack.c.bf16 %v2580_v20, %v2578_v13  ;;  %v2615_v58 = vpop.f32.mrf.mxu3 }
 0x97f   :  { %v2723_v22 = vpack.c.bf16 %v2615_v58, %v2613_v16  ;;  %v2996_v58 = vld [vmem:[#allocation4 + $0x68] sm:$0xff] }
 0x980   :  { %2951 = vmatmul.bf16.gmra.mxu2 %v2722_v21 }
 0x981   :  { %2970 = vmatmul.bf16.gmra.mxu3 %v2723_v22 }
 0x9e7   :  { %v2928_v23 = vpop.f32.mrf.mxu1 }
 0x9e8   :  { %v2929_v31 = vadd.f32 %v7782_v27, %v2928_v23 }
 0x9ea   :  { %v2985_v26 = vpop.f32.mrf.mxu0 }
 0x9ef   :  { %v2930_v28 = vpop.f32.mrf.mxu1 }
 0x9f0   :  { %v2931_v33 = vadd.f32 %v7782_v27, %v2930_v28 }
 0x9f2   :  { %v2987_v34 = vpop.f32.mrf.mxu0 }
 0x9f3   :  { %v2947_v29 = vpop.f32.mrf.mxu2 }
 0x9f4   :  { %v2966_v30 = vpop.f32.mrf.mxu3  ;;  %v2948_v32 = vadd.f32 %v2947_v29, %v2929_v31 }
 0x9f6   :  { %v2967_v36 = vadd.f32 %v2966_v30, %v2948_v32  ;;  %v2997_v30 = vld [vmem:[#allocation4 + $0x70] sm:$0xff] }
 0x9f7   :  { %v2933_v39 = vpop.f32.mrf.mxu1 }
 0x9f8   :  { %v2986_v41 = vadd.f32 %v2985_v26, %v2967_v36  ;;  %v2934_v47 = vadd.f32 %v7782_v27, %v2933_v39 }
 0x9fa   :  { %v2990_v46 = vpop.f32.mrf.mxu0 }
 0x9fb   :  { %v2949_v35 = vpop.f32.mrf.mxu2 }
 0x9fc   :  { %v2950_v37 = vadd.f32 %v2949_v35, %v2931_v33  ;;  %v2968_v38 = vpop.f32.mrf.mxu3 }
 0x9fe   :  { %v2969_v40 = vadd.f32 %v2968_v38, %v2950_v37  ;;  %v2998_v37 = vld [vmem:[#allocation4 + $0x78] sm:$0xff] }
 0x9ff   :  { %v2935_v48 = vpop.f32.mrf.mxu1 }
 0xa00   :  { %v2988_v42 = vadd.f32 %v2987_v34, %v2969_v40  ;;  %v2936_v50 = vadd.f32 %v7782_v27, %v2935_v48 }
 0xa02   :  { %v8084_v43 = vpack.c.bf16 %v2988_v42, %v2986_v41  ;;  %v2992_v56 = vpop.f32.mrf.mxu0 }
 0xa03   :  { %v2952_v44 = vpop.f32.mrf.mxu2 }
 0xa04   :  { %v2971_v45 = vpop.f32.mrf.mxu3  ;;  %3175 = vrot.lane.b32.xlu1 %v8084_v43, %s7911_s0  ;;  %v2953_v49 = vadd.f32 %v2952_v44, %v2934_v47 }
 0xa06   :  { %v2972_v52 = vadd.f32 %v2971_v45, %v2953_v49 }
 0xa08   :  { %v2991_v60 = vadd.f32 %v2990_v46, %v2972_v52 }
 0xa0b   :  { %v2954_v51 = vpop.f32.mrf.mxu2 }
 0xa0c   :  { %v2955_v53 = vadd.f32 %v2954_v51, %v2936_v50  ;;  %v2973_v54 = vpop.f32.mrf.mxu3 }
 0xa0e   :  { %v2974_v55 = vadd.f32 %v2973_v54, %v2955_v53 }
 0xa10   :  { %v2993_v61 = vadd.f32 %v2992_v56, %v2974_v55 }
 0xa12   :  { %v8088_v62 = vpack.c.bf16 %v2993_v61, %v2991_v60 }
 0xa14   :  { %3005 = vrot.lane.b32.xlu2 %v8088_v62, %s7912_s5  ;;  %3177 = vrot.lane.b32.xlu1 %v8088_v62, %s7911_s0 }
 0xa15   :  { %3181 = vrot.lane.b32.xlu0 %v8088_v62, %s7913_s6 }
 0xa1c   :  { %3003 = vrot.lane.b32.xlu2 %v8084_v43, %s7912_s5 }
 0xa1d   :  { %3179 = vrot.lane.b32.xlu0 %v8084_v43, %s7913_s6 }
 0xa24   :  { %3262 = vrot.lane.b32.xlu2 %v8088_v62, %s7914_s7 }
 0xa2c   :  { %3260 = vrot.lane.b32.xlu2 %v8084_v43, %s7914_s7 }
 0xa6e   :  { %v3006_v0 = vpop.permute.xlu2 %3005 }
 0xa6f   :  { %v3017_v1 = vsel %vm1534_vm1, %v3006_v0, 0 }
 0xa70   :  { %3025 = vmatpush.bf16.xpose.msrb.mxu1 %v3017_v1 }
 0xa76   :  { %v3004_v11 = vpop.permute.xlu2 %3003  ;;  %v3176_v10 = vpop.permute.xlu1 %3175 }
 0xa77   :  { %v3014_v8 = vsel %vm1534_vm1, %v3004_v11, 0 }
 0xa78   :  { %3026 = vmatpush.bf16.xpose.msrb.mxu1 %v3014_v8 }
 0xa7e   :  { %v3263_v6 = vpop.permute.xlu2 %3262 }
 0xa7f   :  { %6622 = vmatmul.msk.bf16.vlgmr.msrb.gmra.mxu1 %vm1534_vm1, %v8084_v43  ;;  %3278 = vmatpush.bf16.msra.mxu0 %v3263_v6 }
 0xa86   :  { %v3261_v4 = vpop.permute.xlu2 %3260  ;;  %v3178_v14 = vpop.permute.xlu1 %3177 }
 0xa87   :  { %v3182_v7 = vpop.permute.xlu0 %3181  ;;  %3279 = vmatpush.bf16.msra.mxu0 %v3261_v4 }
 0xa88   :  { %v3193_v5 = vsel %vm1534_vm1, %v3182_v7, 0 }
 0xa89   :  { %3201 = vmatpush.bf16.xpose.msra.mxu3 %v3193_v5 }
 0xa8f   :  { %v3180_v9 = vpop.permute.xlu0 %3179  ;;  %6623 = vmatmul.msk.bf16.gmra.mxu1 %vm1534_vm1, %v8088_v62 }
 0xa90   :  { %v3190_v24 = vsel %vm1534_vm1, %v3180_v9, 0 }
 0xa91   :  { %3202 = vmatpush.bf16.xpose.msra.mxu3 %v3190_v24 }
 0xa98   :  { %6626 = vmatmul.msk.bf16.vlgmr.msra.gmra.mxu3 %vm1534_vm1, %v3176_v10 }
 0xaa8   :  { %6627 = vmatmul.msk.bf16.gmra.mxu3 %vm1534_vm1, %v3178_v14 }
 0xafc   :  { %v3028_v21 = vpop.f32.mrf.mxu1 }
 0xafd   :  { %v3038_v23 = vmul.f32 0.25, %v3028_v21 }
 0xaff   :  { %v3042_v29 = vadd.f32 %v3038_v23, %v2995_v57 }
 0xb01   :  { %v3046_v32 = vsel %vm67_vm0, %v3042_v29, -inf }
 0xb04   :  { %v3030_v34 = vpop.f32.mrf.mxu1 }
 0xb05   :  { %v3039_v39 = vmul.f32 0.25, %v3030_v34 }
 0xb07   :  { %v3043_v42 = vadd.f32 %v3039_v39, %v2996_v58 }
 0xb09   :  { %v3049_v45 = vsel %vm67_vm0, %v3043_v42, -inf }
 0xb0c   :  { %v3033_v41 = vpop.f32.mrf.mxu1 }
 0xb0d   :  { %v3040_v44 = vmul.f32 0.25, %v3033_v41 }
 0xb0f   :  { %v3044_v46 = vadd.f32 %v3040_v44, %v2997_v30 }
 0xb11   :  { %v3052_v49 = vsel %vm67_vm0, %v3044_v46, -inf }
 0xb14   :  { %v3035_v47 = vpop.f32.mrf.mxu1 }
 0xb15   :  { %v3041_v48 = vmul.f32 0.25, %v3035_v47 }
 0xb17   :  { %v3045_v50 = vadd.f32 %v3041_v48, %v2998_v37 }
 0xb19   :  { %v3055_v51 = vsel %vm67_vm0, %v3045_v50, -inf }
 0xb1b   :  { %v3204_v13 = vpop.f32.mrf.mxu3 }
 0xb1c   :  { %v3214_v16 = vmul.f32 0.25, %v3204_v13 }
 0xb1e   :  { %v3218_v17 = vadd.f32 %v3214_v16, %v2995_v57 }
 0xb20   :  { %v3222_v18 = vsel %vm67_vm0, %v3218_v17, -inf }
 0xb21   :  { %3223 = vmax.xlane.f32.xlu0 %v3222_v18 }
 0xb23   :  { %v3206_v19 = vpop.f32.mrf.mxu3 }
 0xb24   :  { %v3215_v20 = vmul.f32 0.25, %v3206_v19 }
 0xb26   :  { %v3219_v22 = vadd.f32 %v3215_v20, %v2996_v58 }
 0xb28   :  { %v3225_v26 = vsel %vm67_vm0, %v3219_v22, -inf }
 0xb29   :  { %3226 = vmax.xlane.f32.xlu1 %v3225_v26 }
 0xb2b   :  { %v3209_v27 = vpop.f32.mrf.mxu3 }
 0xb2c   :  { %v3216_v28 = vmul.f32 0.25, %v3209_v27 }
 0xb2e   :  { %v3220_v31 = vadd.f32 %v3216_v28, %v2997_v30 }
 0xb30   :  { %v3228_v33 = vsel %vm67_vm0, %v3220_v31, -inf }
 0xb31   :  { %3047 = vmax.xlane.f32.xlu1 %v3046_v32  ;;  %3229 = vmax.xlane.f32.xlu2 %v3228_v33 }
 0xb33   :  { %v3211_v35 = vpop.f32.mrf.mxu3 }
 0xb34   :  { %v3217_v36 = vmul.f32 0.25, %v3211_v35 }
 0xb36   :  { %v3221_v38 = vadd.f32 %v3217_v36, %v2998_v37 }
 0xb38   :  { %v3231_v40 = vsel %vm67_vm0, %v3221_v38, -inf }
 0xb39   :  { %3232 = vmax.xlane.f32.xlu0 %v3231_v40 }
 0xb41   :  { %3050 = vmax.xlane.f32.xlu0 %v3049_v45 }
 0xb49   :  { %3084 = vrot.lane.b32.xlu2 %v8084_v43, %s7906_s20  ;;  %3053 = vmax.xlane.f32.xlu0 %v3052_v49 }
 0xb4a   :  { %3086 = vrot.lane.b32.xlu1 %v8088_v62, %s7906_s20 }
 0xb51   :  { %3056 = vmax.xlane.f32.xlu0 %v3055_v51 }
 0xb94   :  { %v3224_v52 = vpop.xlane.xlu0 %3223 }
 0xb95   :  { %v3234_v53 = vsub.f32 %v3218_v17, %v3224_v52 }
 0xb97   :  { %v3238_v54 = vmul.f32 1.442695, %v3234_v53 }
 0xb99   :  { %7791 = vpow2.f32 %v3238_v54 }
 0xb9c   :  { %v3227_v55 = vpop.xlane.xlu1 %3226 }
 0xb9d   :  { %v3235_v56 = vsub.f32 %v3219_v22, %v3227_v55 }
 0xb9f   :  { %v7792_v60 = vpop.eup %7791  ;;  %v3240_v61 = vmul.f32 1.442695, %v3235_v56 }
 0xba0   :  { %v3246_v0 = vsel %vm67_vm0, %v7792_v60, 0.0 }
 0xba1   :  { %7793 = vpow2.f32 %v3240_v61  ;;  %3247 = vadd.xlane.f32.xlu2 %v3246_v0 }
 0xba4   :  { %v3230_v43 = vpop.xlane.xlu2 %3229  ;;  %v3048_v9 = vpop.xlane.xlu1 %3047 }
 0xba5   :  { %v3236_v1 = vsub.f32 %v3220_v31, %v3230_v43  ;;  %v3058_v10 = vsub.f32 %v3042_v29, %v3048_v9 }
 0xba7   :  { %v7794_v11 = vpop.eup %7793  ;;  %v3242_v62 = vmul.f32 1.442695, %v3236_v1  ;;  %v3062_v57 = vmul.f32 1.442695, %v3058_v10 }
 0xba8   :  { %v3258_v8 = vpack.c.bf16 %v7794_v11, %v7792_v60  ;;  %v3249_v20 = vsel %vm67_vm0, %v7794_v11, 0.0 }
 0xba9   :  { %7795 = vpow2.f32 %v3242_v62 }
 0xbaa   :  { %6628 = vmatmul.msk.bf16.vlgmr.msra.gmra.mxu0 %vm67_vm0, %v3258_v8 }
 0xbac   :  { %v3233_v6 = vpop.xlane.xlu0 %3232  ;;  %v3085_v27 = vpop.permute.xlu2 %3084 }
 0xbad   :  { %v3237_v4 = vsub.f32 %v3221_v38, %v3233_v6 }
 0xbaf   :  { %v3244_v7 = vmul.f32 1.442695, %v3237_v4  ;;  %v7796_v5 = vpop.eup %7795 }
 0xbb0   :  { %v3252_v24 = vsel %vm67_vm0, %v7796_v5, 0.0 }
 0xbb1   :  { %7797 = vpow2.f32 %v3244_v7  ;;  %3253 = vadd.xlane.f32.xlu0 %v3252_v24 }
 0xbb4   :  { %v3051_v14 = vpop.xlane.xlu0 %3050 }
 0xbb5   :  { %v3059_v13 = vsub.f32 %v3043_v42, %v3051_v14 }
 0xbb7   :  { %v7798_v16 = vpop.eup %7797  ;;  %v3064_v17 = vmul.f32 1.442695, %v3059_v13 }
 0xbb8   :  { %v3255_v18 = vsel %vm67_vm0, %v7798_v16, 0.0  ;;  %v3259_v19 = vpack.c.bf16 %v7798_v16, %v7796_v5 }
 0xbb9   :  { %7799 = vpow2.f32 %v3064_v17  ;;  %3256 = vadd.xlane.f32.xlu1 %v3255_v18  ;;  %3250 = vadd.xlane.f32.xlu0 %v3249_v20  ;;  %v7591_v20 = vld [vmem:[#allocation2 + $0x890] sm:$0xff] }
 0xbba   :  { %6629 = vmatmul.msk.bf16.gmra.mxu0 %vm67_vm0, %v3259_v19  ;;  %7801 = vpow2.f32 %v3062_v57 }
 0xbbc   :  { %v3087_v21 = vpop.permute.xlu1 %3086  ;;  %v3054_v58 = vpop.xlane.xlu0 %3053 }
 0xbbd   :  { %v3060_v22 = vsub.f32 %v3044_v46, %v3054_v58  ;;  %3102 = vmatpush.bf16.msra.mxu2 %v3087_v21 }
 0xbbf   :  { %v7800_v23 = vpop.eup %7799  ;;  %v3066_v26 = vmul.f32 1.442695, %v3060_v22 }
 0xbc0   :  { %v7802_v28 = vpop.eup %7801  ;;  %v3073_v39 = vsel %vm67_vm0, %v7800_v23, 0.0 }
 0xbc1   :  { %7803 = vpow2.f32 %v3066_v26  ;;  %3103 = vmatpush.bf16.msra.mxu2 %v3085_v27  ;;  %v3082_v29 = vpack.c.bf16 %v7800_v23, %v7802_v28  ;;  %v3070_v38 = vsel %vm67_vm0, %v7802_v28, 0.0 }
 0xbc4   :  { %6624 = vmatmul.msk.bf16.vlgmr.msra.gmra.mxu2 %vm67_vm0, %v3082_v29  ;;  %v3057_v30 = vpop.xlane.xlu0 %3056 }
 0xbc5   :  { %v3061_v31 = vsub.f32 %v3045_v50, %v3057_v30 }
 0xbc7   :  { %v7804_v32 = vpop.eup %7803  ;;  %v3068_v33 = vmul.f32 1.442695, %v3061_v31 }
 0xbc8   :  { %v3076_v34 = vsel %vm67_vm0, %v7804_v32, 0.0 }
 0xbc9   :  { %7805 = vpow2.f32 %v3068_v33  ;;  %3077 = vadd.xlane.f32.xlu0 %v3076_v34 }
 0xbcf   :  { %v7806_v35 = vpop.eup %7805 }
 0xbd0   :  { %v3079_v36 = vsel %vm67_vm0, %v7806_v35, 0.0  ;;  %v3083_v37 = vpack.c.bf16 %v7806_v35, %v7804_v32 }
 0xbd1   :  { %3080 = vadd.xlane.f32.xlu0 %v3079_v36 }
 0xbd4   :  { %6625 = vmatmul.msk.bf16.gmra.mxu2 %vm67_vm0, %v3083_v37 }
 0xbd9   :  { %3071 = vadd.xlane.f32.xlu0 %v3070_v38 }
 0xbe1   :  { %3074 = vadd.xlane.f32.xlu0 %v3073_v39 }
 0xc14   :  { %v3248_v40 = vpop.xlane.xlu2 %3247 }
 0xc15   :  { %7807 = vrcp.f32 %v3248_v40  ;;  %vm3296_vm4 = vweird.f32 %v3248_v40  ;;  %v3300_v61 = vand.u32 2147483647, %v3248_v40  ;;  %v3302_v1 = vand.u32 2147483648, %v3248_v40 }
 0xc17   :  { %vm3301_vm13 = vcmp.eq.f32.partialorder %v3300_v61, 8.507059e+37  ;;  %v3303_v21 = vor.u32 1.1754944e-38, %v3302_v1 }
 0xc1b   :  { %v7808_v42 = vpop.eup %7807 }
 0xc1c   :  { %v3292_v45 = vmul.f32 %v7808_v42, %v3248_v40  ;;  %vm3297_vm5 = vweird.f32 %v7808_v42 }
 0xc1d   :  { %vm8135_vm9 = vmor %vm3296_vm4, %vm3297_vm5 }
 0xc1e   :  { %v3293_v50 = vsub.f32 1.0, %v3292_v45 }
 0xc20   :  { %v3294_v53 = vmul.f32 %v7808_v42, %v3293_v50 }
 0xc22   :  { %v3295_v43 = vadd.f32 %v7808_v42, %v3294_v53 }
 0xc24   :  { %v3254_v41 = vpop.xlane.xlu0 %3253  ;;  %v3299_v18 = vsel %vm8135_vm9, %v7808_v42, %v3295_v43 }
 0xc25   :  { %7809 = vrcp.f32 %v3254_v41  ;;  %vm3326_vm6 = vweird.f32 %v3254_v41  ;;  %v3332_v6 = vand.u32 2147483648, %v3254_v41  ;;  %v3330_v16 = vand.u32 2147483647, %v3254_v41 }
 0xc26   :  { %v3304_v29 = vsel %vm3301_vm13, %v3303_v21, %v3299_v18 }
 0xc27   :  { %v3281_v44 = vpop.f32.mrf.mxu0  ;;  %v3333_v27 = vor.u32 1.1754944e-38, %v3332_v6 }
 0xc28   :  { %v3305_v31 = vmul.f32 %v3304_v29, %v3281_v44 }
 0xc2b   :  { %v7810_v46 = vpop.eup %7809 }
 0xc2c   :  { %v3257_v47 = vpop.xlane.xlu1 %3256  ;;  %v3322_v48 = vmul.f32 %v7810_v46, %v3254_v41  ;;  %v3251_v49 = vpop.xlane.xlu0 %3250  ;;  %vm3327_vm7 = vweird.f32 %v7810_v46 }
 0xc2d   :  { %7811 = vrcp.f32 %v3257_v47  ;;  %v3317_v7 = vand.u32 2147483648, %v3251_v49  ;;  %v3315_v10 = vand.u32 2147483647, %v3251_v49  ;;  %v3347_v14 = vand.u32 2147483648, %v3257_v47  ;;  %vm8139_vm11 = vmor %vm3326_vm6, %vm3327_vm7 }
 0xc2e   :  { %7813 = vrcp.f32 %v3251_v49  ;;  %v3323_v52 = vsub.f32 1.0, %v3322_v48  ;;  %vm3341_vm12 = vweird.f32 %v3257_v47  ;;  %v3345_v17 = vand.u32 2147483647, %v3257_v47 }
 0xc2f   :  { %v3283_v51 = vpop.f32.mrf.mxu0  ;;  %vm3311_vm14 = vweird.f32 %v3251_v49  ;;  %v3318_v58 = vor.u32 1.1754944e-38, %v3317_v7  ;;  %vm3316_vm5 = vcmp.eq.f32.partialorder %v3315_v10, 8.507059e+37  ;;  %v3348_v28 = vor.u32 1.1754944e-38, %v3347_v14 }
 0xc30   :  { %v3324_v60 = vmul.f32 %v7810_v46, %v3323_v52  ;;  %vm3331_vm6 = vcmp.eq.f32.partialorder %v3330_v16, 8.507059e+37  ;;  %vm3346_vm7 = vcmp.eq.f32.partialorder %v3345_v17, 8.507059e+37 }
 0xc32   :  { %v3325_v5 = vadd.f32 %v7810_v46, %v3324_v60 }
 0xc33   :  { %v7812_v54 = vpop.eup %7811 }
 0xc34   :  { %v7814_v55 = vpop.eup %7813  ;;  %v3337_v56 = vmul.f32 %v7812_v54, %v3257_v47  ;;  %vm3342_vm8 = vweird.f32 %v7812_v54  ;;  %v3329_v22 = vsel %vm8139_vm11, %v7810_v46, %v3325_v5 }
 0xc35   :  { %v3307_v0 = vmul.f32 %v7814_v55, %v3251_v49  ;;  %vm3312_vm10 = vweird.f32 %v7814_v55  ;;  %vm8146_vm15 = vmor %vm3341_vm12, %vm3342_vm8  ;;  %v3334_v33 = vsel %vm3331_vm6, %v3333_v27, %v3329_v22 }
 0xc36   :  { %v3338_v11 = vsub.f32 1.0, %v3337_v56  ;;  %vm3313_vm4 = vmor %vm3311_vm14, %vm3312_vm10 }
 0xc37   :  { %v3308_v62 = vsub.f32 1.0, %v3307_v0  ;;  %v3286_v8 = vpop.f32.mrf.mxu0 }
 0xc38   :  { %v3339_v4 = vmul.f32 %v7812_v54, %v3338_v11  ;;  %v3335_v36 = vmul.f32 %v3334_v33, %v3286_v8 }
 0xc39   :  { %v3309_v24 = vmul.f32 %v7814_v55, %v3308_v62 }
 0xc3a   :  { %v3340_v57 = vadd.f32 %v7812_v54, %v3339_v4 }
 0xc3b   :  { %v3310_v19 = vadd.f32 %v7814_v55, %v3309_v24  ;;  %v7574_v24 = vld [vmem:[#allocation2 + $0x820] sm:$0xff] }
 0xc3c   :  { %v3344_v23 = vsel %vm8146_vm15, %v7812_v54, %v3340_v57  ;;  %v3078_v40 = vpop.xlane.xlu0 %3077 }
 0xc3d   :  { %v3314_v26 = vsel %vm3313_vm4, %v7814_v55, %v3310_v19  ;;  %v3349_v35 = vsel %vm3346_vm7, %v3348_v28, %v3344_v23  ;;  %7815 = vrcp.f32 %v3078_v40  ;;  %vm3150_vm9 = vweird.f32 %v3078_v40 }
 0xc3e   :  { %v3319_v30 = vsel %vm3316_vm5, %v3318_v58, %v3314_v26  ;;  %v3154_v8 = vand.u32 2147483647, %v3078_v40  ;;  %v3156_v6 = vand.u32 2147483648, %v3078_v40 }
 0xc3f   :  { %v3320_v32 = vmul.f32 %v3319_v30, %v3283_v51  ;;  %v3288_v34 = vpop.f32.mrf.mxu0 }
 0xc40   :  { %v3350_v37 = vmul.f32 %v3349_v35, %v3288_v34  ;;  %v3157_v26 = vor.u32 1.1754944e-38, %v3156_v6 }
 0xc41   :  { %v7767_v38 = vpack.i.bf16 %v3320_v32, %v3305_v31 }
 0xc42   :  { %v7762_v39 = vpack.i.bf16 %v3350_v37, %v3335_v36 }
 0xc43   :  { %7768 = vrot.lane.b32.xlu0 %v7767_v38, %s7915_s8  ;;  %v7816_v46 = vpop.eup %7815 }
 0xc44   :  { %7763 = vrot.lane.b32.xlu1 %v7762_v39, %s7915_s8  ;;  %v3081_v41 = vpop.xlane.xlu0 %3080  ;;  %v3146_v51 = vmul.f32 %v7816_v46, %v3078_v40  ;;  %vm3151_vm8 = vweird.f32 %v7816_v46 }
 0xc45   :  { %7817 = vrcp.f32 %v3081_v41  ;;  %vm3165_vm12 = vweird.f32 %v3081_v41  ;;  %vm8160_vm14 = vmor %vm3150_vm9, %vm3151_vm8  ;;  %v3171_v10 = vand.u32 2147483648, %v3081_v41  ;;  %v3169_v57 = vand.u32 2147483647, %v3081_v41 }
 0xc46   :  { %v3147_v55 = vsub.f32 1.0, %v3146_v51  ;;  %vm3155_vm8 = vcmp.eq.f32.partialorder %v3154_v8, 8.507059e+37 }
 0xc47   :  { %v8156_v45 = vpop.f32.mrf.mxu2  ;;  %v3172_v28 = vor.u32 1.1754944e-38, %v3171_v10  ;;  %vm3170_vm9 = vcmp.eq.f32.partialorder %v3169_v57, 8.507059e+37  ;;  %v7573_v10 = vld [vmem:[#allocation2 + $0x818] sm:$0xff] }
 0xc48   :  { %v3148_v1 = vmul.f32 %v7816_v46, %v3147_v55  ;;  %v2507_v55 = vld [vmem:[#allocation2 + $0x710] sm:$0xf] }
 0xc4a   :  { %v3149_v4 = vadd.f32 %v7816_v46, %v3148_v1 }
 0xc4b   :  { %v7818_v47 = vpop.eup %7817 }
 0xc4c   :  { %v3072_v42 = vpop.xlane.xlu0 %3071  ;;  %v3161_v52 = vmul.f32 %v7818_v47, %v3081_v41  ;;  %vm3166_vm10 = vweird.f32 %v7818_v47  ;;  %v3153_v21 = vsel %vm8160_vm14, %v7816_v46, %v3149_v4 }
 0xc4d   :  { %7819 = vrcp.f32 %v3072_v42  ;;  %vm3120_vm15 = vweird.f32 %v3072_v42  ;;  %v3126_v14 = vand.u32 2147483648, %v3072_v42  ;;  %vm8164_vm4 = vmor %vm3165_vm12, %vm3166_vm10  ;;  %v3124_v18 = vand.u32 2147483647, %v3072_v42 }
 0xc4e   :  { %v3162_v56 = vsub.f32 1.0, %v3161_v52  ;;  %v3158_v31 = vsel %vm3155_vm8, %v3157_v26, %v3153_v21  ;;  %vm3450_vm12 = vcmask 523264   ;;  %v7590_v21 = vld [vmem:[#allocation2 + $0x888] sm:$0xff]  ;;  %v7783_v26 = vld [vmem:[#allocation4 + $0x58] ss:$0 sm:$0xff] }
 0xc4f   :  { %v8158_v49 = vpop.f32.mrf.mxu2  ;;  %v3127_v29 = vor.u32 1.1754944e-38, %v3126_v14  ;;  %vm3125_vm10 = vcmp.eq.f32.partialorder %v3124_v18, 8.507059e+37 }
 0xc50   :  { %v3163_v43 = vmul.f32 %v7818_v47, %v3162_v56  ;;  %v7580_v56 = vld [vmem:[#allocation2 + $0x850] sm:$0xff] }
 0xc51   :  { %3521 = vmatpush.bf16.msrb.mxu0 %v7580_v56 }
 0xc52   :  { %v3164_v7 = vadd.f32 %v7818_v47, %v3163_v43  ;;  %v7577_v43 = vld [vmem:[#allocation2 + $0x838] sm:$0xff] }
 0xc53   :  { %v7820_v48 = vpop.eup %7819 }
 0xc54   :  { %v3075_v44 = vpop.xlane.xlu0 %3074  ;;  %v3116_v53 = vmul.f32 %v7820_v48, %v3072_v42  ;;  %vm3121_vm11 = vweird.f32 %v7820_v48  ;;  %v3168_v58 = vsel %vm8164_vm4, %v7818_v47, %v3164_v7 }
 0xc55   :  { %7821 = vrcp.f32 %v3075_v44  ;;  %v3141_v13 = vand.u32 2147483648, %v3075_v44  ;;  %vm8168_vm5 = vmor %vm3120_vm15, %vm3121_vm11  ;;  %vm3135_vm6 = vweird.f32 %v3075_v44  ;;  %v3139_v19 = vand.u32 2147483647, %v3075_v44 }
 0xc56   :  { %v3117_v60 = vsub.f32 1.0, %v3116_v53  ;;  %v3173_v32 = vsel %vm3170_vm9, %v3172_v28, %v3168_v58  ;;  %v7589_v58 = vld [vmem:[#allocation2 + $0x880] sm:$0xff] }
 0xc57   :  { %v3110_v0 = vpop.f32.mrf.mxu2  ;;  %v3142_v30 = vor.u32 1.1754944e-38, %v3141_v13  ;;  %vm3140_vm11 = vcmp.eq.f32.partialorder %v3139_v19, 8.507059e+37 }
 0xc58   :  { %v3118_v11 = vmul.f32 %v7820_v48, %v3117_v60  ;;  %v3159_v36 = vmul.f32 %v3158_v31, %v3110_v0  ;;  %v7579_v60 = vld [vmem:[#allocation2 + $0x848] sm:$0xff]  ;;  %v7599_v31 = vld [vmem:[#allocation2 + $0x8d0] sm:$0xff] }
 0xc59   :  { %3522 = vmatpush.bf16.msrb.mxu0 %v7579_v60 }
 0xc5a   :  { %v3119_v5 = vadd.f32 %v7820_v48, %v3118_v11 }
 0xc5b   :  { %v7822_v50 = vpop.eup %7821 }
 0xc5c   :  { %v3131_v54 = vmul.f32 %v7822_v50, %v3075_v44  ;;  %vm3136_vm13 = vweird.f32 %v7822_v50  ;;  %v3123_v22 = vsel %vm8168_vm5, %v7820_v48, %v3119_v5  ;;  %v7576_v5 = vld [vmem:[#allocation2 + $0x830] sm:$0xff] }
 0xc5d   :  { %vm8172_vm7 = vmor %vm3135_vm6, %vm3136_vm13  ;;  %v3128_v34 = vsel %vm3125_vm10, %v3127_v29, %v3123_v22  ;;  %vm3452_vm13 = vcmask 785408   ;;  %v7588_v22 = vld [vmem:[#allocation2 + $0x878] sm:$0xff] }
 0xc5e   :  { %v3132_v61 = vsub.f32 1.0, %v3131_v54  ;;  %v3129_v44 = vmul.f32 %v3128_v34, %v8156_v45  ;;  %v2505_v54 = vld [vmem:[#allocation2 + $0x708] sm:$0xf]  ;;  %v2508_v45 = vld [vmem:[#allocation2 + $0x714] sm:$0xf]  ;;  %v7581_v34 = vld [vmem:[#allocation2 + $0x80] sm:$0xff] }
 0xc5f   :  { %v3112_v27 = vpop.f32.mrf.mxu2 }
 0xc60   :  { %v3133_v62 = vmul.f32 %v7822_v50, %v3132_v61  ;;  %v3174_v37 = vmul.f32 %v3173_v32, %v3112_v27  ;;  %v7578_v61 = vld [vmem:[#allocation2 + $0x840] sm:$0xff]  ;;  %v7607_v32 = vld [vmem:[#allocation2 + $0x910] sm:$0xff] }
 0xc61   :  { %3523 = vmatpush.bf16.msrb.mxu0 %v7578_v61 }
 0xc62   :  { %v3134_v9 = vadd.f32 %v7822_v50, %v3133_v62 }
 0xc64   :  { %v3138_v23 = vsel %vm8172_vm7, %v7822_v50, %v3134_v9  ;;  %v7575_v9 = vld [vmem:[#allocation2 + $0x828] sm:$0xff] }
 0xc65   :  { %v3143_v35 = vsel %vm3140_vm11, %v3142_v30, %v3138_v23  ;;  %3524 = vmatpush.bf16.msrb.mxu0 %v7577_v43  ;;  %v7587_v23 = vld [vmem:[#allocation2 + $0x870] sm:$0xff] }
 0xc66   :  { %v3144_v46 = vmul.f32 %v3143_v35, %v8158_v49  ;;  %v2506_v49 = vld [vmem:[#allocation2 + $0x70c] sm:$0xf] }
 0xc67   :  { %v7582_v35 = vld [vmem:[#allocation2 + $0x88] sm:$0xff] }
 0xc69   :  { %3525 = vmatpush.bf16.msrb.mxu0 %v7576_v5  ;;  %v7619_v5 = vld [vmem:[#allocation2 + $0x970] sm:$0xff] }
 0xc6d   :  { %3526 = vmatpush.bf16.msrb.mxu0 %v7575_v9  ;;  %v7618_v9 = vld [vmem:[#allocation2 + $0x968] sm:$0xff] }
 0xc71   :  { %3527 = vmatpush.bf16.msrb.mxu0 %v7574_v24  ;;  %v7617_v24 = vld [vmem:[#allocation2 + $0x960] sm:$0xff] }
 0xc75   :  { %3528 = vmatpush.bf16.msrb.mxu0 %v7573_v10  ;;  %v7616_v10 = vld [vmem:[#allocation2 + $0x958] sm:$0xff] }
 0xc79   :  { %3808 = vmatpush.bf16.msra.mxu0 %v7591_v20 }
 0xc7d   :  { %3809 = vmatpush.bf16.msra.mxu0 %v7590_v21 }
 0xc81   :  { %3810 = vmatpush.bf16.msra.mxu0 %v7589_v58 }
 0xc85   :  { %3811 = vmatpush.bf16.msra.mxu0 %v7588_v22 }
 0xc89   :  { %3812 = vmatpush.bf16.msra.mxu0 %v7587_v23 }
 0xcb5   :  { %v7769_v33 = vpop.permute.xlu0 %7768 }
 0xcb6   :  { %v7764_v38 = vpop.permute.xlu1 %7763  ;;  %v7771_v39 = vunpack.i.h.bf16 %v7769_v33  ;;  %v7770_v40 = vunpack.i.l.bf16 %v7769_v33 }
 0xcb7   :  { %v7766_v41 = vunpack.i.h.bf16 %v7764_v38  ;;  %v7765_v42 = vunpack.i.l.bf16 %v7764_v38  ;;  %v7598_v38 = vld [vmem:[#allocation2 + $0x8c8] sm:$0xff] }
 0xcb8   :  { %v3368_v51 = vsel %vm1534_vm1, %v3144_v46, %v7771_v39  ;;  %v3367_v52 = vsel %vm1534_vm1, %v3129_v44, %v7770_v40  ;;  %v7606_v39 = vld [vmem:[#allocation2 + $0x908] sm:$0xff]  ;;  %v7605_v40 = vld [vmem:[#allocation2 + $0x900] sm:$0xff]  ;;  %v7595_v46 = vld [vmem:[#allocation2 + $0x8b0] sm:$0xff] }
 0xcb9   :  { %v3369_v47 = vsel %vm1534_vm1, %v3159_v36, %v7765_v42  ;;  %v3370_v48 = vsel %vm1534_vm1, %v3174_v37, %v7766_v41  ;;  %v3371_v53 = vpack.c.bf16 %v3368_v51, %v3367_v52  ;;  %v7583_v37 = vld [vmem:[#allocation2 + $0x90] sm:$0xff]  ;;  %v7596_v41 = vld [vmem:[#allocation2 + $0x8b8] sm:$0xff]  ;;  %v7586_v44 = vld [vmem:[#allocation2 + $0x868] sm:$0xff] }
 0xcba   :  { %v3372_v50 = vpack.c.bf16 %v3370_v48, %v3369_v47  ;;  %v7604_v42 = vld [vmem:[#allocation2 + $0x8f8] sm:$0xff]  ;;  %v7603_v47 = vld [vmem:[#allocation2 + $0x8f0] sm:$0xff]  ;;  %3813 = vmatpush.bf16.msra.mxu0 %v7586_v44  ;;  %v7585_v48 = vld [vmem:[#allocation2 + $0x860] sm:$0xff] }
 0xcbb   :  { %v7602_v51 = vld [vmem:[#allocation2 + $0x8e8] sm:$0xff]  ;;  %v7584_v52 = vld [vmem:[#allocation2 + $0x858] sm:$0xff]  ;;  %v7609_v44 = vld [vmem:[#allocation2 + $0x920] sm:$0xff] }
 0xcbc   :  { %3382 = vmatpush.bf16.msra.mxu1 %v3372_v50  ;;  %3414 = vmatpush.bf16.msrb.mxu2 %v3372_v50 }
 0xcbd   :  { %3430 = vmatpush.bf16.msrb.mxu3 %v3372_v50 }
 0xcbe   :  { %3814 = vmatpush.bf16.msra.mxu0 %v7585_v48  ;;  %v7628_v48 = vld [vmem:[#allocation2 + $0x9b8] sm:$0xff] }
 0xcc0   :  { %3383 = vmatpush.bf16.msra.mxu1 %v3371_v53  ;;  %3415 = vmatpush.bf16.msrb.mxu2 %v3371_v53 }
 0xcc1   :  { %3431 = vmatpush.bf16.msrb.mxu3 %v3371_v53 }
 0xcc2   :  { %3815 = vmatpush.bf16.msra.mxu0 %v7584_v52  ;;  %v7625_v52 = vld [vmem:[#allocation2 + $0x9a0] sm:$0xff] }
 0xcc3   :  { %6630 = vmatmul.msk.bf16.vlgmr.msra.gmra.mxu1 %vm67_vm0, %v2505_v54  ;;  %6632 = vmatmul.msk.bf16.vlgmr.msrb.gmra.mxu2 %vm67_vm0, %v2507_v55  ;;  %v7601_v54 = vld [vmem:[#allocation2 + $0x8e0] sm:$0xff]  ;;  %v7592_v55 = vld [vmem:[#allocation2 + $0x898] sm:$0xff] }
 0xcc4   :  { %3398 = vmatpush.bf16.msrb.mxu1 %v3372_v50  ;;  %6633 = vmatmul.msk.bf16.vlgmr.msrb.gmra.mxu3 %vm67_vm0, %v2508_v45  ;;  %v7594_v50 = vld [vmem:[#allocation2 + $0x8a8] sm:$0xff]  ;;  %v7600_v45 = vld [vmem:[#allocation2 + $0x8d8] sm:$0xff] }
 0xcc8   :  { %3399 = vmatpush.bf16.msrb.mxu1 %v3371_v53  ;;  %v7593_v53 = vld [vmem:[#allocation2 + $0x8a0] sm:$0xff] }
 0xcd3   :  { %6631 = vmatmul.msk.bf16.vlgmr.msrb.gmra.mxu1 %vm67_vm0, %v2506_v49 }
 0xd40   :  { %v3385_v0 = vpop.f32.mrf.mxu1 }
 0xd46   :  { %v3417_v1 = vpop.f32.mrf.mxu2 }
 0xd47   :  { %v3433_v11 = vpop.f32.mrf.mxu3  ;;  %3442 = vrot.lane.b32.xlu0 %v3417_v1, %s7906_s20 }
 0xd48   :  { %3446 = vrot.lane.b32.xlu1 %v3433_v11, %s7912_s5  ;;  %v3387_v62 = vpop.f32.mrf.mxu1 }
 0xd4e   :  { %v3419_v8 = vpop.f32.mrf.mxu2 }
 0xd4f   :  { %v3435_v6 = vpop.f32.mrf.mxu3  ;;  %v7623_v8 = vld [vmem:[#allocation2 + $0x990] sm:$0xff] }
 0xd50   :  { %v3401_v4 = vpop.f32.mrf.mxu1  ;;  %v7622_v6 = vld [vmem:[#allocation2 + $0x988] sm:$0xff] }
 0xd51   :  { %3438 = vrot.lane.b32.xlu2 %v3401_v4, %s7916_s9  ;;  %v7621_v4 = vld [vmem:[#allocation2 + $0x980] sm:$0xff] }
 0xd58   :  { %v3403_v7 = vpop.f32.mrf.mxu1 }
 0xd59   :  { %v7620_v7 = vld [vmem:[#allocation2 + $0x978] sm:$0xff] }
 0xdab   :  { %v3439_v14 = vpop.permute.xlu2 %3438 }
 0xdac   :  { %v3449_v13 = vsel %vm67_vm0, %v3385_v0, %v3439_v14 }
 0xdb9   :  { %v3443_v16 = vpop.permute.xlu0 %3442 }
 0xdba   :  { %v3451_v57 = vsel %vm3450_vm12, %v3449_v13, %v3443_v16  ;;  %v3447_v17 = vpop.permute.xlu1 %3446  ;;  %v7784_v13 = vld [vmem:[#allocation4 + $0x80] ss:$0 sm:$0xff] }
 0xdbb   :  { %v3453_v18 = vsel %vm3452_vm13, %v3451_v57, %v3447_v17 }
 0xdbc   :  { %v3470_v19 = vpack.c.bf16 %v3453_v18, %v3453_v18 }
 0xdbe   :  { %3529 = vmatmul.bf16.vlgmr.msrb.gmra.mxu0 %v3470_v19 }
 0xe3b   :  { %v3530_v27 = vpop.f32.mrf.mxu0 }
 0xe3c   :  { %v3531_v28 = vadd.f32 %v7783_v26, %v3530_v27  ;;  %v7615_v27 = vld [vmem:[#allocation2 + $0x950] sm:$0xff] }
 0xe3d   :  { %4083 = vmatpush.bf16.msrb.mxu0 %v7615_v27  ;;  %v7637_v27 = vld [vmem:[#allocation2 + $0xa00] sm:$0xff] }
 0xe3e   :  { %v3534_v29 = vadd.f32 %v3531_v28, %v8071_v15  ;;  %v7597_v15 = vld [vmem:[#allocation2 + $0x8c0] sm:$0xff] }
 0xe40   :  { %v3537_v30 = vpack.c.bf16 %v3534_v29, %v3534_v29 }
 0xe42   :  { %v3547_v33 = vsel %vm2216_vm2, %v3537_v30, 0  ;;  %v7614_v30 = vld [vmem:[#allocation2 + $0x948] sm:$0xff] }
 0xe43   :  { %v3532_v36 = vpop.f32.mrf.mxu0  ;;  %3556 = vmatpush.bf16.msra.mxu1 %v3547_v33  ;;  %3580 = vmatpush.bf16.msra.mxu2 %v3547_v33 }
 0xe44   :  { %3604 = vmatpush.bf16.msra.mxu3 %v3547_v33  ;;  %4084 = vmatpush.bf16.msrb.mxu0 %v7614_v30 }
 0xe46   :  { %6670 = vmatmul.msk.bf16.vlgmr.msra.gmra.mxu1 %vm2212_vm3, %v7581_v34  ;;  %6675 = vmatmul.msk.bf16.vlgmr.msra.gmra.mxu2 %vm2212_vm3, %v7582_v35  ;;  %v7613_v34 = vld [vmem:[#allocation2 + $0x940] sm:$0xff] }
 0xe47   :  { %3822 = vmatpush.bf16.msrb.mxu1 %v7599_v31  ;;  %3836 = vmatpush.bf16.msrb.mxu2 %v7607_v32 }
 0xe48   :  { %6680 = vmatmul.msk.bf16.vlgmr.msra.gmra.mxu3 %vm2212_vm3, %v7583_v37  ;;  %4085 = vmatpush.bf16.msrb.mxu0 %v7613_v34  ;;  %v7655_v34 = vld [vmem:[#allocation2 + $0xa90] sm:$0xff] }
 0xe4b   :  { %3823 = vmatpush.bf16.msrb.mxu1 %v7598_v38  ;;  %3837 = vmatpush.bf16.msrb.mxu2 %v7606_v39  ;;  %v8210_v38 = vld [vmem:[#allocation2 + $0x20] sm:$0xff]  ;;  %v7612_v39 = vld [vmem:[#allocation2 + $0x938] sm:$0xff] }
 0xe4c   :  { %4086 = vmatpush.bf16.msrb.mxu0 %v7612_v39  ;;  %v7653_v39 = vld [vmem:[#allocation2 + $0xa80] sm:$0xff] }
 0xe4f   :  { %3824 = vmatpush.bf16.msrb.mxu1 %v7597_v15  ;;  %3838 = vmatpush.bf16.msrb.mxu2 %v7605_v40  ;;  %v7631_v15 = vld [vmem:[#allocation2 + $0x9d0] sm:$0xff] }
 0xe50   :  { %v7611_v40 = vld [vmem:[#allocation2 + $0x930] sm:$0xff] }
 0xe51   :  { %4087 = vmatpush.bf16.msrb.mxu0 %v7611_v40  ;;  %v7652_v40 = vld [vmem:[#allocation2 + $0xa78] sm:$0xff] }
 0xe53   :  { %3825 = vmatpush.bf16.msrb.mxu1 %v7596_v41  ;;  %3839 = vmatpush.bf16.msrb.mxu2 %v7604_v42  ;;  %v7610_v41 = vld [vmem:[#allocation2 + $0x928] sm:$0xff] }
 0xe54   :  { %v7630_v42 = vld [vmem:[#allocation2 + $0x9c8] sm:$0xff] }
 0xe55   :  { %4088 = vmatpush.bf16.msrb.mxu0 %v7610_v41  ;;  %v7649_v41 = vld [vmem:[#allocation2 + $0xa60] sm:$0xff] }
 0xe57   :  { %3826 = vmatpush.bf16.msrb.mxu1 %v7595_v46  ;;  %3840 = vmatpush.bf16.msrb.mxu2 %v7603_v47  ;;  %v7629_v46 = vld [vmem:[#allocation2 + $0x9c0] sm:$0xff]  ;;  %v7608_v47 = vld [vmem:[#allocation2 + $0x918] sm:$0xff] }
 0xe59   :  { %4089 = vmatpush.bf16.msrb.mxu0 %v7609_v44 }
 0xe5b   :  { %3827 = vmatpush.bf16.msrb.mxu1 %v7594_v50  ;;  %3841 = vmatpush.bf16.msrb.mxu2 %v7602_v51  ;;  %v7627_v50 = vld [vmem:[#allocation2 + $0x9b0] sm:$0xff]  ;;  %v7626_v51 = vld [vmem:[#allocation2 + $0x9a8] sm:$0xff] }
 0xe5d   :  { %4090 = vmatpush.bf16.msrb.mxu0 %v7608_v47 }
 0xe5f   :  { %3828 = vmatpush.bf16.msrb.mxu1 %v7593_v53  ;;  %3842 = vmatpush.bf16.msrb.mxu2 %v7601_v54  ;;  %v7624_v53 = vld [vmem:[#allocation2 + $0x998] sm:$0xff] }
 0xe63   :  { %3829 = vmatpush.bf16.msrb.mxu1 %v7592_v55  ;;  %3843 = vmatpush.bf16.msrb.mxu2 %v7600_v45 }
 0xe67   :  { %4097 = vmatpush.bf16.msra.mxu1 %v7623_v8  ;;  %4111 = vmatpush.bf16.msra.mxu2 %v7631_v15  ;;  %v7641_v8 = vld [vmem:[#allocation2 + $0xa20] sm:$0xff]  ;;  %v7632_v15 = vld [vmem:[#allocation2 + $0x9d8] sm:$0xff] }
 0xe6b   :  { %4098 = vmatpush.bf16.msra.mxu1 %v7622_v6  ;;  %4112 = vmatpush.bf16.msra.mxu2 %v7630_v42  ;;  %v7640_v6 = vld [vmem:[#allocation2 + $0xa18] sm:$0xff] }
 0xe6c   :  { %v7648_v42 = vld [vmem:[#allocation2 + $0xa58] sm:$0xff] }
 0xe6f   :  { %4099 = vmatpush.bf16.msra.mxu1 %v7621_v4  ;;  %4113 = vmatpush.bf16.msra.mxu2 %v7629_v46 }
 0xe73   :  { %4100 = vmatpush.bf16.msra.mxu1 %v7620_v7  ;;  %4114 = vmatpush.bf16.msra.mxu2 %v7628_v48  ;;  %v7785_v7 = vld [vmem:[#allocation4 + $0x88] ss:$0 sm:$0xff] }
 0xe77   :  { %4101 = vmatpush.bf16.msra.mxu1 %v7619_v5  ;;  %4115 = vmatpush.bf16.msra.mxu2 %v7627_v50 }
 0xe7b   :  { %4102 = vmatpush.bf16.msra.mxu1 %v7618_v9  ;;  %4116 = vmatpush.bf16.msra.mxu2 %v7626_v51 }
 0xe7f   :  { %4103 = vmatpush.bf16.msra.mxu1 %v7617_v24  ;;  %4117 = vmatpush.bf16.msra.mxu2 %v7625_v52 }
 0xe83   :  { %4104 = vmatpush.bf16.msra.mxu1 %v7616_v10  ;;  %4118 = vmatpush.bf16.msra.mxu2 %v7624_v53 }
 0xec3   :  { %v3558_v49 = vpop.f32.mrf.mxu1 }
 0xec9   :  { %v3582_v56 = vpop.f32.mrf.mxu2 }
 0xecb   :  { %v3606_v60 = vpop.f32.mrf.mxu3  ;;  %v3560_v61 = vpop.f32.mrf.mxu1 }
 0xecc   :  { %v3659_v0 = vpack.c.bf16 %v3560_v61, %v3558_v49  ;;  %v7647_v61 = vld [vmem:[#allocation2 + $0xa50] sm:$0xff] }
 0xece   :  { %3816 = vmatmul.bf16.vlgmr.msra.gmra.mxu0 %v3659_v0  ;;  %v7646_v0 = vld [vmem:[#allocation2 + $0xa48] sm:$0xff] }
 0xed1   :  { %v3584_v43 = vpop.f32.mrf.mxu2 }
 0xed2   :  { %v3660_v1 = vpack.c.bf16 %v3584_v43, %v3582_v56  ;;  %v7645_v43 = vld [vmem:[#allocation2 + $0xa40] sm:$0xff] }
 0xed3   :  { %v3608_v11 = vpop.f32.mrf.mxu3 }
 0xed4   :  { %v3661_v62 = vpack.c.bf16 %v3608_v11, %v3606_v60  ;;  %3830 = vmatmul.bf16.vlgmr.msrb.gmra.mxu1 %v3660_v1  ;;  %v7644_v1 = vld [vmem:[#allocation2 + $0xa38] sm:$0xff]  ;;  %v7643_v11 = vld [vmem:[#allocation2 + $0xa30] sm:$0xff] }
 0xed5   :  { %4370 = vmatpush.bf16.msrb.mxu1 %v7647_v61 }
 0xed6   :  { %3844 = vmatmul.bf16.vlgmr.msrb.gmra.mxu2 %v3661_v62  ;;  %v7642_v62 = vld [vmem:[#allocation2 + $0xa28] sm:$0xff] }
 0xed7   :  { %4384 = vmatpush.bf16.msrb.mxu2 %v7655_v34  ;;  %v7670_v34 = vld [vmem:[#allocation2 + $0xad8] sm:$0xff] }
 0xed9   :  { %4371 = vmatpush.bf16.msrb.mxu1 %v7646_v0  ;;  %v7676_v0 = vld [vmem:[#allocation2 + $0xb08] sm:$0xff] }
 0xedd   :  { %4372 = vmatpush.bf16.msrb.mxu1 %v7645_v43 }
 0xee1   :  { %4373 = vmatpush.bf16.msrb.mxu1 %v7644_v1 }
 0xee5   :  { %4374 = vmatpush.bf16.msrb.mxu1 %v7643_v11 }
 0xee9   :  { %4375 = vmatpush.bf16.msrb.mxu1 %v7642_v62 }
 0xeed   :  { %4376 = vmatpush.bf16.msrb.mxu1 %v7641_v8 }
 0xef1   :  { %4377 = vmatpush.bf16.msrb.mxu1 %v7640_v6  ;;  %v7675_v6 = vld [vmem:[#allocation2 + $0xb00] sm:$0xff] }
 0xf4b   :  { %v3817_v14 = vpop.f32.mrf.mxu0 }
 0xf4c   :  { %v3818_v57 = vadd.f32 %v7784_v13, %v3817_v14 }
 0xf51   :  { %v3831_v16 = vpop.f32.mrf.mxu1 }
 0xf52   :  { %v3832_v17 = vadd.f32 %v3831_v16, %v3818_v57 }
 0xf53   :  { %v3819_v20 = vpop.f32.mrf.mxu0 }
 0xf54   :  { %v3820_v58 = vadd.f32 %v7784_v13, %v3819_v20 }
 0xf59   :  { %v3845_v18 = vpop.f32.mrf.mxu2  ;;  %v3833_v21 = vpop.f32.mrf.mxu1 }
 0xf5a   :  { %v3846_v19 = vadd.f32 %v3845_v18, %v3832_v17  ;;  %v3834_v23 = vadd.f32 %v3833_v21, %v3820_v58  ;;  %v7639_v17 = vld [vmem:[#allocation2 + $0xa10] sm:$0xff]  ;;  %v7638_v21 = vld [vmem:[#allocation2 + $0xa08] sm:$0xff] }
 0xf5b   :  { %4356 = vmatpush.bf16.msra.mxu0 %v7639_v17  ;;  %v7668_v17 = vld [vmem:[#allocation2 + $0xac8] sm:$0xff] }
 0xf5c   :  { %v8203_v22 = vadd.f32 %v3846_v19, %v8057_v2 }
 0xf5e   :  { %v3852_v28 = vmul.f32 0.999995, %v8203_v22 }
 0xf5f   :  { %4357 = vmatpush.bf16.msra.mxu0 %v7638_v21  ;;  %v7681_v21 = vld [vmem:[#allocation2 + $0xb30] sm:$0xff] }
 0xf60   :  { %v3854_v32 = vmax.f32 %v3852_v28, 0.0 }
 0xf61   :  { %v3847_v26 = vpop.f32.mrf.mxu2 }
 0xf62   :  { %v3848_v29 = vadd.f32 %v3847_v26, %v3834_v23  ;;  %v3856_v36 = vmin.f32 %v3854_v32, 6.0 }
 0xf63   :  { %4358 = vmatpush.bf16.msra.mxu0 %v7637_v27  ;;  %v7672_v27 = vld [vmem:[#allocation2 + $0xae8] sm:$0xff] }
 0xf64   :  { %v8207_v31 = vadd.f32 %v3848_v29, %v8061_v25  ;;  %v8214_v25 = vld [vmem:[#allocation2 + $0x28] sm:$0xff] }
 0xf66   :  { %v3853_v33 = vmul.f32 0.999995, %v8207_v31 }
 0xf68   :  { %v3855_v35 = vmax.f32 %v3853_v33, 0.0  ;;  %v7636_v33 = vld [vmem:[#allocation2 + $0x9f8] sm:$0xff] }
 0xf69   :  { %4359 = vmatpush.bf16.msra.mxu0 %v7636_v33  ;;  %v7664_v33 = vld [vmem:[#allocation2 + $0xaa8] sm:$0xff] }
 0xf6a   :  { %v3857_v2 = vmin.f32 %v3855_v35, 6.0  ;;  %v7635_v35 = vld [vmem:[#allocation2 + $0x9f0] sm:$0xff] }
 0xf6c   :  { %v3858_v37 = vpack.c.bf16 %v3857_v2, %v3856_v36  ;;  %v7634_v36 = vld [vmem:[#allocation2 + $0x9e8] sm:$0xff] }
 0xf6d   :  { %4360 = vmatpush.bf16.msra.mxu0 %v7635_v35  ;;  %v7654_v2 = vld [vmem:[#allocation2 + $0xa88] sm:$0xff]  ;;  %v7678_v35 = vld [vmem:[#allocation2 + $0xb18] sm:$0xff] }
 0xf6e   :  { %3866 = vmatpush.bf16.msrb.mxu3 %v3858_v37  ;;  %4105 = vmatmul.bf16.vlgmr.msra.gmra.mxu1 %v3858_v37 }
 0xf6f   :  { %4385 = vmatpush.bf16.msrb.mxu2 %v7654_v2  ;;  %v7662_v2 = vld [vmem:[#allocation2 + $0xa98] sm:$0xff] }
 0xf71   :  { %6777 = vmatmul.msk.bf16.vlgmr.msrb.gmra.mxu3 %vm1534_vm1, %v8210_v38  ;;  %4361 = vmatpush.bf16.msra.mxu0 %v7634_v36  ;;  %v7663_v36 = vld [vmem:[#allocation2 + $0xaa0] sm:$0xff] }
 0xf72   :  { %3880 = vmatpush.bf16.msra.mxu3 %v3858_v37  ;;  %v7633_v37 = vld [vmem:[#allocation2 + $0x9e0] sm:$0xff] }
 0xf73   :  { %4386 = vmatpush.bf16.msrb.mxu2 %v7653_v39 }
 0xf75   :  { %4362 = vmatpush.bf16.msra.mxu0 %v7633_v37 }
 0xf77   :  { %4387 = vmatpush.bf16.msrb.mxu2 %v7652_v40 }
 0xf79   :  { %4363 = vmatpush.bf16.msra.mxu0 %v7632_v15 }
 0xf81   :  { %6778 = vmatmul.msk.bf16.vlgmr.msra.gmra.mxu3 %vm1534_vm1, %v8214_v25 }
 0xfeb   :  { %v4106_v5 = vpop.f32.mrf.mxu1 }
 0xff3   :  { %v4108_v57 = vpop.f32.mrf.mxu1 }
 0xff4   :  { %v3868_v54 = vpop.f32.mrf.mxu3 }
 0xffc   :  { %v3870_v55 = vpop.f32.mrf.mxu3 }
 0xffd   :  { %v3935_v45 = vpack.c.bf16 %v3870_v55, %v3868_v54  ;;  %v7786_v54 = vld [vmem:[#allocation4 + $0x90] ss:$0 sm:$0xff] }
 0xfff   :  { %4091 = vmatmul.bf16.vlgmr.msrb.gmra.mxu0 %v3935_v45 }
0x1004   :  { %v3882_v49 = vpop.f32.mrf.mxu3 }
0x100c   :  { %v3884_v56 = vpop.f32.mrf.mxu3 }
0x100d   :  { %v3936_v60 = vpack.c.bf16 %v3884_v56, %v3882_v49 }
0x100f   :  { %4119 = vmatmul.bf16.vlgmr.msra.gmra.mxu2 %v3936_v60  ;;  %v7677_v60 = vld [vmem:[#allocation2 + $0xb10] sm:$0xff] }
0x107c   :  { %v4092_v4 = vpop.f32.mrf.mxu0 }
0x107d   :  { %v4093_v9 = vadd.f32 %v7785_v7, %v4092_v4 }
0x107f   :  { %v4107_v14 = vadd.f32 %v4106_v5, %v4093_v9  ;;  %v7685_v5 = vld [vmem:[#allocation2 + $0xb50] sm:$0xff] }
0x1084   :  { %v4094_v24 = vpop.f32.mrf.mxu0 }
0x1085   :  { %v4095_v13 = vadd.f32 %v7785_v7, %v4094_v24  ;;  %v7669_v24 = vld [vmem:[#allocation2 + $0xad0] sm:$0xff] }
0x1087   :  { %v4109_v19 = vadd.f32 %v4108_v57, %v4095_v13  ;;  %v7658_v13 = vld [vmem:[#allocation2 + $0xa8] sm:$0xff] }
0x1088   :  { %v7684_v57 = vld [vmem:[#allocation2 + $0xb48] sm:$0xff] }
0x1092   :  { %v4120_v10 = vpop.f32.mrf.mxu2 }
0x1093   :  { %v4121_v16 = vadd.f32 %v4120_v10, %v4107_v14  ;;  %v7674_v10 = vld [vmem:[#allocation2 + $0xaf8] sm:$0xff] }
0x1094   :  { %v7656_v14 = vld [vmem:[#allocation2 + $0x98] sm:$0xff] }
0x1095   :  { %v4125_v18 = vmul.f32 0.999995, %v4121_v16  ;;  %v7660_v16 = vld [vmem:[#allocation2 + $0xb8] sm:$0xff] }
0x1097   :  { %v4127_v23 = vmax.f32 %v4125_v18, 0.0  ;;  %v7673_v18 = vld [vmem:[#allocation2 + $0xaf0] sm:$0xff] }
0x1099   :  { %v4129_v29 = vmin.f32 %v4127_v23, 6.0  ;;  %v7659_v23 = vld [vmem:[#allocation2 + $0xb0] sm:$0xff] }
0x109a   :  { %v4122_v20 = vpop.f32.mrf.mxu2 }
0x109b   :  { %v4123_v58 = vadd.f32 %v4122_v20, %v4109_v19  ;;  %v7682_v19 = vld [vmem:[#allocation2 + $0xb38] sm:$0xff] }
0x109c   :  { %v7666_v20 = vld [vmem:[#allocation2 + $0xab8] sm:$0xff] }
0x109d   :  { %v4126_v26 = vmul.f32 0.999995, %v4123_v58  ;;  %v7657_v58 = vld [vmem:[#allocation2 + $0xa0] sm:$0xff] }
0x109f   :  { %v4128_v28 = vmax.f32 %v4126_v26, 0.0  ;;  %v7661_v26 = vld [vmem:[#allocation2 + $0xc0] sm:$0xff] }
0x10a1   :  { %v4130_v30 = vmin.f32 %v4128_v28, 6.0  ;;  %v7680_v28 = vld [vmem:[#allocation2 + $0xb28] sm:$0xff] }
0x10a3   :  { %v4131_v32 = vpack.c.bf16 %v4130_v30, %v4129_v29  ;;  %v7665_v29 = vld [vmem:[#allocation2 + $0xab0] sm:$0xff]  ;;  %v7671_v30 = vld [vmem:[#allocation2 + $0xae0] sm:$0xff] }
0x10a5   :  { %4139 = vmatpush.bf16.msrb.mxu3 %v4131_v32  ;;  %4378 = vmatmul.bf16.vlgmr.msrb.gmra.mxu1 %v4131_v32 }
0x10a8   :  { %6875 = vmatmul.msk.bf16.vlgmr.msrb.gmra.mxu3 %vm1534_vm1, %v8210_v38  ;;  %v7651_v38 = vld [vmem:[#allocation2 + $0xa70] sm:$0xff] }
0x10a9   :  { %4153 = vmatpush.bf16.msra.mxu3 %v4131_v32  ;;  %4388 = vmatpush.bf16.msrb.mxu2 %v7651_v38  ;;  %v7679_v32 = vld [vmem:[#allocation2 + $0xb20] sm:$0xff] }
0x10b8   :  { %6876 = vmatmul.msk.bf16.vlgmr.msra.gmra.mxu3 %vm1534_vm1, %v8214_v25  ;;  %v7650_v25 = vld [vmem:[#allocation2 + $0xa68] sm:$0xff] }
0x10b9   :  { %4389 = vmatpush.bf16.msrb.mxu2 %v7650_v25 }
0x10bd   :  { %4390 = vmatpush.bf16.msrb.mxu2 %v7649_v41 }
0x10c1   :  { %4391 = vmatpush.bf16.msrb.mxu2 %v7648_v42 }
0x10c5   :  { %4737 = vmatpush.bf16.msra.mxu2 %v7677_v60  ;;  %v7698_v60 = vld [vmem:[#allocation2 + $0xbb8] sm:$0xff] }
0x10c9   :  { %4738 = vmatpush.bf16.msra.mxu2 %v7676_v0  ;;  %v7696_v0 = vld [vmem:[#allocation2 + $0xba8] sm:$0xff] }
0x10cd   :  { %4739 = vmatpush.bf16.msra.mxu2 %v7675_v6 }
0x10d1   :  { %4740 = vmatpush.bf16.msra.mxu2 %v7674_v10 }
0x10d5   :  { %4741 = vmatpush.bf16.msra.mxu2 %v7673_v18 }
0x10d9   :  { %4742 = vmatpush.bf16.msra.mxu2 %v7672_v27 }
0x10dd   :  { %4743 = vmatpush.bf16.msra.mxu2 %v7671_v30 }
0x10e1   :  { %4744 = vmatpush.bf16.msra.mxu2 %v7670_v34 }
0x1122   :  { %v4379_v53 = vpop.f32.mrf.mxu1 }
0x112a   :  { %v4381_v43 = vpop.f32.mrf.mxu1 }
0x112b   :  { %v4141_v44 = vpop.f32.mrf.mxu3 }
0x1133   :  { %v4143_v46 = vpop.f32.mrf.mxu3 }
0x1134   :  { %v4208_v47 = vpack.c.bf16 %v4143_v46, %v4141_v44 }
0x1136   :  { %4364 = vmatmul.bf16.vlgmr.msra.gmra.mxu0 %v4208_v47 }
0x113b   :  { %v4155_v48 = vpop.f32.mrf.mxu3 }
0x1143   :  { %v4157_v50 = vpop.f32.mrf.mxu3 }
0x1144   :  { %v4209_v51 = vpack.c.bf16 %v4157_v50, %v4155_v48 }
0x1146   :  { %4392 = vmatmul.bf16.vlgmr.msrb.gmra.mxu2 %v4209_v51 }
0x11b3   :  { %v4365_v52 = vpop.f32.mrf.mxu0 }
0x11b4   :  { %v4366_v49 = vadd.f32 %v7786_v54, %v4365_v52 }
0x11b6   :  { %v4380_v61 = vadd.f32 %v4379_v53, %v4366_v49  ;;  %v7700_v49 = vld [vmem:[#allocation2 + $0xbc8] sm:$0xff] }
0x11bb   :  { %v4367_v55 = vpop.f32.mrf.mxu0 }
0x11bc   :  { %v4368_v56 = vadd.f32 %v7786_v54, %v4367_v55 }
0x11be   :  { %v4382_v11 = vadd.f32 %v4381_v43, %v4368_v56  ;;  %v7699_v56 = vld [vmem:[#allocation2 + $0xbc0] sm:$0xff] }
0x11bf   :  { %v7695_v43 = vld [vmem:[#allocation2 + $0xba0] sm:$0xff] }
0x11c9   :  { %v4393_v45 = vpop.f32.mrf.mxu2 }
0x11ca   :  { %v4394_v1 = vadd.f32 %v4393_v45, %v4380_v61  ;;  %v7701_v45 = vld [vmem:[#allocation2 + $0xbd0] sm:$0xff] }
0x11cb   :  { %v7697_v61 = vld [vmem:[#allocation2 + $0xbb0] sm:$0xff] }
0x11cc   :  { %v4398_v4 = vadd.f32 %v4394_v1, %v8203_v22  ;;  %v7683_v22 = vld [vmem:[#allocation2 + $0xb40] sm:$0xff]  ;;  %v7694_v1 = vld [vmem:[#allocation2 + $0xb98] sm:$0xff] }
0x11d1   :  { %v4395_v62 = vpop.f32.mrf.mxu2 }
0x11d2   :  { %v4396_v8 = vadd.f32 %v4395_v62, %v4382_v11  ;;  %v7787_v62 = vld [vmem:[#allocation4 + $0x98] ss:$0 sm:$0xff] }
0x11d4   :  { %v4399_v7 = vadd.f32 %v4396_v8, %v8207_v31  ;;  %v7667_v31 = vld [vmem:[#allocation2 + $0xac0] sm:$0xff] }
0x11d6   :  { %v4404_v9 = vpack.c.bf16 %v4399_v7, %v4398_v4 }
0x11d8   :  { %4428 = vmatpush.bf16.msrb.mxu3 %v4404_v9  ;;  %4467 = vmatpush.bf16.msrb.mxu0 %v4404_v9 }
0x11d9   :  { %4506 = vmatpush.bf16.msra.mxu1 %v4404_v9 }
0x11db   :  { %6981 = vmatmul.msk.bf16.vlgmr.msrb.gmra.mxu3 %vm1534_vm1, %v7656_v14  ;;  %6991 = vmatmul.msk.bf16.vlgmr.msrb.gmra.mxu0 %vm1534_vm1, %v7658_v13 }
0x11dc   :  { %4756 = vmatpush.bf16.msra.mxu0 %v7685_v5  ;;  %4718 = vmatpush.bf16.msra.mxu3 %v7669_v24 }
0x11dd   :  { %7001 = vmatmul.msk.bf16.vlgmr.msra.gmra.mxu1 %vm1534_vm1, %v7660_v16 }
0x11e0   :  { %4757 = vmatpush.bf16.msra.mxu0 %v7684_v57  ;;  %4719 = vmatpush.bf16.msra.mxu3 %v7668_v17 }
0x11e4   :  { %4758 = vmatpush.bf16.msra.mxu0 %v7683_v22  ;;  %4720 = vmatpush.bf16.msra.mxu3 %v7667_v31 }
0x11e8   :  { %4759 = vmatpush.bf16.msra.mxu0 %v7682_v19  ;;  %4721 = vmatpush.bf16.msra.mxu3 %v7666_v20 }
0x11eb   :  { %6982 = vmatmul.msk.bf16.gmra.mxu3 %vm1534_vm1, %v7657_v58  ;;  %6992 = vmatmul.msk.bf16.gmra.mxu0 %vm1534_vm1, %v7659_v23 }
0x11ec   :  { %4760 = vmatpush.bf16.msra.mxu0 %v7681_v21  ;;  %4722 = vmatpush.bf16.msra.mxu3 %v7665_v29 }
0x11ed   :  { %7002 = vmatmul.msk.bf16.gmra.mxu1 %vm1534_vm1, %v7661_v26 }
0x11f0   :  { %4761 = vmatpush.bf16.msra.mxu0 %v7680_v28  ;;  %4723 = vmatpush.bf16.msra.mxu3 %v7664_v33 }
0x11f4   :  { %4762 = vmatpush.bf16.msra.mxu0 %v7679_v32  ;;  %4724 = vmatpush.bf16.msra.mxu3 %v7663_v36 }
0x11f8   :  { %4763 = vmatpush.bf16.msra.mxu0 %v7678_v35  ;;  %4725 = vmatpush.bf16.msra.mxu3 %v7662_v2 }
0x11fc   :  { %5048 = vmatpush.bf16.msrb.mxu0 %v7701_v45  ;;  %v7688_v45 = vld [vmem:[#allocation2 + $0xb68] sm:$0xff] }
0x1200   :  { %5049 = vmatpush.bf16.msrb.mxu0 %v7700_v49  ;;  %v7705_v49 = vld [vmem:[#allocation2 + $0xbf0] sm:$0xff] }
0x1204   :  { %5050 = vmatpush.bf16.msrb.mxu0 %v7699_v56  ;;  %v7687_v56 = vld [vmem:[#allocation2 + $0xb60] sm:$0xff] }
0x1208   :  { %5051 = vmatpush.bf16.msrb.mxu0 %v7698_v60  ;;  %v7704_v60 = vld [vmem:[#allocation2 + $0xbe8] sm:$0xff] }
0x120c   :  { %5052 = vmatpush.bf16.msrb.mxu0 %v7697_v61  ;;  %v7686_v61 = vld [vmem:[#allocation2 + $0xb58] sm:$0xff] }
0x1210   :  { %5053 = vmatpush.bf16.msrb.mxu0 %v7696_v0  ;;  %v7703_v0 = vld [vmem:[#allocation2 + $0xbe0] sm:$0xff] }
0x1214   :  { %5054 = vmatpush.bf16.msrb.mxu0 %v7695_v43  ;;  %v7702_v43 = vld [vmem:[#allocation2 + $0xbd8] sm:$0xff] }
0x1218   :  { %5055 = vmatpush.bf16.msrb.mxu0 %v7694_v1 }
0x1258   :  { %v4469_v37 = vpop.f32.mrf.mxu0 }
0x125a   :  { %v4508_v39 = vpop.f32.mrf.mxu1 }
0x125e   :  { %v4430_v15 = vpop.f32.mrf.mxu3 }
0x1260   :  { %v4471_v40 = vpop.f32.mrf.mxu0 }
0x1261   :  { %v4567_v38 = vpack.c.bf16 %v4471_v40, %v4469_v37 }
0x1262   :  { %v4510_v25 = vpop.f32.mrf.mxu1 }
0x1263   :  { %v4568_v41 = vpack.c.bf16 %v4510_v25, %v4508_v39  ;;  %4745 = vmatmul.bf16.vlgmr.msra.gmra.mxu2 %v4567_v38 }
0x1265   :  { %4764 = vmatmul.bf16.vlgmr.msra.gmra.mxu0 %v4568_v41 }
0x1266   :  { %v4432_v42 = vpop.f32.mrf.mxu3 }
0x1267   :  { %v4566_v44 = vpack.c.bf16 %v4432_v42, %v4430_v15  ;;  %v8250_v42 = vld [vmem:[#allocation2 + $0x10] sm:$0xff] }
0x1268   :  { %v4474_v46 = vpop.f32.mrf.mxu0 }
0x1269   :  { %4726 = vmatmul.bf16.vlgmr.msra.gmra.mxu3 %v4566_v44  ;;  %v8258_v44 = vld [vmem:[#allocation2 + $0x18] sm:$0xff] }
0x126a   :  { %v4513_v47 = vpop.f32.mrf.mxu1 }
0x126e   :  { %v4435_v48 = vpop.f32.mrf.mxu3 }
0x1270   :  { %v4476_v50 = vpop.f32.mrf.mxu0 }
0x1271   :  { %v4570_v51 = vpack.c.bf16 %v4476_v50, %v4474_v46  ;;  %v7693_v46 = vld [vmem:[#allocation2 + $0xb90] sm:$0xff]  ;;  %v7691_v50 = vld [vmem:[#allocation2 + $0xb80] sm:$0xff] }
0x1272   :  { %v4515_v52 = vpop.f32.mrf.mxu1  ;;  %5029 = vmatpush.bf16.msrb.mxu2 %v7693_v46 }
0x1273   :  { %v4571_v53 = vpack.c.bf16 %v4515_v52, %v4513_v47  ;;  %4750 = vmatmul.bf16.gmra.mxu2 %v4570_v51  ;;  %v7692_v47 = vld [vmem:[#allocation2 + $0xb88] sm:$0xff]  ;;  %v7690_v52 = vld [vmem:[#allocation2 + $0xb78] sm:$0xff] }
0x1274   :  { %v7708_v51 = vld [vmem:[#allocation2 + $0xc08] sm:$0xff] }
0x1275   :  { %4769 = vmatmul.bf16.gmra.mxu0 %v4571_v53  ;;  %v7707_v53 = vld [vmem:[#allocation2 + $0xc00] sm:$0xff] }
0x1276   :  { %v4437_v54 = vpop.f32.mrf.mxu3  ;;  %5030 = vmatpush.bf16.msrb.mxu2 %v7692_v47 }
0x1277   :  { %v4569_v55 = vpack.c.bf16 %v4437_v54, %v4435_v48  ;;  %v7709_v48 = vld [vmem:[#allocation2 + $0xc10] sm:$0xff] }
0x1278   :  { %v7689_v54 = vld [vmem:[#allocation2 + $0xb70] sm:$0xff] }
0x1279   :  { %4731 = vmatmul.bf16.gmra.mxu3 %v4569_v55  ;;  %v7706_v55 = vld [vmem:[#allocation2 + $0xbf8] sm:$0xff] }
0x127a   :  { %5031 = vmatpush.bf16.msrb.mxu2 %v7691_v50 }
0x127e   :  { %5032 = vmatpush.bf16.msrb.mxu2 %v7690_v52 }
0x1282   :  { %5033 = vmatpush.bf16.msrb.mxu2 %v7689_v54 }
0x1286   :  { %5034 = vmatpush.bf16.msrb.mxu2 %v7688_v45 }
0x128a   :  { %5035 = vmatpush.bf16.msrb.mxu2 %v7687_v56 }
0x128e   :  { %5036 = vmatpush.bf16.msrb.mxu2 %v7686_v61 }
0x12e2   :  { %v4765_v8 = vpop.f32.mrf.mxu0 }
0x12e6   :  { %v4746_v11 = vpop.f32.mrf.mxu2 }
0x12ea   :  { %v4767_v24 = vpop.f32.mrf.mxu0 }
0x12ec   :  { %v4727_v6 = vpop.f32.mrf.mxu3 }
0x12ed   :  { %v4728_v4 = vadd.f32 %v7787_v62, %v4727_v6 }
0x12ee   :  { %v4748_v9 = vpop.f32.mrf.mxu2 }
0x12ef   :  { %v4747_v7 = vadd.f32 %v4746_v11, %v4728_v4  ;;  %v7725_v11 = vld [vmem:[#allocation2 + $0xc90] sm:$0xff] }
0x12f1   :  { %v4766_v5 = vadd.f32 %v4765_v8, %v4747_v7 }
0x12f2   :  { %v4770_v58 = vpop.f32.mrf.mxu0 }
0x12f3   :  { %v8231_v14 = vadd.f32 %v4766_v5, %v8038_v12 }
0x12f4   :  { %v4729_v10 = vpop.f32.mrf.mxu3 }
0x12f5   :  { %v4730_v13 = vadd.f32 %v7787_v62, %v4729_v10  ;;  %v4779_v57 = vmul.f32 0.999995, %v8231_v14 }
0x12f6   :  { %v4751_v22 = vpop.f32.mrf.mxu2 }
0x12f7   :  { %v4749_v16 = vadd.f32 %v4748_v9, %v4730_v13  ;;  %v4783_v19 = vmax.f32 %v4779_v57, 0.0 }
0x12f9   :  { %v4768_v17 = vadd.f32 %v4767_v24, %v4749_v16  ;;  %v4787_v27 = vmin.f32 %v4783_v19, 6.0  ;;  %v7720_v19 = vld [vmem:[#allocation2 + $0xc68] sm:$0xff] }
0x12fa   :  { %v4772_v35 = vpop.f32.mrf.mxu0 }
0x12fb   :  { %v8235_v18 = vadd.f32 %v4768_v17, %v8035_v63  ;;  %v7723_v17 = vld [vmem:[#allocation2 + $0xc80] sm:$0xff] }
0x12fc   :  { %v4732_v31 = vpop.f32.mrf.mxu3 }
0x12fd   :  { %v4780_v20 = vmul.f32 0.999995, %v8235_v18  ;;  %v4733_v21 = vadd.f32 %v7787_v62, %v4732_v31  ;;  %v7721_v31 = vld [vmem:[#allocation2 + $0xc70] sm:$0xff] }
0x12fe   :  { %v4753_v63 = vpop.f32.mrf.mxu2 }
0x12ff   :  { %v4784_v23 = vmax.f32 %v4780_v20, 0.0  ;;  %v4752_v26 = vadd.f32 %v4751_v22, %v4733_v21  ;;  %v7722_v22 = vld [vmem:[#allocation2 + $0xc78] sm:$0xff]  ;;  %v7719_v20 = vld [vmem:[#allocation2 + $0xc60] sm:$0xff] }
0x1300   :  { %v7718_v21 = vld [vmem:[#allocation2 + $0xc58] sm:$0xff] }
0x1301   :  { %v4788_v12 = vmin.f32 %v4784_v23, 6.0  ;;  %v4771_v28 = vadd.f32 %v4770_v58, %v4752_v26  ;;  %v7788_v23 = vld [vmem:[#allocation4 + $0xa0] ss:$0 sm:$0xff] }
0x1303   :  { %v4791_v29 = vpack.c.bf16 %v4788_v12, %v4787_v27  ;;  %v8239_v32 = vadd.f32 %v4771_v28, %v8032_v59  ;;  %v8246_v59 = vld [vmem:[#allocation2] sm:$0xff] }
0x1304   :  { %v4734_v30 = vpop.f32.mrf.mxu3 }
0x1305   :  { %v4735_v33 = vadd.f32 %v7787_v62, %v4734_v30  ;;  %5056 = vmatmul.bf16.vlgmr.msrb.gmra.mxu0 %v4791_v29  ;;  %v4781_v36 = vmul.f32 0.999995, %v8239_v32  ;;  %v7724_v62 = vld [vmem:[#allocation2 + $0xc88] sm:$0xff] }
0x1307   :  { %v4754_v34 = vadd.f32 %v4753_v63, %v4735_v33  ;;  %v4785_v39 = vmax.f32 %v4781_v36, 0.0 }
0x1309   :  { %v4773_v2 = vadd.f32 %v4772_v35, %v4754_v34  ;;  %v4789_v38 = vmin.f32 %v4785_v39, 6.0 }
0x130b   :  { %v8243_v37 = vadd.f32 %v4773_v2, %v8042_v3  ;;  %v8254_v3 = vld [vmem:[#allocation2 + $0x8] sm:$0xff] }
0x130d   :  { %v4782_v15 = vmul.f32 0.999995, %v8243_v37 }
0x130f   :  { %v4786_v40 = vmax.f32 %v4782_v15, 0.0 }
0x1311   :  { %v4790_v25 = vmin.f32 %v4786_v40, 6.0 }
0x1313   :  { %v4792_v41 = vpack.c.bf16 %v4790_v25, %v4789_v38 }
0x1315   :  { %4799 = vmatpush.bf16.msrb.mxu1 %v4792_v41  ;;  %4818 = vmatpush.bf16.msrb.mxu3 %v4792_v41 }
0x1316   :  { %5061 = vmatmul.bf16.gmra.mxu0 %v4792_v41 }
0x1319   :  { %4800 = vmatpush.bf16.msrb.mxu1 %v4791_v29  ;;  %4819 = vmatpush.bf16.msrb.mxu3 %v4791_v29 }
0x131c   :  { %7099 = vmatmul.msk.bf16.vlgmr.msrb.gmra.mxu1 %vm67_vm0, %v8246_v59  ;;  %7101 = vmatmul.msk.bf16.vlgmr.msrb.gmra.mxu3 %vm67_vm0, %v8250_v42 }
0x131d   :  { %5067 = vmatpush.bf16.msra.mxu1 %v7709_v48 }
0x1321   :  { %5068 = vmatpush.bf16.msra.mxu1 %v7708_v51 }
0x1325   :  { %5069 = vmatpush.bf16.msra.mxu1 %v7707_v53 }
0x1329   :  { %5070 = vmatpush.bf16.msra.mxu1 %v7706_v55 }
0x132c   :  { %7100 = vmatmul.msk.bf16.gmra.mxu1 %vm67_vm0, %v8254_v3  ;;  %7102 = vmatmul.msk.bf16.gmra.mxu3 %vm67_vm0, %v8258_v44 }
0x132d   :  { %5071 = vmatpush.bf16.msra.mxu1 %v7705_v49 }
0x1331   :  { %5072 = vmatpush.bf16.msra.mxu1 %v7704_v60 }
0x1335   :  { %5073 = vmatpush.bf16.msra.mxu1 %v7703_v0 }
0x1339   :  { %5074 = vmatpush.bf16.msra.mxu1 %v7702_v43 }
0x133d   :  { %5355 = vmatpush.bf16.msrb.mxu1 %v7725_v11 }
0x1341   :  { %5356 = vmatpush.bf16.msrb.mxu1 %v7724_v62 }
0x1345   :  { %5357 = vmatpush.bf16.msrb.mxu1 %v7723_v17  ;;  %v7726_v17 = vld [vmem:[#allocation2 + $0xc98] sm:$0xff] }
0x1349   :  { %5358 = vmatpush.bf16.msrb.mxu1 %v7722_v22  ;;  %v7741_v22 = vld [vmem:[#allocation2 + $0xd10] sm:$0xff] }
0x134d   :  { %5359 = vmatpush.bf16.msrb.mxu1 %v7721_v31 }
0x1351   :  { %5360 = vmatpush.bf16.msrb.mxu1 %v7720_v19 }
0x1355   :  { %5361 = vmatpush.bf16.msrb.mxu1 %v7719_v20 }
0x1359   :  { %5362 = vmatpush.bf16.msrb.mxu1 %v7718_v21 }
0x1382   :  { %v5057_v58 = vpop.f32.mrf.mxu0 }
0x138a   :  { %v5059_v29 = vpop.f32.mrf.mxu0 }
0x1393   :  { %v5062_v40 = vpop.f32.mrf.mxu0 }
0x1399   :  { %v4802_v1 = vpop.f32.mrf.mxu1 }
0x139b   :  { %v5064_v55 = vpop.f32.mrf.mxu0 }
0x139f   :  { %v4821_v8 = vpop.f32.mrf.mxu3 }
0x13a1   :  { %v4804_v6 = vpop.f32.mrf.mxu1 }
0x13a2   :  { %v4879_v4 = vpack.c.bf16 %v4804_v6, %v4802_v1  ;;  %v7733_v6 = vld [vmem:[#allocation2 + $0xcd0] sm:$0xff] }
0x13a4   :  { %5037 = vmatmul.bf16.vlgmr.msrb.gmra.mxu2 %v4879_v4  ;;  %v7716_v4 = vld [vmem:[#allocation2 + $0xc48] sm:$0xff] }
0x13a7   :  { %v4823_v7 = vpop.f32.mrf.mxu3 }
0x13a8   :  { %v4880_v5 = vpack.c.bf16 %v4823_v7, %v4821_v8  ;;  %v7717_v8 = vld [vmem:[#allocation2 + $0xc50] sm:$0xff]  ;;  %v7732_v7 = vld [vmem:[#allocation2 + $0xcc8] sm:$0xff] }
0x13a9   :  { %v4807_v9 = vpop.f32.mrf.mxu1  ;;  %5336 = vmatpush.bf16.msra.mxu0 %v7717_v8 }
0x13aa   :  { %5075 = vmatmul.bf16.vlgmr.msra.gmra.mxu1 %v4880_v5  ;;  %v7715_v5 = vld [vmem:[#allocation2 + $0xc40] sm:$0xff] }
0x13ad   :  { %5337 = vmatpush.bf16.msra.mxu0 %v7716_v4 }
0x13af   :  { %v4826_v24 = vpop.f32.mrf.mxu3 }
0x13b1   :  { %v4809_v10 = vpop.f32.mrf.mxu1  ;;  %5338 = vmatpush.bf16.msra.mxu0 %v7715_v5 }
0x13b2   :  { %v4881_v13 = vpack.c.bf16 %v4809_v10, %v4807_v9  ;;  %v7731_v9 = vld [vmem:[#allocation2 + $0xcc0] sm:$0xff]  ;;  %v7728_v10 = vld [vmem:[#allocation2 + $0xca8] sm:$0xff] }
0x13b4   :  { %5042 = vmatmul.bf16.gmra.mxu2 %v4881_v13  ;;  %v7711_v13 = vld [vmem:[#allocation2 + $0xc20] sm:$0xff] }
0x13b7   :  { %v4828_v16 = vpop.f32.mrf.mxu3 }
0x13b8   :  { %v4882_v57 = vpack.c.bf16 %v4828_v16, %v4826_v24  ;;  %v7729_v24 = vld [vmem:[#allocation2 + $0xcb0] sm:$0xff]  ;;  %v7727_v16 = vld [vmem:[#allocation2 + $0xca0] sm:$0xff] }
0x13ba   :  { %5080 = vmatmul.bf16.gmra.mxu1 %v4882_v57  ;;  %v7710_v57 = vld [vmem:[#allocation2 + $0xc18] sm:$0xff] }
0x1427   :  { %v5038_v26 = vpop.f32.mrf.mxu2  ;;  %v5076_v27 = vpop.f32.mrf.mxu1 }
0x1428   :  { %v5039_v12 = vadd.f32 %v7788_v23, %v5038_v26 }
0x142a   :  { %v5058_v28 = vadd.f32 %v5057_v58, %v5039_v12 }
0x142c   :  { %v5077_v30 = vadd.f32 %v5076_v27, %v5058_v28 }
0x142e   :  { %v5086_v35 = vmul.f32 0.999995, %v5077_v30 }
0x142f   :  { %v5040_v33 = vpop.f32.mrf.mxu2  ;;  %v5078_v63 = vpop.f32.mrf.mxu1 }
0x1430   :  { %v5041_v34 = vadd.f32 %v7788_v23, %v5040_v33  ;;  %v5090_v39 = vmax.f32 %v5086_v35, 0.0  ;;  %v7740_v33 = vld [vmem:[#allocation2 + $0xd08] sm:$0xff]  ;;  %v7737_v35 = vld [vmem:[#allocation2 + $0xcf0] sm:$0xff] }
0x1432   :  { %v5060_v36 = vadd.f32 %v5059_v29, %v5041_v34  ;;  %v5094_v47 = vmin.f32 %v5090_v39, 6.0  ;;  %v7738_v34 = vld [vmem:[#allocation2 + $0xcf8] sm:$0xff] }
0x1433   :  { %v7734_v39 = vld [vmem:[#allocation2 + $0xcd8] sm:$0xff] }
0x1434   :  { %v5079_v2 = vadd.f32 %v5078_v63, %v5060_v36  ;;  %v7739_v63 = vld [vmem:[#allocation2 + $0xd00] sm:$0xff]  ;;  %v7736_v36 = vld [vmem:[#allocation2 + $0xce8] sm:$0xff] }
0x1436   :  { %v5087_v15 = vmul.f32 0.999995, %v5079_v2  ;;  %v7735_v2 = vld [vmem:[#allocation2 + $0xce0] sm:$0xff] }
0x1437   :  { %v5043_v38 = vpop.f32.mrf.mxu2  ;;  %v5081_v46 = vpop.f32.mrf.mxu1 }
0x1438   :  { %v5091_v25 = vmax.f32 %v5087_v15, 0.0  ;;  %v5044_v41 = vadd.f32 %v7788_v23, %v5043_v38  ;;  %v7789_v15 = vld [vmem:[#allocation4 + $0xa8] ss:$0 sm:$0xff] }
0x143a   :  { %v5095_v48 = vmin.f32 %v5091_v25, 6.0  ;;  %v5063_v50 = vadd.f32 %v5062_v40, %v5044_v41 }
0x143c   :  { %v5098_v51 = vpack.c.bf16 %v5095_v48, %v5094_v47  ;;  %v5082_v52 = vadd.f32 %v5081_v46, %v5063_v50 }
0x143e   :  { %5363 = vmatmul.bf16.vlgmr.msrb.gmra.mxu1 %v5098_v51  ;;  %v5088_v45 = vmul.f32 0.999995, %v5082_v52 }
0x143f   :  { %v5045_v53 = vpop.f32.mrf.mxu2  ;;  %v5083_v56 = vpop.f32.mrf.mxu1 }
0x1440   :  { %v5046_v54 = vadd.f32 %v7788_v23, %v5045_v53  ;;  %v5092_v61 = vmax.f32 %v5088_v45, 0.0 }
0x1442   :  { %v5065_v49 = vadd.f32 %v5064_v55, %v5046_v54  ;;  %v5096_v1 = vmin.f32 %v5092_v61, 6.0 }
0x1444   :  { %v5084_v60 = vadd.f32 %v5083_v56, %v5065_v49 }
0x1446   :  { %v5089_v0 = vmul.f32 0.999995, %v5084_v60 }
0x1448   :  { %v5093_v43 = vmax.f32 %v5089_v0, 0.0 }
0x144a   :  { %v5097_v11 = vmin.f32 %v5093_v43, 6.0 }
0x144c   :  { %v5099_v62 = vpack.c.bf16 %v5097_v11, %v5096_v1 }
0x144e   :  { %5106 = vmatpush.bf16.msra.mxu3 %v5099_v62  ;;  %5125 = vmatpush.bf16.msra.mxu2 %v5099_v62 }
0x144f   :  { %5368 = vmatmul.bf16.gmra.mxu1 %v5099_v62 }
0x1452   :  { %5107 = vmatpush.bf16.msra.mxu3 %v5098_v51  ;;  %5126 = vmatpush.bf16.msra.mxu2 %v5098_v51 }
0x1455   :  { %7199 = vmatmul.msk.bf16.vlgmr.msra.gmra.mxu3 %vm67_vm0, %v8246_v59  ;;  %7201 = vmatmul.msk.bf16.vlgmr.msra.gmra.mxu2 %vm67_vm0, %v8250_v42  ;;  %v7714_v59 = vld [vmem:[#allocation2 + $0xc38] sm:$0xff] }
0x1456   :  { %5374 = vmatpush.bf16.msrb.mxu3 %v7733_v6  ;;  %v7730_v42 = vld [vmem:[#allocation2 + $0xcb8] sm:$0xff]  ;;  %5339 = vmatpush.bf16.msra.mxu0 %v7714_v59 }
0x1457   :  { %5477 = vmatpush.bf16.msrb.mxu2 %v7741_v22 }
0x145a   :  { %5375 = vmatpush.bf16.msrb.mxu3 %v7732_v7 }
0x145b   :  { %5478 = vmatpush.bf16.msrb.mxu2 %v7740_v33 }
0x145e   :  { %5376 = vmatpush.bf16.msrb.mxu3 %v7731_v9 }
0x145f   :  { %5479 = vmatpush.bf16.msrb.mxu2 %v7739_v63 }
0x1462   :  { %5377 = vmatpush.bf16.msrb.mxu3 %v7730_v42 }
0x1463   :  { %5480 = vmatpush.bf16.msrb.mxu2 %v7738_v34 }
0x1465   :  { %7200 = vmatmul.msk.bf16.gmra.mxu3 %vm67_vm0, %v8254_v3  ;;  %7202 = vmatmul.msk.bf16.gmra.mxu2 %vm67_vm0, %v8258_v44  ;;  %v7713_v3 = vld [vmem:[#allocation2 + $0xc30] sm:$0xff]  ;;  %v7712_v44 = vld [vmem:[#allocation2 + $0xc28] sm:$0xff] }
0x1466   :  { %5340 = vmatpush.bf16.msra.mxu0 %v7713_v3  ;;  %5378 = vmatpush.bf16.msrb.mxu3 %v7729_v24 }
0x1467   :  { %5481 = vmatpush.bf16.msrb.mxu2 %v7737_v35 }
0x146a   :  { %5341 = vmatpush.bf16.msra.mxu0 %v7712_v44  ;;  %5379 = vmatpush.bf16.msrb.mxu3 %v7728_v10 }
0x146b   :  { %5482 = vmatpush.bf16.msrb.mxu2 %v7736_v36 }
0x146e   :  { %5342 = vmatpush.bf16.msra.mxu0 %v7711_v13  ;;  %5380 = vmatpush.bf16.msrb.mxu3 %v7727_v16 }
0x146f   :  { %5483 = vmatpush.bf16.msrb.mxu2 %v7735_v2 }
0x1472   :  { %5343 = vmatpush.bf16.msra.mxu0 %v7710_v57  ;;  %5381 = vmatpush.bf16.msrb.mxu3 %v7726_v17 }
0x1473   :  { %5484 = vmatpush.bf16.msrb.mxu2 %v7734_v39 }
0x14bb   :  { %v5364_v40 = vpop.f32.mrf.mxu1 }
0x14c3   :  { %v5366_v48 = vpop.f32.mrf.mxu1 }
0x14cc   :  { %v5369_v61 = vpop.f32.mrf.mxu1 }
0x14d4   :  { %v5371_v59 = vpop.f32.mrf.mxu1 }
0x14d8   :  { %v5109_v31 = vpop.f32.mrf.mxu3  ;;  %v5128_v19 = vpop.f32.mrf.mxu2 }
0x14e0   :  { %v5111_v20 = vpop.f32.mrf.mxu3  ;;  %v5130_v21 = vpop.f32.mrf.mxu2 }
0x14e1   :  { %v5186_v58 = vpack.c.bf16 %v5111_v20, %v5109_v31  ;;  %v5187_v23 = vpack.c.bf16 %v5130_v21, %v5128_v19  ;;  %v7790_v31 = vld [vmem:[#allocation4 + $0xb0] ss:$0 sm:$0xff] }
0x14e3   :  { %5344 = vmatmul.bf16.vlgmr.msra.gmra.mxu0 %v5186_v58  ;;  %5382 = vmatmul.bf16.vlgmr.msrb.gmra.mxu3 %v5187_v23 }
0x14e8   :  { %v5114_v26 = vpop.f32.mrf.mxu3  ;;  %v5133_v27 = vpop.f32.mrf.mxu2 }
0x14f0   :  { %v5116_v12 = vpop.f32.mrf.mxu3  ;;  %v5135_v28 = vpop.f32.mrf.mxu2 }
0x14f1   :  { %v5188_v29 = vpack.c.bf16 %v5116_v12, %v5114_v26  ;;  %v5189_v30 = vpack.c.bf16 %v5135_v28, %v5133_v27 }
0x14f3   :  { %5349 = vmatmul.bf16.gmra.mxu0 %v5188_v29  ;;  %5387 = vmatmul.bf16.gmra.mxu3 %v5189_v30 }
0x1560   :  { %v5345_v38 = vpop.f32.mrf.mxu0 }
0x1561   :  { %v5346_v25 = vadd.f32 %v7789_v15, %v5345_v38 }
0x1563   :  { %v5365_v41 = vadd.f32 %v5364_v40, %v5346_v25 }
0x1566   :  { %v5383_v46 = vpop.f32.mrf.mxu3 }
0x1567   :  { %v5384_v47 = vadd.f32 %v5383_v46, %v5365_v41 }
0x1568   :  { %v5347_v50 = vpop.f32.mrf.mxu0 }
0x1569   :  { %v5348_v51 = vadd.f32 %v7789_v15, %v5347_v50  ;;  %v5393_v52 = vadd.f32 %v5384_v47, %v8231_v14 }
0x156b   :  { %v5367_v53 = vadd.f32 %v5366_v48, %v5348_v51  ;;  %v5397_v55 = vmul.f32 0.999995, %v5393_v52 }
0x156d   :  { %v5401_v0 = vmax.f32 %v5397_v55, 0.0 }
0x156e   :  { %v5385_v54 = vpop.f32.mrf.mxu3 }
0x156f   :  { %v5386_v45 = vadd.f32 %v5385_v54, %v5367_v53  ;;  %v5405_v8 = vmin.f32 %v5401_v0, 6.0 }
0x1570   :  { %v5350_v49 = vpop.f32.mrf.mxu0 }
0x1571   :  { %v5394_v56 = vadd.f32 %v5386_v45, %v8235_v18  ;;  %v5351_v60 = vadd.f32 %v7789_v15, %v5350_v49 }
0x1573   :  { %v5398_v43 = vmul.f32 0.999995, %v5394_v56  ;;  %v5370_v11 = vadd.f32 %v5369_v61, %v5351_v60 }
0x1575   :  { %v5402_v1 = vmax.f32 %v5398_v43, 0.0 }
0x1576   :  { %v5388_v62 = vpop.f32.mrf.mxu3 }
0x1577   :  { %v5406_v6 = vmin.f32 %v5402_v1, 6.0  ;;  %v5389_v4 = vadd.f32 %v5388_v62, %v5370_v11 }
0x1578   :  { %v5352_v7 = vpop.f32.mrf.mxu0 }
0x1579   :  { %v5425_v5 = vpack.c.bf16 %v5406_v6, %v5405_v8  ;;  %v5353_v14 = vadd.f32 %v7789_v15, %v5352_v7  ;;  %v5395_v9 = vadd.f32 %v5389_v4, %v8239_v32 }
0x157b   :  { %5485 = vmatmul.bf16.vlgmr.msrb.gmra.mxu2 %v5425_v5  ;;  %v5372_v42 = vadd.f32 %v5371_v59, %v5353_v14  ;;  %v5399_v18 = vmul.f32 0.999995, %v5395_v9 }
0x157d   :  { %v5403_v10 = vmax.f32 %v5399_v18, 0.0 }
0x157e   :  { %v5390_v3 = vpop.f32.mrf.mxu3 }
0x157f   :  { %v5391_v24 = vadd.f32 %v5390_v3, %v5372_v42  ;;  %v5407_v57 = vmin.f32 %v5403_v10, 6.0 }
0x1581   :  { %v5396_v44 = vadd.f32 %v5391_v24, %v8243_v37 }
0x1583   :  { %v5400_v13 = vmul.f32 0.999995, %v5396_v44 }
0x1585   :  { %v5404_v16 = vmax.f32 %v5400_v13, 0.0 }
0x1587   :  { %v5408_v17 = vmin.f32 %v5404_v16, 6.0 }
0x1589   :  { %v5426_v22 = vpack.c.bf16 %v5408_v17, %v5407_v57 }
0x158b   :  { %5490 = vmatmul.bf16.gmra.mxu2 %v5426_v22 }
0x15fe   :  { %v5486_v19 = vpop.f32.mrf.mxu2 }
0x15ff   :  { %v5487_v20 = vadd.f32 %v7790_v31, %v5486_v19 }
0x1601   :  { %5500 = vrot.lane.b32.xlu2 %v5487_v20, %s7911_s0 }
0x1606   :  { %v5488_v32 = vpop.f32.mrf.mxu2 }
0x1607   :  { %v5489_v21 = vadd.f32 %v7790_v31, %v5488_v32 }
0x1609   :  { %5502 = vrot.lane.b32.xlu0 %v5489_v21, %s7911_s0 }
0x160e   :  { %v5491_v58 = vpop.f32.mrf.mxu2 }
0x160f   :  { %v5492_v23 = vadd.f32 %v7790_v31, %v5491_v58 }
0x1611   :  { %5504 = vrot.lane.b32.xlu1 %v5492_v23, %s7911_s0 }
0x1616   :  { %v5493_v37 = vpop.f32.mrf.mxu2 }
0x1617   :  { %v5494_v26 = vadd.f32 %v7790_v31, %v5493_v37 }
0x1619   :  { %5506 = vrot.lane.b32.xlu2 %v5494_v26, %s7911_s0 }
0x165b   :  { %v5501_v27 = vpop.permute.xlu2 %5500 }
0x165c   :  { %v5512_v12 = vmax.f32 %v5487_v20, %v5501_v27 }
0x165e   :  { %5524 = vrot.lane.b32.xlu0 %v5512_v12, %s7915_s8  ;;  %v5516_v54 = vsub.f32 %v5487_v20, %v5512_v12 }
0x1660   :  { %v5540_v55 = vmul.f32 1.442695, %v5516_v54 }
0x1673   :  { %v5507_v28 = vpop.permute.xlu2 %5506 }
0x1674   :  { %v5515_v29 = vmax.f32 %v5494_v26, %v5507_v28 }
0x1676   :  { %5530 = vrot.lane.b32.xlu0 %v5515_v29, %s7915_s8  ;;  %v5519_v6 = vsub.f32 %v5494_v26, %v5515_v29 }
0x1678   :  { %v5546_v7 = vmul.f32 1.442695, %v5519_v6 }
0x167b   :  { %v5503_v30 = vpop.permute.xlu0 %5502 }
0x167c   :  { %v5513_v33 = vmax.f32 %v5489_v21, %v5503_v30 }
0x167e   :  { %5526 = vrot.lane.b32.xlu1 %v5513_v33, %s7915_s8  ;;  %v5517_v45 = vsub.f32 %v5489_v21, %v5513_v33 }
0x1680   :  { %v5542_v49 = vmul.f32 1.442695, %v5517_v45 }
0x1683   :  { %v5505_v63 = vpop.permute.xlu1 %5504 }
0x1684   :  { %v5514_v34 = vmax.f32 %v5492_v23, %v5505_v63 }
0x1686   :  { %5528 = vrot.lane.b32.xlu2 %v5514_v34, %s7915_s8  ;;  %v5518_v0 = vsub.f32 %v5492_v23, %v5514_v34 }
0x1688   :  { %v5544_v43 = vmul.f32 1.442695, %v5518_v0 }
0x16d0   :  { %v5525_v35 = vpop.permute.xlu0 %5524 }
0x16d1   :  { %v8282_v36 = vsub.f32 %v5487_v20, %v5525_v35 }
0x16d3   :  { %v5548_v2 = vmul.f32 1.442695, %v8282_v36 }
0x16d5   :  { %7823 = vpow2.f32 %v5548_v2 }
0x16db   :  { %v7824_v39 = vpop.eup %7823 }
0x16dc   :  { %5560 = vrot.lane.b32.xlu1 %v7824_v39, %s7911_s0 }
0x16e0   :  { %v5529_v15 = vpop.permute.xlu2 %5528 }
0x16e1   :  { %v8286_v40 = vsub.f32 %v5492_v23, %v5529_v15 }
0x16e3   :  { %v5552_v38 = vmul.f32 1.442695, %v8286_v40 }
0x16e5   :  { %7825 = vpow2.f32 %v5552_v38 }
0x16e8   :  { %v5531_v25 = vpop.permute.xlu0 %5530 }
0x16e9   :  { %v8289_v41 = vsub.f32 %v5494_v26, %v5531_v25 }
0x16eb   :  { %v7826_v46 = vpop.eup %7825  ;;  %v5554_v47 = vmul.f32 1.442695, %v8289_v41 }
0x16ec   :  { %5564 = vrot.lane.b32.xlu0 %v7826_v46, %s7911_s0 }
0x16ed   :  { %7827 = vpow2.f32 %v5554_v47 }
0x16f0   :  { %v5527_v48 = vpop.permute.xlu1 %5526 }
0x16f1   :  { %v5537_v50 = vsub.f32 %v5489_v21, %v5527_v48 }
0x16f3   :  { %v7828_v51 = vpop.eup %7827  ;;  %v5550_v52 = vmul.f32 1.442695, %v5537_v50 }
0x16f4   :  { %5566 = vrot.lane.b32.xlu1 %v7828_v51, %s7911_s0 }
0x16f5   :  { %7829 = vpow2.f32 %v5550_v52 }
0x16f6   :  { %7831 = vpow2.f32 %v5540_v55 }
0x16f7   :  { %7833 = vpow2.f32 %v5542_v49 }
0x16fb   :  { %v7830_v53 = vpop.eup %7829 }
0x16fc   :  { %5562 = vrot.lane.b32.xlu2 %v7830_v53, %s7911_s0  ;;  %v7832_v56 = vpop.eup %7831 }
0x16fd   :  { %v7834_v1 = vpop.eup %7833 }
0x174e   :  { %v5561_v60 = vpop.permute.xlu1 %5560 }
0x174f   :  { %v5572_v61 = vadd.f32 %v7832_v56, %v5561_v60 }
0x1751   :  { %7835 = vlog2.f32 %v5572_v61 }
0x1752   :  { %7837 = vpow2.f32 %v5544_v43 }
0x1756   :  { %v5563_v11 = vpop.permute.xlu2 %5562 }
0x1757   :  { %v7836_v62 = vpop.eup %7835  ;;  %v5573_v8 = vadd.f32 %v7834_v1, %v5563_v11 }
0x1758   :  { %v5577_v4 = vmul.f32 0.6931472, %v7836_v62  ;;  %v7838_v5 = vpop.eup %7837 }
0x1759   :  { %7839 = vlog2.f32 %v5573_v8 }
0x175a   :  { %5592 = vrot.lane.b32.xlu2 %v5577_v4, %s7915_s8  ;;  %7841 = vpow2.f32 %v5546_v7  ;;  %v5584_v17 = vsub.f32 %v5516_v54, %v5577_v4 }
0x175e   :  { %v5565_v14 = vpop.permute.xlu0 %5564 }
0x175f   :  { %v7840_v9 = vpop.eup %7839  ;;  %v5574_v59 = vadd.f32 %v7838_v5, %v5565_v14 }
0x1760   :  { %v5579_v42 = vmul.f32 0.6931472, %v7840_v9  ;;  %v7842_v3 = vpop.eup %7841 }
0x1761   :  { %7843 = vlog2.f32 %v5574_v59 }
0x1762   :  { %5594 = vrot.lane.b32.xlu0 %v5579_v42, %s7915_s8  ;;  %v5585_v23 = vsub.f32 %v5517_v45, %v5579_v42 }
0x1766   :  { %v5567_v18 = vpop.permute.xlu1 %5566 }
0x1767   :  { %v7844_v24 = vpop.eup %7843  ;;  %v5575_v44 = vadd.f32 %v7842_v3, %v5567_v18 }
0x1768   :  { %v5581_v10 = vmul.f32 0.6931472, %v7844_v24 }
0x1769   :  { %7845 = vlog2.f32 %v5575_v44 }
0x176a   :  { %5596 = vrot.lane.b32.xlu1 %v5581_v10, %s7915_s8  ;;  %v5586_v12 = vsub.f32 %v5518_v0, %v5581_v10 }
0x176f   :  { %v7846_v13 = vpop.eup %7845 }
0x1770   :  { %v5583_v16 = vmul.f32 0.6931472, %v7846_v13 }
0x1772   :  { %5598 = vrot.lane.b32.xlu2 %v5583_v16, %s7915_s8  ;;  %v5587_v20 = vsub.f32 %v5519_v6, %v5583_v16 }
0x17b4   :  { %v5593_v57 = vpop.permute.xlu2 %5592 }
0x17b5   :  { %v5604_v22 = vsub.f32 %v8282_v36, %v5593_v57 }
0x17b7   :  { %v5608_v31 = vsel %vm1534_vm1, %v5584_v17, %v5604_v22 }
0x17b8   :  { %5612 = vst.msk [vmem:[%s8325_s3] sm:$0xff] %vm67_vm0, %v5608_v31 }
0x17cc   :  { %v5599_v19 = vpop.permute.xlu2 %5598 }
0x17cd   :  { %v5607_v32 = vsub.f32 %v8289_v41, %v5599_v19 }
0x17cf   :  { %v5611_v21 = vsel %vm1534_vm1, %v5587_v20, %v5607_v32 }
0x17d0   :  { %5615 = vst.msk [vmem:[%s8325_s3 + $0x18] sm:$0xff] %vm67_vm0, %v5611_v21 }
0x17d4   :  { %v5595_v58 = vpop.permute.xlu0 %5594 }
0x17d5   :  { %v5605_v37 = vsub.f32 %v5537_v50, %v5595_v58 }
0x17d7   :  { %v5609_v26 = vsel %vm1534_vm1, %v5585_v23, %v5605_v37 }
0x17d8   :  { %5613 = vst.msk [vmem:[%s8325_s3 + $0x8] sm:$0xff] %vm67_vm0, %v5609_v26 }
0x17dc   :  { %v5597_v27 = vpop.permute.xlu1 %5596 }
0x17dd   :  { %v5606_v28 = vsub.f32 %v8286_v40, %v5597_v27 }
0x17df   :  { %v5610_v29 = vsel %vm1534_vm1, %v5586_v12, %v5606_v28 }
0x17e0   :  { %5614 = vst.msk [vmem:[%s8325_s3 + $0x10] sm:$0xff] %vm67_vm0, %v5610_v29 }
0x17e1   :  { %5620 = vsyncpa [#allocation3], 1 }
0x17e2   :  { %5621 = vsyncpa [#allocation5], 1 }

</bundles_post_ra>
